<compile_context>
chip_gen: v7x
topology: tpu7x:2x2x1
jax: 0.10.0
libtpu: 0.0.40
codegen_flags: <defaults>
</compile_context>

<pallas_src>
import functools

import numpy as np
import jax
import jax.numpy as jnp
from jax import lax
from jax.experimental import pallas as pl
from jax.experimental.pallas import tpu as pltpu

EPS_SMOOTH = 1e-5            # additive_smoothing eps
EPS_BN = 1e-5                # BatchNorm1d eps
ROW_TILE = 256               # contrastive row-block size (256 v7x, 256-512 v6e/v5e)

F32 = jnp.float32
BF16 = jnp.bfloat16
HIGH = lax.Precision.HIGHEST


def _vmem_spec():
    return pl.BlockSpec(memory_space=pltpu.MemorySpace.VMEM)


def _encode(x, w1, b1, w2, b2):
    """Linear -> ReLU -> BatchNorm1d(train) -> Linear -> row L2 normalize.

    Kept in f32 / HIGHEST MXU passes: this path feeds the exported membership
    tensor (tight tolerance).  For production, bf16 operands here are the next
    step once membership tolerances are validated.
    """
    h = jnp.dot(x, w1, preferred_element_type=F32, precision=HIGH) + b1
    h = jnp.maximum(h, 0.0)
    b = h.shape[0]
    inv_b = 1.0 / b
    ones_1b = jnp.ones((1, b), F32)
    # One-pass batch statistics via MXU ones-contractions (no (h-mean)^2 pass).
    mean = jnp.dot(ones_1b, h, preferred_element_type=F32, precision=HIGH) * inv_b
    ex2 = jnp.dot(ones_1b, h * h, preferred_element_type=F32, precision=HIGH) * inv_b
    var = ex2 - mean * mean
    hn = (h - mean) * lax.rsqrt(var + EPS_BN)          # gamma=1, beta=0 (train BN)
    z = jnp.dot(hn, w2, preferred_element_type=F32, precision=HIGH) + b2
    return z * lax.rsqrt(jnp.sum(z * z, axis=1, keepdims=True))


def fused_kernel(v1_ref, v2_ref, s_ref, centroid_ref,
                 w11_ref, b11_ref, w12_ref, b12_ref,
                 w21_ref, b21_ref, w22_ref, b22_ref,
                 wv1_ref, bv1_ref, wv2_ref, bv2_ref,
                 mem_ref, loss_ref,
                 *, alpha, gamma, k):
    # ---------------- view encoders (everything stays in VMEM) --------------
    f1 = _encode(v1_ref[...], w11_ref[...], b11_ref[...], w12_ref[...], b12_ref[...])
    f2 = _encode(v2_ref[...], w21_ref[...], b21_ref[...], w22_ref[...], b22_ref[...])
    B = f1.shape[0]

    s_row = s_ref[...]                                          # (1, B) lane-dense
    avg = jnp.sum(s_row, axis=1, keepdims=True) * (1.0 / B)     # (1, 1)

    # -------- similarity + fair soft membership (per view, unrolled) --------
    mems, e_sims = [], []
    for i, f in enumerate((f1, f2)):
        c = centroid_ref[i]                                     # (k, hid)
        sq_c = jnp.sum(c * c, axis=1, keepdims=True)            # (k, 1)
        cf = lax.dot_general(c, f, (((1,), (1,)), ((), ())),
                             preferred_element_type=F32, precision=HIGH)   # (k, B)
        # ||f_b||^2 == 1 exactly: rows of f were just L2-normalized.
        dist = sq_c + 1.0 - 2.0 * cf                            # ||c - f||^2
        sim = -dist
        e_sim = jnp.exp(sim)
        e_sims.append(e_sim)

        pre = e_sim + EPS_SMOOTH
        pre = pre * pl.reciprocal(jnp.sum(pre, axis=0, keepdims=True), approx=True)

        if alpha != 0.0:
            denom = jnp.sum(pre, axis=1, keepdims=True) + 1.0   # (k, 1)
            cr = lax.dot_general(pre, s_row, (((1,), (1,)), ((), ())),
                                 preferred_element_type=F32, precision=HIGH) / denom
            # outer product (k,1)*(1,B) -> broadcast multiply on the VPU
            fairness = (avg - cr) * (avg - s_row)
            m = jnp.exp(sim + alpha * fairness) + EPS_SMOOTH
        else:
            m = e_sim + EPS_SMOOTH
        m = m / jnp.sum(m, axis=0, keepdims=True)   # exact: membership is an output
        mem_ref[i, :, :] = m
        mems.append(m)

    m0, m1 = mems

    # ---------------- KL + hard-assignment losses ---------------------------
    # m0*log(m0/m1) + m1*log(m1/m0) == (m0-m1)*(log m0 - log m1): drops 2 divides.
    kl_cols = jnp.sum((m0 - m1) * (jnp.log(m0) - jnp.log(m1)), axis=0, keepdims=True)
    l_kl = jnp.mean(kl_cols)

    m_mean = 0.5 * (m0 + m1)                                    # (k, B)
    mx = jnp.max(m_mean, axis=0, keepdims=True)
    row_ids = lax.broadcasted_iota(jnp.int32, m_mean.shape, 0)
    first = jnp.min(jnp.where(m_mean == mx, row_ids, k), axis=0, keepdims=True)
    mem_hard = (row_ids == first).astype(F32)                   # one_hot(argmax)

    for e_sim in e_sims:
        # exp(-sim) == 1/exp(sim): reuse e_sim instead of a second (k,B) exp.
        l_kl = l_kl + gamma * jnp.mean(pl.reciprocal(e_sim, approx=False) * mem_hard)

    # ---------------- fairness loss L_F -------------------------------------
    denom = jnp.sum(m_mean, axis=1, keepdims=True) + 1.0
    cr = lax.dot_general(m_mean, s_row, (((1,), (1,)), ((), ())),
                         preferred_element_type=F32, precision=HIGH) / denom   # (k, 1)
    l_f = jnp.sqrt(jnp.sum((cr - avg) ** 2))

    # ---------------- weighted contrastive loss -----------------------------
    # Projection heads: bf16 operands on the MXU, f32 accumulation.
    p1 = jnp.dot(f1.astype(BF16), wv1_ref[...].astype(BF16),
                 preferred_element_type=F32) + bv1_ref[...]
    p2 = jnp.dot(f2.astype(BF16), wv2_ref[...].astype(BF16),
                 preferred_element_type=F32) + bv2_ref[...]
    p1n = p1 * lax.rsqrt(jnp.sum(p1 * p1, axis=1, keepdims=True))
    p2n = p2 * lax.rsqrt(jnp.sum(p2 * p2, axis=1, keepdims=True))
    P = p1.shape[1]
    ones_1p = jnp.ones((1, P), F32)
    # diag(csim) as a lane-dense (1,B) vector (no (B,B) iota mask).
    diag = jnp.exp(lax.dot_general(ones_1p, p1n * p2n, (((1,), (1,)), ((), ())),
                                   preferred_element_type=F32, precision=HIGH))

    # Unit-normalize soft-membership columns once: cosine gram == plain gram.
    inv_norm = lax.rsqrt(jnp.sum(m0 * m0 + m1 * m1, axis=0, keepdims=True))    # (1, B)
    m0n = (m0 * inv_norm).astype(BF16)
    m1n = (m1 * inv_norm).astype(BF16)
    p1nb = p1n.astype(BF16)
    p2nb = p2n.astype(BF16)

    # Row-block tiled accumulation of t = exp((1 - cos_mem) + proj_logits):
    # ONE fused exp per (tb,B) slab, peak live (tb,B) instead of several (B,B).
    # TODO(synk): at production B, shard this row-block axis across the two
    # v7x TensorCores via a parallel grid axis (requires splitting the fused call).
    ones_full = jnp.ones((1, B), F32)
    col_s = jnp.zeros((1, B), F32)
    row_pieces = []
    r0 = 0
    while r0 < B:                                   # static Python loop over row blocks
        tb = min(ROW_TILE, B - r0)
        cos_blk = (lax.dot_general(m0n[:, r0:r0 + tb], m0n, (((0,), (0,)), ((), ())),
                                   preferred_element_type=F32)
                   + lax.dot_general(m1n[:, r0:r0 + tb], m1n, (((0,), (0,)), ((), ())),
                                     preferred_element_type=F32))              # (tb, B)
        logit_blk = lax.dot_general(p1nb[r0:r0 + tb, :], p2nb, (((1,), (1,)), ((), ())),
                                    preferred_element_type=F32)                # (tb, B)
        t_blk = jnp.exp((1.0 - cos_blk) + logit_blk)                           # single exp
        col_s = col_s + jnp.dot(jnp.ones((1, tb), F32), t_blk,
                                preferred_element_type=F32, precision=HIGH)    # sum over rows
        row_pieces.append(lax.dot_general(ones_full, t_blk, (((1,), (1,)), ((), ())),
                                          preferred_element_type=F32,
                                          precision=HIGH))                     # (1, tb) row sums
        r0 += tb
    row_s = row_pieces[0] if len(row_pieces) == 1 else jnp.concatenate(row_pieces, axis=1)
    l_c = jnp.mean(jnp.log((col_s + row_s) / (diag * float(B))))

    # ---- pack the three scalar losses into a single lane-dense (1,128) tile ----
    lane = lax.broadcasted_iota(jnp.int32, (1, 128), 1)
    loss_ref[...] = ((lane == 0).astype(F32) * l_kl
                     + (lane == 1).astype(F32) * l_c
                     + (lane == 2).astype(F32) * l_f)


# --------------------------------------------------------------------------
# Forward wrapper: ONE pallas_call for the whole forward pass.
# --------------------------------------------------------------------------
def _pad_last(a, target):
    pad = target - a.shape[-1]
    return a if pad <= 0 else jnp.pad(a, [(0, 0)] * (a.ndim - 1) + [(0, pad)])


def _pad_first(a, target):
    pad = target - a.shape[0]
    return a if pad <= 0 else jnp.pad(a, [(0, pad)] + [(0, 0)] * (a.ndim - 1))


def mv_clustering_forward(v1, v2, s, centroid, params, *, alpha, beta, gamma, k):
    (w11, b11, w12, b12, w21, b21, w22, b22, wv1, bv1, wv2, bv2) = params
    # Sensitive attribute lane-dense as (1, B)  (num_s == 1, matches s.reshape(-1,1)).
    s_row = s.reshape(1, -1).astype(jnp.float32)
    B = v1.shape[0]

    # Zero-pad the 200-wide hidden / projection widths to a multiple of 128.
    # Exact: padded hidden columns are 0 -> ReLU 0 -> BN-of-zero 0, and the
    # padded rows / output columns carry zero weights and zero bias.
    hpad = ((w11.shape[1] + 127) // 128) * 128
    w11p, b11p, w12p = _pad_last(w11, hpad), _pad_last(b11, hpad), _pad_first(w12, hpad)
    w21p, b21p, w22p = _pad_last(w21, hpad), _pad_last(b21, hpad), _pad_first(w22, hpad)
    ppad = ((wv1.shape[1] + 127) // 128) * 128
    wv1p, bv1p = _pad_last(wv1, ppad), _pad_last(bv1, ppad)
    wv2p, bv2p = _pad_last(wv2, ppad), _pad_last(bv2, ppad)

    mem, losses = pl.pallas_call(
        functools.partial(fused_kernel, alpha=alpha, gamma=gamma, k=k),
        out_shape=(jax.ShapeDtypeStruct((2, k, B), jnp.float32),
                   jax.ShapeDtypeStruct((1, 128), jnp.float32)),
        in_specs=[_vmem_spec() for _ in range(16)],
        out_specs=(_vmem_spec(), _vmem_spec()),
        compiler_params=pltpu.CompilerParams(vmem_limit_bytes=32 * 1024 * 1024),
    )(v1, v2, s_row, centroid,
      w11p, b11p, w12p, b12, w21p, b21p, w22p, b22, wv1p, bv1p, wv2p, bv2p)

    return [losses[0, 0], beta * losses[0, 1], alpha * losses[0, 2]], mem


# --------------------------------------------------------------------------
# Pure-JAX reference (mirrors the PyTorch forward) for the correctness check
# --------------------------------------------------------------------------
def _ref_encode(x, w1, b1, w2, b2):
    h = jnp.maximum(jnp.dot(x, w1, precision=HIGH) + b1, 0.0)
    mean = h.mean(0, keepdims=True)
    var = ((h - mean) ** 2).mean(0, keepdims=True)
    hn = (h - mean) / jnp.sqrt(var + EPS_BN)
    z = jnp.dot(hn, w2, precision=HIGH) + b2
    return z / jnp.linalg.norm(z, axis=1, keepdims=True)


def _ref_forward(v1, v2, s, centroid, params, *, alpha, beta, gamma, k):
    (w11, b11, w12, b12, w21, b21, w22, b22, wv1, bv1, wv2, bv2) = params
    if s.ndim == 1:
        s = s.reshape(-1, 1)
    B = v1.shape[0]
    v1f = _ref_encode(v1, w11, b11, w12, b12)
    v2f = _ref_encode(v2, w21, b21, w22, b22)
    feature = jnp.stack([v1f, v2f])
    avg = s.mean(0)                                                  # (1,)
    sims, mems = [], []
    for i in range(2):
        c, f = centroid[i], feature[i]
        dist = ((c[:, None, :] - f[None, :, :]) ** 2).sum(2)
        sim = -dist
        pre = jnp.exp(sim) + EPS_SMOOTH
        pre = pre / pre.sum(0, keepdims=True)
        cr = jnp.dot(pre, s, precision=HIGH) / (pre.sum(1, keepdims=True) + 1.0)
        fairness = (avg - cr) @ (avg - s).T
        m = jnp.exp(sim + alpha * fairness) + EPS_SMOOTH
        m = m / m.sum(0, keepdims=True)
        sims.append(sim)
        mems.append(m)
    membership = jnp.stack(mems)
    similarity = jnp.stack(sims)
    kl = lambda p, q: (p * jnp.log(p / q)).sum(0).mean()
    L_kl = kl(membership[0], membership[1]) + kl(membership[1], membership[0])
    m_mean = membership.mean(0)
    hard = jax.nn.one_hot(jnp.argmax(m_mean, axis=0), k).T
    for i in range(2):
        L_kl = L_kl + gamma * (jnp.exp(-similarity[i]) * hard).mean()
    soft_mem = membership.reshape(2 * k, -1).T
    cossim = lambda a, b: (a @ b.T) / (jnp.linalg.norm(a, axis=1, keepdims=True)
                                       * jnp.linalg.norm(b, axis=1, keepdims=True).T)
    sim_w = jnp.exp(1.0 - cossim(soft_mem, soft_mem))
    csim = jnp.exp(cossim(v1f @ wv1 + bv1, v2f @ wv2 + bv2))
    t = sim_w * csim
    L_c = jnp.mean(jnp.log((t.sum(0) + t.sum(1)) / (jnp.diag(csim) * B)))
    avg_col = s.mean(0).reshape(-1, 1)
    soft_membership = m_mean.T
    cr = jnp.dot(soft_membership.T, s, precision=HIGH) / (soft_membership.sum(0) + 1).reshape(-1, 1)
    L_F = jnp.linalg.norm(cr - avg_col)
    return [L_kl, beta * L_c, alpha * L_F], membership


# --------------------------------------------------------------------------
if __name__ == "__main__":
    B, D1, D2, HID, K = 8, 64, 32, 32, 5
    ALPHA, BETA, GAMMA = 0.1, 0.01, 1.0

    key = jax.random.PRNGKey(0)
    ks = jax.random.split(key, 12)

    def make_linear(k_, fan_in, fan_out):
        kw, kb = jax.random.split(k_)
        bound = 1.0 / np.sqrt(fan_in)
        w = jax.random.uniform(kw, (fan_in, fan_out), jnp.float32, -bound, bound)
        b = jax.random.uniform(kb, (1, fan_out), jnp.float32, -bound, bound)
        return w, b

    w11, b11 = make_linear(ks[0], D1, 200)     # first_view Linear(d_1, 200)
    w12, b12 = make_linear(ks[1], 200, HID)    # first_view Linear(200, hid)
    w21, b21 = make_linear(ks[2], D2, 200)     # second_view Linear(d_2, 200)
    w22, b22 = make_linear(ks[3], 200, HID)    # second_view Linear(200, hid)
    wv1, bv1 = make_linear(ks[4], HID, 200)    # projection head v1
    wv2, bv2 = make_linear(ks[5], HID, 200)    # projection head v2
    params = (w11, b11, w12, b12, w21, b21, w22, b22, wv1, bv1, wv2, bv2)
    # TODO(synk): decoder / attention module / weight_net are unused in the
    # default forward path (mode='contra'), so they are not instantiated here.

    v1 = jax.random.normal(ks[6], (B, D1), jnp.float32)
    v2 = jax.random.normal(ks[7], (B, D2), jnp.float32)
    s = (jax.random.uniform(ks[8], (B,)) < 0.5).astype(jnp.float32)   # sensitive attr
    centroid = jax.random.normal(ks[9], (2, K, HID), jnp.float32)
    centroid = centroid / jnp.linalg.norm(centroid, axis=-1, keepdims=True)

    losses, membership = mv_clustering_forward(
        v1, v2, s, centroid, params, alpha=ALPHA, beta=BETA, gamma=GAMMA, k=K)
    membership = jax.block_until_ready(membership)
    losses = [jax.block_until_ready(l) for l in losses]

    ref_losses, ref_membership = _ref_forward(
        v1, v2, s, centroid, params, alpha=ALPHA, beta=BETA, gamma=GAMMA, k=K)

    np.testing.assert_allclose(np.asarray(membership), np.asarray(ref_membership),
                               rtol=1e-2, atol=1e-3)
    for got, exp in zip(losses, ref_losses):
        np.testing.assert_allclose(np.asarray(got), np.asarray(exp),
                                   rtol=2e-2, atol=2e-3)
        assert np.isfinite(np.asarray(got)).all()

    print("KERNEL_OK")
</pallas_src>

<mosaic_0001>
module attributes {stable_mosaic.version = 11 : i64} {
  func.func @fused_kernel(%arg0: memref<8x64xf32, #tpu.memory_space<vmem>>, %arg1: memref<8x32xf32, #tpu.memory_space<vmem>>, %arg2: memref<1x8xf32, #tpu.memory_space<vmem>>, %arg3: memref<2x5x32xf32, #tpu.memory_space<vmem>>, %arg4: memref<64x256xf32, #tpu.memory_space<vmem>>, %arg5: memref<1x256xf32, #tpu.memory_space<vmem>>, %arg6: memref<256x32xf32, #tpu.memory_space<vmem>>, %arg7: memref<1x32xf32, #tpu.memory_space<vmem>>, %arg8: memref<32x256xf32, #tpu.memory_space<vmem>>, %arg9: memref<1x256xf32, #tpu.memory_space<vmem>>, %arg10: memref<256x32xf32, #tpu.memory_space<vmem>>, %arg11: memref<1x32xf32, #tpu.memory_space<vmem>>, %arg12: memref<32x256xf32, #tpu.memory_space<vmem>>, %arg13: memref<1x256xf32, #tpu.memory_space<vmem>>, %arg14: memref<32x256xf32, #tpu.memory_space<vmem>>, %arg15: memref<1x256xf32, #tpu.memory_space<vmem>>, %arg16: memref<2x5x8xf32, #tpu.memory_space<vmem>>, %arg17: memref<1x128xf32, #tpu.memory_space<vmem>>) attributes {dimension_semantics = [], scalar_prefetch = 0 : i64, scratch_operands = 0 : i64, tpu.core_type = #tpu.core_type<tc>} {
    %c0 = arith.constant 0 : index
    %c0_0 = arith.constant 0 : index
    %0 = vector.load %arg0[%c0, %c0_0] : memref<8x64xf32, #tpu.memory_space<vmem>>, vector<8x64xf32>
    %c0_1 = arith.constant 0 : index
    %c0_2 = arith.constant 0 : index
    %1 = vector.load %arg4[%c0_1, %c0_2] : memref<64x256xf32, #tpu.memory_space<vmem>>, vector<64x256xf32>
    %c0_3 = arith.constant 0 : index
    %c0_4 = arith.constant 0 : index
    %2 = vector.load %arg5[%c0_3, %c0_4] : memref<1x256xf32, #tpu.memory_space<vmem>>, vector<1x256xf32>
    %c0_5 = arith.constant 0 : index
    %c0_6 = arith.constant 0 : index
    %3 = vector.load %arg6[%c0_5, %c0_6] : memref<256x32xf32, #tpu.memory_space<vmem>>, vector<256x32xf32>
    %c0_7 = arith.constant 0 : index
    %c0_8 = arith.constant 0 : index
    %4 = vector.load %arg7[%c0_7, %c0_8] : memref<1x32xf32, #tpu.memory_space<vmem>>, vector<1x32xf32>
    %cst = arith.constant dense<0.000000e+00> : vector<8x256xf32>
    %5 = tpu.matmul %0, %1, %cst {dimension_numbers = #tpu.dot_dimension_numbers<[1], [0], [0], [1], [0, 0, 1, 1], [], []>, precision = #tpu.contract_precision<fp32>} : vector<8x64xf32>, vector<64x256xf32>, vector<8x256xf32> -> vector<8x256xf32>
    %6 = vector.broadcast %2 : vector<1x256xf32> to vector<8x256xf32>
    %7 = arith.addf %5, %6 : vector<8x256xf32>
    %cst_9 = arith.constant 0.000000e+00 : f32
    %8 = vector.broadcast %cst_9 : f32 to vector<8x256xf32>
    %9 = arith.maximumf %7, %8 : vector<8x256xf32>
    %cst_10 = arith.constant 1.000000e+00 : f32
    %10 = vector.broadcast %cst_10 : f32 to vector<1x8xf32>
    %cst_11 = arith.constant dense<0.000000e+00> : vector<1x256xf32>
    %11 = tpu.matmul %10, %9, %cst_11 {dimension_numbers = #tpu.dot_dimension_numbers<[1], [0], [0], [1], [0, 0, 1, 1], [], []>, precision = #tpu.contract_precision<fp32>} : vector<1x8xf32>, vector<8x256xf32>, vector<1x256xf32> -> vector<1x256xf32>
    %cst_12 = arith.constant 1.250000e-01 : f32
    %12 = vector.broadcast %cst_12 : f32 to vector<1x256xf32>
    %13 = arith.mulf %11, %12 : vector<1x256xf32>
    %14 = arith.mulf %9, %9 : vector<8x256xf32>
    %cst_13 = arith.constant dense<0.000000e+00> : vector<1x256xf32>
    %15 = tpu.matmul %10, %14, %cst_13 {dimension_numbers = #tpu.dot_dimension_numbers<[1], [0], [0], [1], [0, 0, 1, 1], [], []>, precision = #tpu.contract_precision<fp32>} : vector<1x8xf32>, vector<8x256xf32>, vector<1x256xf32> -> vector<1x256xf32>
    %cst_14 = arith.constant 1.250000e-01 : f32
    %16 = vector.broadcast %cst_14 : f32 to vector<1x256xf32>
    %17 = arith.mulf %15, %16 : vector<1x256xf32>
    %18 = arith.mulf %13, %13 : vector<1x256xf32>
    %19 = arith.subf %17, %18 : vector<1x256xf32>
    %20 = vector.broadcast %13 : vector<1x256xf32> to vector<8x256xf32>
    %21 = arith.subf %9, %20 : vector<8x256xf32>
    %cst_15 = arith.constant 9.99999974E-6 : f32
    %22 = vector.broadcast %cst_15 : f32 to vector<1x256xf32>
    %23 = arith.addf %19, %22 : vector<1x256xf32>
    %24 = math.rsqrt %23 : vector<1x256xf32>
    %25 = vector.broadcast %24 : vector<1x256xf32> to vector<8x256xf32>
    %26 = arith.mulf %21, %25 : vector<8x256xf32>
    %cst_16 = arith.constant dense<0.000000e+00> : vector<8x32xf32>
    %27 = tpu.matmul %26, %3, %cst_16 {dimension_numbers = #tpu.dot_dimension_numbers<[1], [0], [0], [1], [0, 0, 1, 1], [], []>, precision = #tpu.contract_precision<fp32>} : vector<8x256xf32>, vector<256x32xf32>, vector<8x32xf32> -> vector<8x32xf32>
    %28 = vector.broadcast %4 : vector<1x32xf32> to vector<8x32xf32>
    %29 = arith.addf %27, %28 : vector<8x32xf32>
    %30 = arith.mulf %29, %29 : vector<8x32xf32>
    %cst_17 = arith.constant dense<0.000000e+00> : vector<8xf32>
    %31 = vector.multi_reduction <add>, %30, %cst_17 [1] : vector<8x32xf32> to vector<8xf32>
    %32 = vector.shape_cast %31 : vector<8xf32> to vector<8x1xf32>
    %33 = math.rsqrt %32 : vector<8x1xf32>
    %34 = vector.broadcast %33 : vector<8x1xf32> to vector<8x32xf32>
    %35 = arith.mulf %29, %34 : vector<8x32xf32>
    %c0_18 = arith.constant 0 : index
    %c0_19 = arith.constant 0 : index
    %36 = vector.load %arg1[%c0_18, %c0_19] : memref<8x32xf32, #tpu.memory_space<vmem>>, vector<8x32xf32>
    %c0_20 = arith.constant 0 : index
    %c0_21 = arith.constant 0 : index
    %37 = vector.load %arg8[%c0_20, %c0_21] : memref<32x256xf32, #tpu.memory_space<vmem>>, vector<32x256xf32>
    %c0_22 = arith.constant 0 : index
    %c0_23 = arith.constant 0 : index
    %38 = vector.load %arg9[%c0_22, %c0_23] : memref<1x256xf32, #tpu.memory_space<vmem>>, vector<1x256xf32>
    %c0_24 = arith.constant 0 : index
    %c0_25 = arith.constant 0 : index
    %39 = vector.load %arg10[%c0_24, %c0_25] : memref<256x32xf32, #tpu.memory_space<vmem>>, vector<256x32xf32>
    %c0_26 = arith.constant 0 : index
    %c0_27 = arith.constant 0 : index
    %40 = vector.load %arg11[%c0_26, %c0_27] : memref<1x32xf32, #tpu.memory_space<vmem>>, vector<1x32xf32>
    %cst_28 = arith.constant dense<0.000000e+00> : vector<8x256xf32>
    %41 = tpu.matmul %36, %37, %cst_28 {dimension_numbers = #tpu.dot_dimension_numbers<[1], [0], [0], [1], [0, 0, 1, 1], [], []>, precision = #tpu.contract_precision<fp32>} : vector<8x32xf32>, vector<32x256xf32>, vector<8x256xf32> -> vector<8x256xf32>
    %42 = vector.broadcast %38 : vector<1x256xf32> to vector<8x256xf32>
    %43 = arith.addf %41, %42 : vector<8x256xf32>
    %cst_29 = arith.constant 0.000000e+00 : f32
    %44 = vector.broadcast %cst_29 : f32 to vector<8x256xf32>
    %45 = arith.maximumf %43, %44 : vector<8x256xf32>
    %cst_30 = arith.constant 1.000000e+00 : f32
    %46 = vector.broadcast %cst_30 : f32 to vector<1x8xf32>
    %cst_31 = arith.constant dense<0.000000e+00> : vector<1x256xf32>
    %47 = tpu.matmul %46, %45, %cst_31 {dimension_numbers = #tpu.dot_dimension_numbers<[1], [0], [0], [1], [0, 0, 1, 1], [], []>, precision = #tpu.contract_precision<fp32>} : vector<1x8xf32>, vector<8x256xf32>, vector<1x256xf32> -> vector<1x256xf32>
    %cst_32 = arith.constant 1.250000e-01 : f32
    %48 = vector.broadcast %cst_32 : f32 to vector<1x256xf32>
    %49 = arith.mulf %47, %48 : vector<1x256xf32>
    %50 = arith.mulf %45, %45 : vector<8x256xf32>
    %cst_33 = arith.constant dense<0.000000e+00> : vector<1x256xf32>
    %51 = tpu.matmul %46, %50, %cst_33 {dimension_numbers = #tpu.dot_dimension_numbers<[1], [0], [0], [1], [0, 0, 1, 1], [], []>, precision = #tpu.contract_precision<fp32>} : vector<1x8xf32>, vector<8x256xf32>, vector<1x256xf32> -> vector<1x256xf32>
    %cst_34 = arith.constant 1.250000e-01 : f32
    %52 = vector.broadcast %cst_34 : f32 to vector<1x256xf32>
    %53 = arith.mulf %51, %52 : vector<1x256xf32>
    %54 = arith.mulf %49, %49 : vector<1x256xf32>
    %55 = arith.subf %53, %54 : vector<1x256xf32>
    %56 = vector.broadcast %49 : vector<1x256xf32> to vector<8x256xf32>
    %57 = arith.subf %45, %56 : vector<8x256xf32>
    %cst_35 = arith.constant 9.99999974E-6 : f32
    %58 = vector.broadcast %cst_35 : f32 to vector<1x256xf32>
    %59 = arith.addf %55, %58 : vector<1x256xf32>
    %60 = math.rsqrt %59 : vector<1x256xf32>
    %61 = vector.broadcast %60 : vector<1x256xf32> to vector<8x256xf32>
    %62 = arith.mulf %57, %61 : vector<8x256xf32>
    %cst_36 = arith.constant dense<0.000000e+00> : vector<8x32xf32>
    %63 = tpu.matmul %62, %39, %cst_36 {dimension_numbers = #tpu.dot_dimension_numbers<[1], [0], [0], [1], [0, 0, 1, 1], [], []>, precision = #tpu.contract_precision<fp32>} : vector<8x256xf32>, vector<256x32xf32>, vector<8x32xf32> -> vector<8x32xf32>
    %64 = vector.broadcast %40 : vector<1x32xf32> to vector<8x32xf32>
    %65 = arith.addf %63, %64 : vector<8x32xf32>
    %66 = arith.mulf %65, %65 : vector<8x32xf32>
    %cst_37 = arith.constant dense<0.000000e+00> : vector<8xf32>
    %67 = vector.multi_reduction <add>, %66, %cst_37 [1] : vector<8x32xf32> to vector<8xf32>
    %68 = vector.shape_cast %67 : vector<8xf32> to vector<8x1xf32>
    %69 = math.rsqrt %68 : vector<8x1xf32>
    %70 = vector.broadcast %69 : vector<8x1xf32> to vector<8x32xf32>
    %71 = arith.mulf %65, %70 : vector<8x32xf32>
    %c0_38 = arith.constant 0 : index
    %c0_39 = arith.constant 0 : index
    %72 = vector.load %arg2[%c0_38, %c0_39] : memref<1x8xf32, #tpu.memory_space<vmem>>, vector<1x8xf32>
    %cst_40 = arith.constant dense<0.000000e+00> : vector<1xf32>
    %73 = vector.multi_reduction <add>, %72, %cst_40 [1] : vector<1x8xf32> to vector<1xf32>
    %74 = vector.shape_cast %73 : vector<1xf32> to vector<1x1xf32>
    %cst_41 = arith.constant 1.250000e-01 : f32
    %75 = vector.broadcast %cst_41 : f32 to vector<1x1xf32>
    %76 = arith.mulf %74, %75 : vector<1x1xf32>
    %c0_42 = arith.constant 0 : index
    %c0_43 = arith.constant 0 : index
    %c0_44 = arith.constant 0 : index
    %77 = vector.load %arg3[%c0_42, %c0_43, %c0_44] : memref<2x5x32xf32, #tpu.memory_space<vmem>>, vector<1x5x32xf32>
    %78 = vector.shape_cast %77 : vector<1x5x32xf32> to vector<5x32xf32>
    %79 = arith.mulf %78, %78 : vector<5x32xf32>
    %cst_45 = arith.constant dense<0.000000e+00> : vector<5xf32>
    %80 = vector.multi_reduction <add>, %79, %cst_45 [1] : vector<5x32xf32> to vector<5xf32>
    %81 = vector.shape_cast %80 : vector<5xf32> to vector<5x1xf32>
    %cst_46 = arith.constant dense<0.000000e+00> : vector<5x8xf32>
    %82 = tpu.matmul %78, %35, %cst_46 {dimension_numbers = #tpu.dot_dimension_numbers<[1], [1], [0], [0], [0, 0, 1, 0], [], []>, precision = #tpu.contract_precision<fp32>} : vector<5x32xf32>, vector<8x32xf32>, vector<5x8xf32> -> vector<5x8xf32>
    %cst_47 = arith.constant 1.000000e+00 : f32
    %83 = vector.broadcast %cst_47 : f32 to vector<5x1xf32>
    %84 = arith.addf %81, %83 : vector<5x1xf32>
    %cst_48 = arith.constant 2.000000e+00 : f32
    %85 = vector.broadcast %cst_48 : f32 to vector<5x8xf32>
    %86 = arith.mulf %85, %82 : vector<5x8xf32>
    %87 = vector.broadcast %84 : vector<5x1xf32> to vector<5x8xf32>
    %88 = arith.subf %87, %86 : vector<5x8xf32>
    %cst_49 = arith.constant 0.000000e+00 : f32
    %89 = vector.broadcast %cst_49 : f32 to vector<5x8xf32>
    %90 = arith.subf %89, %88 : vector<5x8xf32>
    %91 = math.exp %90 : vector<5x8xf32>
    %cst_50 = arith.constant 9.99999974E-6 : f32
    %92 = vector.broadcast %cst_50 : f32 to vector<5x8xf32>
    %93 = arith.addf %91, %92 : vector<5x8xf32>
    %cst_51 = arith.constant dense<0.000000e+00> : vector<8xf32>
    %94 = vector.multi_reduction <add>, %93, %cst_51 [0] : vector<5x8xf32> to vector<8xf32>
    %95 = vector.shape_cast %94 : vector<8xf32> to vector<1x8xf32>
    %96 = tpu.reciprocal %95 {approx = true} : vector<1x8xf32> -> vector<1x8xf32>
    %97 = vector.broadcast %96 : vector<1x8xf32> to vector<5x8xf32>
    %98 = arith.mulf %93, %97 : vector<5x8xf32>
    %cst_52 = arith.constant dense<0.000000e+00> : vector<5xf32>
    %99 = vector.multi_reduction <add>, %98, %cst_52 [1] : vector<5x8xf32> to vector<5xf32>
    %100 = vector.shape_cast %99 : vector<5xf32> to vector<5x1xf32>
    %cst_53 = arith.constant 1.000000e+00 : f32
    %101 = vector.broadcast %cst_53 : f32 to vector<5x1xf32>
    %102 = arith.addf %100, %101 : vector<5x1xf32>
    %cst_54 = arith.constant dense<0.000000e+00> : vector<5x1xf32>
    %103 = tpu.matmul %98, %72, %cst_54 {dimension_numbers = #tpu.dot_dimension_numbers<[1], [1], [0], [0], [0, 0, 1, 0], [], []>, precision = #tpu.contract_precision<fp32>} : vector<5x8xf32>, vector<1x8xf32>, vector<5x1xf32> -> vector<5x1xf32>
    %104 = arith.divf %103, %102 : vector<5x1xf32>
    %105 = vector.broadcast %76 : vector<1x1xf32> to vector<5x1xf32>
    %106 = arith.subf %105, %104 : vector<5x1xf32>
    %107 = vector.broadcast %76 : vector<1x1xf32> to vector<1x8xf32>
    %108 = arith.subf %107, %72 : vector<1x8xf32>
    %109 = vector.broadcast %106 : vector<5x1xf32> to vector<5x8xf32>
    %110 = vector.broadcast %108 : vector<1x8xf32> to vector<5x8xf32>
    %111 = arith.mulf %109, %110 : vector<5x8xf32>
    %cst_55 = arith.constant 1.000000e-01 : f32
    %112 = vector.broadcast %cst_55 : f32 to vector<5x8xf32>
    %113 = arith.mulf %112, %111 : vector<5x8xf32>
    %114 = arith.addf %90, %113 : vector<5x8xf32>
    %115 = math.exp %114 : vector<5x8xf32>
    %cst_56 = arith.constant 9.99999974E-6 : f32
    %116 = vector.broadcast %cst_56 : f32 to vector<5x8xf32>
    %117 = arith.addf %115, %116 : vector<5x8xf32>
    %cst_57 = arith.constant dense<0.000000e+00> : vector<8xf32>
    %118 = vector.multi_reduction <add>, %117, %cst_57 [0] : vector<5x8xf32> to vector<8xf32>
    %119 = vector.shape_cast %118 : vector<8xf32> to vector<1x8xf32>
    %120 = vector.broadcast %119 : vector<1x8xf32> to vector<5x8xf32>
    %121 = arith.divf %117, %120 : vector<5x8xf32>
    %c0_58 = arith.constant 0 : index
    %c0_59 = arith.constant 0 : index
    %c0_60 = arith.constant 0 : index
    %122 = vector.load %arg16[%c0_58, %c0_59, %c0_60] : memref<2x5x8xf32, #tpu.memory_space<vmem>>, vector<1x5x8xf32>
    %123 = vector.shape_cast %122 : vector<1x5x8xf32> to vector<5x8xf32>
    %124 = vector.shape_cast %121 : vector<5x8xf32> to vector<1x5x8xf32>
    tpu.vector_store %arg16[%c0_58, %c0_59, %c0_60], %124 {strides = array<i32>} : memref<2x5x8xf32, #tpu.memory_space<vmem>>, vector<1x5x8xf32>,
    %c1 = arith.constant 1 : index
    %c0_61 = arith.constant 0 : index
    %c0_62 = arith.constant 0 : index
    %125 = vector.load %arg3[%c1, %c0_61, %c0_62] : memref<2x5x32xf32, #tpu.memory_space<vmem>>, vector<1x5x32xf32>
    %126 = vector.shape_cast %125 : vector<1x5x32xf32> to vector<5x32xf32>
    %127 = arith.mulf %126, %126 : vector<5x32xf32>
    %cst_63 = arith.constant dense<0.000000e+00> : vector<5xf32>
    %128 = vector.multi_reduction <add>, %127, %cst_63 [1] : vector<5x32xf32> to vector<5xf32>
    %129 = vector.shape_cast %128 : vector<5xf32> to vector<5x1xf32>
    %cst_64 = arith.constant dense<0.000000e+00> : vector<5x8xf32>
    %130 = tpu.matmul %126, %71, %cst_64 {dimension_numbers = #tpu.dot_dimension_numbers<[1], [1], [0], [0], [0, 0, 1, 0], [], []>, precision = #tpu.contract_precision<fp32>} : vector<5x32xf32>, vector<8x32xf32>, vector<5x8xf32> -> vector<5x8xf32>
    %cst_65 = arith.constant 1.000000e+00 : f32
    %131 = vector.broadcast %cst_65 : f32 to vector<5x1xf32>
    %132 = arith.addf %129, %131 : vector<5x1xf32>
    %cst_66 = arith.constant 2.000000e+00 : f32
    %133 = vector.broadcast %cst_66 : f32 to vector<5x8xf32>
    %134 = arith.mulf %133, %130 : vector<5x8xf32>
    %135 = vector.broadcast %132 : vector<5x1xf32> to vector<5x8xf32>
    %136 = arith.subf %135, %134 : vector<5x8xf32>
    %cst_67 = arith.constant 0.000000e+00 : f32
    %137 = vector.broadcast %cst_67 : f32 to vector<5x8xf32>
    %138 = arith.subf %137, %136 : vector<5x8xf32>
    %139 = math.exp %138 : vector<5x8xf32>
    %cst_68 = arith.constant 9.99999974E-6 : f32
    %140 = vector.broadcast %cst_68 : f32 to vector<5x8xf32>
    %141 = arith.addf %139, %140 : vector<5x8xf32>
    %cst_69 = arith.constant dense<0.000000e+00> : vector<8xf32>
    %142 = vector.multi_reduction <add>, %141, %cst_69 [0] : vector<5x8xf32> to vector<8xf32>
    %143 = vector.shape_cast %142 : vector<8xf32> to vector<1x8xf32>
    %144 = tpu.reciprocal %143 {approx = true} : vector<1x8xf32> -> vector<1x8xf32>
    %145 = vector.broadcast %144 : vector<1x8xf32> to vector<5x8xf32>
    %146 = arith.mulf %141, %145 : vector<5x8xf32>
    %cst_70 = arith.constant dense<0.000000e+00> : vector<5xf32>
    %147 = vector.multi_reduction <add>, %146, %cst_70 [1] : vector<5x8xf32> to vector<5xf32>
    %148 = vector.shape_cast %147 : vector<5xf32> to vector<5x1xf32>
    %cst_71 = arith.constant 1.000000e+00 : f32
    %149 = vector.broadcast %cst_71 : f32 to vector<5x1xf32>
    %150 = arith.addf %148, %149 : vector<5x1xf32>
    %cst_72 = arith.constant dense<0.000000e+00> : vector<5x1xf32>
    %151 = tpu.matmul %146, %72, %cst_72 {dimension_numbers = #tpu.dot_dimension_numbers<[1], [1], [0], [0], [0, 0, 1, 0], [], []>, precision = #tpu.contract_precision<fp32>} : vector<5x8xf32>, vector<1x8xf32>, vector<5x1xf32> -> vector<5x1xf32>
    %152 = arith.divf %151, %150 : vector<5x1xf32>
    %153 = vector.broadcast %76 : vector<1x1xf32> to vector<5x1xf32>
    %154 = arith.subf %153, %152 : vector<5x1xf32>
    %155 = vector.broadcast %76 : vector<1x1xf32> to vector<1x8xf32>
    %156 = arith.subf %155, %72 : vector<1x8xf32>
    %157 = vector.broadcast %154 : vector<5x1xf32> to vector<5x8xf32>
    %158 = vector.broadcast %156 : vector<1x8xf32> to vector<5x8xf32>
    %159 = arith.mulf %157, %158 : vector<5x8xf32>
    %cst_73 = arith.constant 1.000000e-01 : f32
    %160 = vector.broadcast %cst_73 : f32 to vector<5x8xf32>
    %161 = arith.mulf %160, %159 : vector<5x8xf32>
    %162 = arith.addf %138, %161 : vector<5x8xf32>
    %163 = math.exp %162 : vector<5x8xf32>
    %cst_74 = arith.constant 9.99999974E-6 : f32
    %164 = vector.broadcast %cst_74 : f32 to vector<5x8xf32>
    %165 = arith.addf %163, %164 : vector<5x8xf32>
    %cst_75 = arith.constant dense<0.000000e+00> : vector<8xf32>
    %166 = vector.multi_reduction <add>, %165, %cst_75 [0] : vector<5x8xf32> to vector<8xf32>
    %167 = vector.shape_cast %166 : vector<8xf32> to vector<1x8xf32>
    %168 = vector.broadcast %167 : vector<1x8xf32> to vector<5x8xf32>
    %169 = arith.divf %165, %168 : vector<5x8xf32>
    %c1_76 = arith.constant 1 : index
    %c0_77 = arith.constant 0 : index
    %c0_78 = arith.constant 0 : index
    %170 = vector.load %arg16[%c1_76, %c0_77, %c0_78] : memref<2x5x8xf32, #tpu.memory_space<vmem>>, vector<1x5x8xf32>
    %171 = vector.shape_cast %170 : vector<1x5x8xf32> to vector<5x8xf32>
    %172 = vector.shape_cast %169 : vector<5x8xf32> to vector<1x5x8xf32>
    tpu.vector_store %arg16[%c1_76, %c0_77, %c0_78], %172 {strides = array<i32>} : memref<2x5x8xf32, #tpu.memory_space<vmem>>, vector<1x5x8xf32>,
    %173 = arith.subf %121, %169 : vector<5x8xf32>
    %174 = math.log %121 : vector<5x8xf32>
    %175 = math.log %169 : vector<5x8xf32>
    %176 = arith.subf %174, %175 : vector<5x8xf32>
    %177 = arith.mulf %173, %176 : vector<5x8xf32>
    %cst_79 = arith.constant dense<0.000000e+00> : vector<8xf32>
    %178 = vector.multi_reduction <add>, %177, %cst_79 [0] : vector<5x8xf32> to vector<8xf32>
    %179 = vector.shape_cast %178 : vector<8xf32> to vector<1x8xf32>
    %180 = vector.shape_cast %179 : vector<1x8xf32> to vector<1x1x8xf32>
    %cst_80 = arith.constant dense<0.000000e+00> : vector<1xf32>
    %181 = vector.multi_reduction <add>, %180, %cst_80 [1, 2] : vector<1x1x8xf32> to vector<1xf32>
    %182 = vector.shape_cast %181 : vector<1xf32> to vector<1x1x1xf32>
    %183 = vector.extract %182[0, 0, 0] : f32 from vector<1x1x1xf32>
    %cst_81 = arith.constant 8.000000e+00 : f32
    %184 = arith.divf %183, %cst_81 : f32
    %185 = arith.addf %121, %169 : vector<5x8xf32>
    %cst_82 = arith.constant 5.000000e-01 : f32
    %186 = vector.broadcast %cst_82 : f32 to vector<5x8xf32>
    %187 = arith.mulf %186, %185 : vector<5x8xf32>
    %cst_83 = arith.constant dense<0xFF800000> : vector<8xf32>
    %188 = vector.multi_reduction <maximumf>, %187, %cst_83 [0] : vector<5x8xf32> to vector<8xf32>
    %189 = vector.shape_cast %188 : vector<8xf32> to vector<1x8xf32>
    %190 = tpu.iota {dimensions = array<i32: 0>} : vector<5x8xi32>
    %191 = vector.broadcast %189 : vector<1x8xf32> to vector<5x8xf32>
    %192 = arith.cmpf oeq, %187, %191 : vector<5x8xf32>
    %c5_i32 = arith.constant 5 : i32
    %193 = vector.broadcast %c5_i32 : i32 to vector<5x8xi32>
    %194 = arith.select %192, %190, %193 : vector<5x8xi1>, vector<5x8xi32>
    %cst_84 = arith.constant dense<2147483647> : vector<8xi32>
    %195 = vector.multi_reduction <minsi>, %194, %cst_84 [0] : vector<5x8xi32> to vector<8xi32>
    %196 = vector.shape_cast %195 : vector<8xi32> to vector<1x8xi32>
    %197 = vector.broadcast %196 : vector<1x8xi32> to vector<5x8xi32>
    %198 = arith.cmpi eq, %190, %197 : vector<5x8xi32>
    %199 = arith.extui %198 : vector<5x8xi1> to vector<5x8xi32>
    %200 = arith.sitofp %199 : vector<5x8xi32> to vector<5x8xf32>
    %201 = tpu.reciprocal %91 : vector<5x8xf32> -> vector<5x8xf32>
    %202 = arith.mulf %201, %200 : vector<5x8xf32>
    %203 = vector.shape_cast %202 : vector<5x8xf32> to vector<1x5x8xf32>
    %cst_85 = arith.constant dense<0.000000e+00> : vector<1xf32>
    %204 = vector.multi_reduction <add>, %203, %cst_85 [1, 2] : vector<1x5x8xf32> to vector<1xf32>
    %205 = vector.shape_cast %204 : vector<1xf32> to vector<1x1x1xf32>
    %206 = vector.extract %205[0, 0, 0] : f32 from vector<1x1x1xf32>
    %cst_86 = arith.constant 4.000000e+01 : f32
    %207 = arith.divf %206, %cst_86 : f32
    %cst_87 = arith.constant 1.000000e+00 : f32
    %208 = arith.mulf %cst_87, %207 : f32
    %209 = arith.addf %184, %208 : f32
    %210 = tpu.reciprocal %139 : vector<5x8xf32> -> vector<5x8xf32>
    %211 = arith.mulf %210, %200 : vector<5x8xf32>
    %212 = vector.shape_cast %211 : vector<5x8xf32> to vector<1x5x8xf32>
    %cst_88 = arith.constant dense<0.000000e+00> : vector<1xf32>
    %213 = vector.multi_reduction <add>, %212, %cst_88 [1, 2] : vector<1x5x8xf32> to vector<1xf32>
    %214 = vector.shape_cast %213 : vector<1xf32> to vector<1x1x1xf32>
    %215 = vector.extract %214[0, 0, 0] : f32 from vector<1x1x1xf32>
    %cst_89 = arith.constant 4.000000e+01 : f32
    %216 = arith.divf %215, %cst_89 : f32
    %cst_90 = arith.constant 1.000000e+00 : f32
    %217 = arith.mulf %cst_90, %216 : f32
    %218 = arith.addf %209, %217 : f32
    %cst_91 = arith.constant dense<0.000000e+00> : vector<5xf32>
    %219 = vector.multi_reduction <add>, %187, %cst_91 [1] : vector<5x8xf32> to vector<5xf32>
    %220 = vector.shape_cast %219 : vector<5xf32> to vector<5x1xf32>
    %cst_92 = arith.constant 1.000000e+00 : f32
    %221 = vector.broadcast %cst_92 : f32 to vector<5x1xf32>
    %222 = arith.addf %220, %221 : vector<5x1xf32>
    %cst_93 = arith.constant dense<0.000000e+00> : vector<5x1xf32>
    %223 = tpu.matmul %187, %72, %cst_93 {dimension_numbers = #tpu.dot_dimension_numbers<[1], [1], [0], [0], [0, 0, 1, 0], [], []>, precision = #tpu.contract_precision<fp32>} : vector<5x8xf32>, vector<1x8xf32>, vector<5x1xf32> -> vector<5x1xf32>
    %224 = arith.divf %223, %222 : vector<5x1xf32>
    %225 = vector.broadcast %76 : vector<1x1xf32> to vector<5x1xf32>
    %226 = arith.subf %224, %225 : vector<5x1xf32>
    %227 = arith.mulf %226, %226 : vector<5x1xf32>
    %228 = vector.shape_cast %227 : vector<5x1xf32> to vector<1x5x1xf32>
    %cst_94 = arith.constant dense<0.000000e+00> : vector<1xf32>
    %229 = vector.multi_reduction <add>, %228, %cst_94 [1, 2] : vector<1x5x1xf32> to vector<1xf32>
    %230 = vector.shape_cast %229 : vector<1xf32> to vector<1x1x1xf32>
    %231 = vector.extract %230[0, 0, 0] : f32 from vector<1x1x1xf32>
    %232 = math.sqrt %231 : f32
    %233 = arith.truncf %35 : vector<8x32xf32> to vector<8x32xbf16>
    %c0_95 = arith.constant 0 : index
    %c0_96 = arith.constant 0 : index
    %234 = vector.load %arg12[%c0_95, %c0_96] : memref<32x256xf32, #tpu.memory_space<vmem>>, vector<32x256xf32>
    %235 = arith.truncf %234 : vector<32x256xf32> to vector<32x256xbf16>
    %cst_97 = arith.constant dense<0.000000e+00> : vector<8x256xf32>
    %236 = tpu.matmul %233, %235, %cst_97 {dimension_numbers = #tpu.dot_dimension_numbers<[1], [0], [0], [1], [0, 0, 1, 1], [], []>} : vector<8x32xbf16>, vector<32x256xbf16>, vector<8x256xf32> -> vector<8x256xf32>
    %c0_98 = arith.constant 0 : index
    %c0_99 = arith.constant 0 : index
    %237 = vector.load %arg13[%c0_98, %c0_99] : memref<1x256xf32, #tpu.memory_space<vmem>>, vector<1x256xf32>
    %238 = vector.broadcast %237 : vector<1x256xf32> to vector<8x256xf32>
    %239 = arith.addf %236, %238 : vector<8x256xf32>
    %240 = arith.truncf %71 : vector<8x32xf32> to vector<8x32xbf16>
    %c0_100 = arith.constant 0 : index
    %c0_101 = arith.constant 0 : index
    %241 = vector.load %arg14[%c0_100, %c0_101] : memref<32x256xf32, #tpu.memory_space<vmem>>, vector<32x256xf32>
    %242 = arith.truncf %241 : vector<32x256xf32> to vector<32x256xbf16>
    %cst_102 = arith.constant dense<0.000000e+00> : vector<8x256xf32>
    %243 = tpu.matmul %240, %242, %cst_102 {dimension_numbers = #tpu.dot_dimension_numbers<[1], [0], [0], [1], [0, 0, 1, 1], [], []>} : vector<8x32xbf16>, vector<32x256xbf16>, vector<8x256xf32> -> vector<8x256xf32>
    %c0_103 = arith.constant 0 : index
    %c0_104 = arith.constant 0 : index
    %244 = vector.load %arg15[%c0_103, %c0_104] : memref<1x256xf32, #tpu.memory_space<vmem>>, vector<1x256xf32>
    %245 = vector.broadcast %244 : vector<1x256xf32> to vector<8x256xf32>
    %246 = arith.addf %243, %245 : vector<8x256xf32>
    %247 = arith.mulf %239, %239 : vector<8x256xf32>
    %cst_105 = arith.constant dense<0.000000e+00> : vector<8xf32>
    %248 = vector.multi_reduction <add>, %247, %cst_105 [1] : vector<8x256xf32> to vector<8xf32>
    %249 = vector.shape_cast %248 : vector<8xf32> to vector<8x1xf32>
    %250 = math.rsqrt %249 : vector<8x1xf32>
    %251 = vector.broadcast %250 : vector<8x1xf32> to vector<8x256xf32>
    %252 = arith.mulf %239, %251 : vector<8x256xf32>
    %253 = arith.mulf %246, %246 : vector<8x256xf32>
    %cst_106 = arith.constant dense<0.000000e+00> : vector<8xf32>
    %254 = vector.multi_reduction <add>, %253, %cst_106 [1] : vector<8x256xf32> to vector<8xf32>
    %255 = vector.shape_cast %254 : vector<8xf32> to vector<8x1xf32>
    %256 = math.rsqrt %255 : vector<8x1xf32>
    %257 = vector.broadcast %256 : vector<8x1xf32> to vector<8x256xf32>
    %258 = arith.mulf %246, %257 : vector<8x256xf32>
    %cst_107 = arith.constant 1.000000e+00 : f32
    %259 = vector.broadcast %cst_107 : f32 to vector<1x256xf32>
    %260 = arith.mulf %252, %258 : vector<8x256xf32>
    %cst_108 = arith.constant dense<0.000000e+00> : vector<1x8xf32>
    %261 = tpu.matmul %259, %260, %cst_108 {dimension_numbers = #tpu.dot_dimension_numbers<[1], [1], [0], [0], [0, 0, 1, 0], [], []>, precision = #tpu.contract_precision<fp32>} : vector<1x256xf32>, vector<8x256xf32>, vector<1x8xf32> -> vector<1x8xf32>
    %262 = math.exp %261 : vector<1x8xf32>
    %263 = arith.mulf %121, %121 : vector<5x8xf32>
    %264 = arith.mulf %169, %169 : vector<5x8xf32>
    %265 = arith.addf %263, %264 : vector<5x8xf32>
    %cst_109 = arith.constant dense<0.000000e+00> : vector<8xf32>
    %266 = vector.multi_reduction <add>, %265, %cst_109 [0] : vector<5x8xf32> to vector<8xf32>
    %267 = vector.shape_cast %266 : vector<8xf32> to vector<1x8xf32>
    %268 = math.rsqrt %267 : vector<1x8xf32>
    %269 = vector.broadcast %268 : vector<1x8xf32> to vector<5x8xf32>
    %270 = arith.mulf %121, %269 : vector<5x8xf32>
    %271 = arith.truncf %270 : vector<5x8xf32> to vector<5x8xbf16>
    %272 = vector.broadcast %268 : vector<1x8xf32> to vector<5x8xf32>
    %273 = arith.mulf %169, %272 : vector<5x8xf32>
    %274 = arith.truncf %273 : vector<5x8xf32> to vector<5x8xbf16>
    %275 = arith.truncf %252 : vector<8x256xf32> to vector<8x256xbf16>
    %276 = arith.truncf %258 : vector<8x256xf32> to vector<8x256xbf16>
    %cst_110 = arith.constant 1.000000e+00 : f32
    %277 = vector.broadcast %cst_110 : f32 to vector<1x8xf32>
    %cst_111 = arith.constant 0.000000e+00 : f32
    %278 = vector.broadcast %cst_111 : f32 to vector<1x8xf32>
    %cst_112 = arith.constant dense<0.000000e+00> : vector<8x8xf32>
    %279 = tpu.matmul %271, %271, %cst_112 {dimension_numbers = #tpu.dot_dimension_numbers<[0], [0], [1], [1], [0, 1, 1, 1], [], []>} : vector<5x8xbf16>, vector<5x8xbf16>, vector<8x8xf32> -> vector<8x8xf32>
    %cst_113 = arith.constant dense<0.000000e+00> : vector<8x8xf32>
    %280 = tpu.matmul %274, %274, %cst_113 {dimension_numbers = #tpu.dot_dimension_numbers<[0], [0], [1], [1], [0, 1, 1, 1], [], []>} : vector<5x8xbf16>, vector<5x8xbf16>, vector<8x8xf32> -> vector<8x8xf32>
    %281 = arith.addf %279, %280 : vector<8x8xf32>
    %cst_114 = arith.constant dense<0.000000e+00> : vector<8x8xf32>
    %282 = tpu.matmul %275, %276, %cst_114 {dimension_numbers = #tpu.dot_dimension_numbers<[1], [1], [0], [0], [0, 0, 1, 0], [], []>} : vector<8x256xbf16>, vector<8x256xbf16>, vector<8x8xf32> -> vector<8x8xf32>
    %cst_115 = arith.constant 1.000000e+00 : f32
    %283 = vector.broadcast %cst_115 : f32 to vector<8x8xf32>
    %284 = arith.subf %283, %281 : vector<8x8xf32>
    %285 = arith.addf %284, %282 : vector<8x8xf32>
    %286 = math.exp %285 : vector<8x8xf32>
    %cst_116 = arith.constant 1.000000e+00 : f32
    %287 = vector.broadcast %cst_116 : f32 to vector<1x8xf32>
    %cst_117 = arith.constant dense<0.000000e+00> : vector<1x8xf32>
    %288 = tpu.matmul %287, %286, %cst_117 {dimension_numbers = #tpu.dot_dimension_numbers<[1], [0], [0], [1], [0, 0, 1, 1], [], []>, precision = #tpu.contract_precision<fp32>} : vector<1x8xf32>, vector<8x8xf32>, vector<1x8xf32> -> vector<1x8xf32>
    %289 = arith.addf %278, %288 : vector<1x8xf32>
    %cst_118 = arith.constant dense<0.000000e+00> : vector<1x8xf32>
    %290 = tpu.matmul %277, %286, %cst_118 {dimension_numbers = #tpu.dot_dimension_numbers<[1], [1], [0], [0], [0, 0, 1, 0], [], []>, precision = #tpu.contract_precision<fp32>} : vector<1x8xf32>, vector<8x8xf32>, vector<1x8xf32> -> vector<1x8xf32>
    %291 = arith.addf %289, %290 : vector<1x8xf32>
    %cst_119 = arith.constant 8.000000e+00 : f32
    %292 = vector.broadcast %cst_119 : f32 to vector<1x8xf32>
    %293 = arith.mulf %262, %292 : vector<1x8xf32>
    %294 = arith.divf %291, %293 : vector<1x8xf32>
    %295 = math.log %294 : vector<1x8xf32>
    %296 = vector.shape_cast %295 : vector<1x8xf32> to vector<1x1x8xf32>
    %cst_120 = arith.constant dense<0.000000e+00> : vector<1xf32>
    %297 = vector.multi_reduction <add>, %296, %cst_120 [1, 2] : vector<1x1x8xf32> to vector<1xf32>
    %298 = vector.shape_cast %297 : vector<1xf32> to vector<1x1x1xf32>
    %299 = vector.extract %298[0, 0, 0] : f32 from vector<1x1x1xf32>
    %cst_121 = arith.constant 8.000000e+00 : f32
    %300 = arith.divf %299, %cst_121 : f32
    %301 = tpu.iota {dimensions = array<i32: 1>} : vector<1x128xi32>
    %c0_i32 = arith.constant 0 : i32
    %302 = vector.broadcast %c0_i32 : i32 to vector<1x128xi32>
    %303 = arith.cmpi eq, %301, %302 : vector<1x128xi32>
    %304 = arith.extui %303 : vector<1x128xi1> to vector<1x128xi32>
    %305 = arith.sitofp %304 : vector<1x128xi32> to vector<1x128xf32>
    %306 = vector.broadcast %218 : f32 to vector<1x128xf32>
    %307 = arith.mulf %305, %306 : vector<1x128xf32>
    %c1_i32 = arith.constant 1 : i32
    %308 = vector.broadcast %c1_i32 : i32 to vector<1x128xi32>
    %309 = arith.cmpi eq, %301, %308 : vector<1x128xi32>
    %310 = arith.extui %309 : vector<1x128xi1> to vector<1x128xi32>
    %311 = arith.sitofp %310 : vector<1x128xi32> to vector<1x128xf32>
    %312 = vector.broadcast %300 : f32 to vector<1x128xf32>
    %313 = arith.mulf %311, %312 : vector<1x128xf32>
    %314 = arith.addf %307, %313 : vector<1x128xf32>
    %c2_i32 = arith.constant 2 : i32
    %315 = vector.broadcast %c2_i32 : i32 to vector<1x128xi32>
    %316 = arith.cmpi eq, %301, %315 : vector<1x128xi32>
    %317 = arith.extui %316 : vector<1x128xi1> to vector<1x128xi32>
    %318 = arith.sitofp %317 : vector<1x128xi32> to vector<1x128xf32>
    %319 = vector.broadcast %232 : f32 to vector<1x128xf32>
    %320 = arith.mulf %318, %319 : vector<1x128xf32>
    %321 = arith.addf %314, %320 : vector<1x128xf32>
    %c0_122 = arith.constant 0 : index
    %c0_123 = arith.constant 0 : index
    %322 = vector.load %arg17[%c0_122, %c0_123] : memref<1x128xf32, #tpu.memory_space<vmem>>, vector<1x128xf32>
    tpu.vector_store %arg17[%c0_122, %c0_123], %321 {strides = array<i32>} : memref<1x128xf32, #tpu.memory_space<vmem>>, vector<1x128xf32>,
    return
  }
}

</mosaic_0001>

<bundles_post_ra>
// kernel: tpu_custom_call.1
= control target key start
LH: loop header
LB: loop body
LE: loop exit
PB: predicated region body
PF: predicated region fallthrough
CT: control target
= control target key end

     0   :  { %s11643_s0 = inlined_call_operand.vmem [shape: f32[8,64], index: 0, kind: input, shape index: {}]   ;;  %s11644_s1 = inlined_call_operand.vmem [shape: f32[8,32], index: 1, kind: input, shape index: {}]   ;;  %s11645_s2 = inlined_call_operand.vmem [shape: f32[1,8], index: 2, kind: input, shape index: {}]   ;;  %s11646_s3 = inlined_call_operand.vmem [shape: f32[2,5,32], index: 3, kind: input, shape index: {}]   ;;  %s11647_s4 = inlined_call_operand.vmem [shape: f32[64,256], index: 4, kind: input, shape index: {}]   ;;  %s11648_s5 = inlined_call_operand.vmem [shape: f32[1,256], index: 5, kind: input, shape index: {}]   ;;  %s11649_s6 = inlined_call_operand.vmem [shape: f32[256,32], index: 6, kind: input, shape index: {}]   ;;  %s11650_s7 = inlined_call_operand.vmem [shape: f32[1,32], index: 7, kind: input, shape index: {}]   ;;  %s11651_s8 = inlined_call_operand.vmem [shape: f32[32,256], index: 8, kind: input, shape index: {}]   ;;  %s11652_s9 = inlined_call_operand.vmem [shape: f32[1,256], index: 9, kind: input, shape index: {}]   ;;  %s11653_s10 = inlined_call_operand.vmem [shape: f32[256,32], index: 10, kind: input, shape index: {}]   ;;  %s11654_s11 = inlined_call_operand.vmem [shape: f32[1,32], index: 11, kind: input, shape index: {}]   ;;  %s11655_s12 = inlined_call_operand.vmem [shape: f32[32,256], index: 12, kind: input, shape index: {}]   ;;  %s11656_s13 = inlined_call_operand.vmem [shape: f32[1,256], index: 13, kind: input, shape index: {}]   ;;  %s11657_s14 = inlined_call_operand.vmem [shape: f32[32,256], index: 14, kind: input, shape index: {}]   ;;  %s11658_s15 = inlined_call_operand.vmem [shape: f32[1,256], index: 15, kind: input, shape index: {}]   ;;  %s11659_s16 = inlined_call_operand.vmem [shape: f32[2,5,8], index: 16, kind: output, shape index: {0}]   ;;  %s11660_s17 = inlined_call_operand.hbm [shape: f32[1,128], index: 17, kind: output, shape index: {1}]  }
   0x1   :  { %11781 = sst [smem:[#allocation17_spill]] %s11643_s0 }
   0x2   :  { %11782 = sst [smem:[#allocation18_spill]] %s11644_s1 }
   0x3   :  { %v59_v0 = vld [vmem:[%s11647_s4 + $0x8] sm:$0xff]  ;;  %v61_v1 = vld [vmem:[%s11647_s4 + $0x18] sm:$0xff]  ;;  %v58_v2 = vld [vmem:[%s11647_s4] sm:$0xff]  ;;  %vm119_vm0 = vcmask 523264   ;;  %v11666_v9 = vmov 0.0   ;;  %s11783_s28 = sld [smem:[#allocation17_spill]] }
   0x4   :  { %v123_v3 = vand.u32 4294901760, %v59_v0  ;;  %v127_v4 = vand.u32 4294901760, %v61_v1  ;;  %v60_v5 = vld [vmem:[%s11647_s4 + $0x10] sm:$0xff]  ;;  %v125_v6 = vand.u32 4294901760, %v58_v2  ;;  %v63_v7 = vld [vmem:[%s11647_s4 + $0x28] sm:$0xff]  ;;  %v65_v8 = vld [vmem:[%s11647_s4 + $0x38] sm:$0xff]  ;;  %203 = vmatprep.mubr.f32.mxu0 %v11666_v9  ;;  %842 = vmatprep.mubr.f32.mxu1 %v11666_v9 }
   0x5   :  { %v129_v10 = vand.u32 4294901760, %v60_v5  ;;  %v131_v11 = vand.u32 4294901760, %v63_v7  ;;  %v135_v12 = vand.u32 4294901760, %v65_v8  ;;  %v62_v13 = vld [vmem:[%s11647_s4 + $0x20] sm:$0xff]  ;;  %v64_v14 = vld [vmem:[%s11647_s4 + $0x30] sm:$0xff]  ;;  %v67_v15 = vld [vmem:[%s11647_s4 + $0x48] sm:$0xff] }
   0x6   :  { %v9450_v16 = vpack.c.bf16 %v127_v4, %v123_v3  ;;  %v9452_v17 = vsub.f32 %v59_v0, %v123_v3  ;;  %v9454_v18 = vsub.f32 %v61_v1, %v127_v4  ;;  %v9456_v19 = vsub.f32 %v58_v2, %v125_v6  ;;  %v69_v20 = vld [vmem:[%s11647_s4 + $0x58] sm:$0xff]  ;;  %v66_v21 = vld [vmem:[%s11647_s4 + $0x40] sm:$0xff]  ;;  %v68_v22 = vld [vmem:[%s11647_s4 + $0x50] sm:$0xff] }
   0x7   :  { %v9467_v23 = vpack.c.bf16 %v129_v10, %v125_v6  ;;  %v9469_v24 = vsub.f32 %v60_v5, %v129_v10  ;;  %v9471_v25 = vpack.c.bf16 %v135_v12, %v131_v11  ;;  %v9473_v26 = vsub.f32 %v63_v7, %v131_v11  ;;  %v71_v27 = vld [vmem:[%s11647_s4 + $0x68] sm:$0xff]  ;;  %v73_v35 = vld [vmem:[%s11647_s4 + $0x78] sm:$0xff]  ;;  %v70_v37 = vld [vmem:[%s11647_s4 + $0x60] sm:$0xff] }
   0x8   :  { %8579 = vmatprep.subr.bf16.mxu0 %v9450_v16  ;;  %v9479_v28 = vsub.f32 %v65_v8, %v135_v12  ;;  %v133_v29 = vand.u32 4294901760, %v62_v13  ;;  %v137_v30 = vand.u32 4294901760, %v64_v14  ;;  %v139_v31 = vand.u32 4294901760, %v67_v15  ;;  %v72_v42 = vld [vmem:[%s11647_s4 + $0x70] sm:$0xff] }
   0x9   :  { %8581 = vmatpush1.bf16.msra.mxu0 %v9467_v23  ;;  %v143_v32 = vand.u32 4294901760, %v69_v20  ;;  %v141_v33 = vand.u32 4294901760, %v66_v21  ;;  %v145_v34 = vand.u32 4294901760, %v68_v22  ;;  %v147_v36 = vand.u32 4294901760, %v71_v27  ;;  %v57_v43 = vld [vmem:[%s11783_s28] sm:$0xff] }
   0xa   :  { %8583 = vmatprep.subr.bf16.mxu0 %v9471_v25  ;;  %v9489_v38 = vpack.c.bf16 %v137_v30, %v133_v29  ;;  %v9491_v39 = vsub.f32 %v62_v13, %v133_v29  ;;  %v9493_v40 = vsub.f32 %v64_v14, %v137_v30  ;;  %v9495_v41 = vsub.f32 %v67_v15, %v139_v31 }
   0xb   :  { %23 = vsyncpa [#allocation3], 0  ;;  %v9503_v44 = vpack.c.bf16 %v143_v32, %v139_v31  ;;  %v9505_v45 = vsub.f32 %v69_v20, %v143_v32  ;;  %v9507_v46 = vpack.c.bf16 %v145_v34, %v141_v33  ;;  %v9509_v47 = vsub.f32 %v66_v21, %v141_v33  ;;  %s11845_s26 = sld [smem:[#allocation18_spill]]  ;;  %s9330_s18 = smov [#allocation2]  }
   0xc   :  { %v9511_v48 = vsub.f32 %v68_v22, %v145_v34  ;;  %v151_v49 = vand.u32 4294901760, %v73_v35  ;;  %v9513_v50 = vsub.f32 %v71_v27, %v147_v36  ;;  %v149_v51 = vand.u32 4294901760, %v70_v37  ;;  %s7934_s19 = sshll.u32 %s9330_s18, 4  ;;  %s7935_s19 = int_to_ptr.vmem [resolvable:$true] %s7934_s19 }
   0xd   :  { %8585 = vmatpush1.bf16.msra.mxu0 %v9489_v38  ;;  %v153_v52 = vand.u32 4294901760, %v72_v42  ;;  %v217_v53 = vand.u32 4294901760, %v9452_v17  ;;  %v229_v54 = vand.u32 4294901760, %v9454_v18  ;;  %v121_v55 = vsel %vm119_vm0, %v57_v43, 0  ;;  %s9301_s1 = scalar_lea.vmem %s7935_s19, 16  ;;  %s9305_s20 = scalar_lea.vmem %s7935_s19, 32 }
   0xe   :  { %8587 = vmatprep.subr.bf16.mxu0 %v9503_v44  ;;  %v9520_v56 = vpack.c.bf16 %v151_v49, %v147_v36  ;;  %v9522_v57 = vsub.f32 %v73_v35, %v151_v49  ;;  %v9524_v58 = vsub.f32 %v70_v37, %v149_v51  ;;  %v9526_v59 = vand.u32 4294901760, %v121_v55  ;;  %p9302_p0 = scmp.ne.s32.totalorder %s7935_s19, %s9301_s1  ;;  %p9306_p1 = scmp.lt.s32.totalorder %s7935_s19, %s7935_s19 }
   0xf   :  { %v9528_v60 = vpack.c.bf16 %v153_v52, %v149_v51  ;;  %v9530_v61 = vsub.f32 %v72_v42, %v153_v52  ;;  %v218_v62 = vsub.f32 %v9452_v17, %v217_v53  ;;  %v230_v63 = vsub.f32 %v9454_v18, %v229_v54  ;;  %p9307_p2 = scmp.lt.s32.totalorder %s9305_s20, %s9301_s1 }
  0x10   :  { %v9539_v0 = vsub.f32 %v121_v55, %v9526_v59  ;;  %v223_v1 = vand.u32 4294901760, %v9456_v19  ;;  %v235_v2 = vand.u32 4294901760, %v9469_v24  ;;  %v241_v3 = vand.u32 4294901760, %v9473_v26 }
  0x11   :  { %8589 = vmatpush1.bf16.msra.mxu0 %v9507_v46  ;;  %v219_v4 = vand.u32 4294901760, %v218_v62  ;;  %v231_v5 = vand.u32 4294901760, %v230_v63  ;;  %v253_v6 = vand.u32 4294901760, %v9479_v28  ;;  %v247_v7 = vand.u32 4294901760, %v9491_v39  ;;  %p9308_p3 = por %p9307_p2, %p9306_p1 }
  0x12   :  { %8591 = vmatprep.subr.bf16.mxu0 %v9520_v56  ;;  %v206_v8 = vand.u32 4294901760, %v9539_v0  ;;  %v224_v10 = vsub.f32 %v9456_v19, %v223_v1  ;;  %v236_v11 = vsub.f32 %v9469_v24, %v235_v2  ;;  %v242_v12 = vsub.f32 %v9473_v26, %v241_v3 }
  0x13   :  { %v8594_v13 = vpack.c.bf16 %v231_v5, %v219_v4  ;;  %v254_v14 = vsub.f32 %v9479_v28, %v253_v6  ;;  %v248_v15 = vsub.f32 %v9491_v39, %v247_v7  ;;  %v259_v20 = vand.u32 4294901760, %v9493_v40  ;;  %p9309_p4 = pnand %p9308_p3, %p9302_p0 }
  0x14   :  { %v207_v21 = vsub.f32 %v9539_v0, %v206_v8  ;;  %v225_v22 = vand.u32 4294901760, %v224_v10  ;;  %v237_v27 = vand.u32 4294901760, %v236_v11  ;;  %v243_v29 = vand.u32 4294901760, %v242_v12 }
  0x15   :  { %8593 = vmatpush1.bf16.msra.mxu0 %v9528_v60  ;;  %v255_v30 = vand.u32 4294901760, %v254_v14  ;;  %v249_v31 = vand.u32 4294901760, %v248_v15  ;;  %v260_v32 = vsub.f32 %v9493_v40, %v259_v20  ;;  %v265_v33 = vand.u32 4294901760, %v9495_v41 }
  0x16   :  { %8595 = vmatprep.subr.bf16.mxu0 %v8594_v13  ;;  %v208_v34 = vand.u32 4294901760, %v207_v21  ;;  %v8596_v35 = vpack.c.bf16 %v237_v27, %v225_v22  ;;  %v277_v36 = vand.u32 4294901760, %v9505_v45  ;;  %v271_v37 = vand.u32 4294901760, %v9509_v47 }
  0x17   :  { %v8598_v42 = vpack.c.bf16 %v255_v30, %v243_v29  ;;  %v261_v43 = vand.u32 4294901760, %v260_v32  ;;  %v266_v49 = vsub.f32 %v9495_v41, %v265_v33  ;;  %v283_v51 = vand.u32 4294901760, %v9511_v48 }
  0x18   :  { %209 = vmatmul.mubr.f32.vlgmr.msra.gmra.mrb[0].mxu0 %v208_v34  ;;  %v278_v52 = vsub.f32 %v9505_v45, %v277_v36  ;;  %v272_v55 = vsub.f32 %v9509_v47, %v271_v37  ;;  %v289_v62 = vand.u32 4294901760, %v9513_v50  ;;  %v301_v63 = vand.u32 4294901760, %v9522_v57 }
  0x19   :  { %8597 = vmatpush1.bf16.msra.mxu0 %v8596_v35  ;;  %v8600_v4 = vpack.c.bf16 %v261_v43, %v249_v31  ;;  %v267_v5 = vand.u32 4294901760, %v266_v49  ;;  %v284_v10 = vsub.f32 %v9511_v48, %v283_v51  ;;  %v295_v11 = vand.u32 4294901760, %v9524_v58  ;;  %359 = vmatprep.mubr.f32.mxu0 %v11666_v9 }
  0x1a   :  { %8599 = vmatprep.subr.bf16.mxu0 %v8598_v42  ;;  %v279_v12 = vand.u32 4294901760, %v278_v52  ;;  %v273_v13 = vand.u32 4294901760, %v272_v55  ;;  %v290_v14 = vsub.f32 %v9513_v50, %v289_v62  ;;  %v302_v15 = vsub.f32 %v9522_v57, %v301_v63 }
  0x1b   :  { %v285_v21 = vand.u32 4294901760, %v284_v10  ;;  %v296_v22 = vsub.f32 %v9524_v58, %v295_v11  ;;  %v307_v27 = vand.u32 4294901760, %v9530_v61  ;;  %v8610_v52 = vpack.c.bf16 %v9454_v18, %v9452_v17 }
  0x1c   :  { %v8602_v29 = vpack.c.bf16 %v279_v12, %v267_v5  ;;  %v291_v30 = vand.u32 4294901760, %v290_v14  ;;  %v303_v31 = vand.u32 4294901760, %v302_v15  ;;  %v8612_v55 = vpack.c.bf16 %v9469_v24, %v9456_v19 }
  0x1d   :  { %8601 = vmatpush1.bf16.msra.mxu0 %v8600_v4  ;;  %v8604_v32 = vpack.c.bf16 %v285_v21, %v273_v13  ;;  %v297_v34 = vand.u32 4294901760, %v296_v22  ;;  %v308_v35 = vsub.f32 %v9530_v61, %v307_v27  ;;  %v8614_v4 = vpack.c.bf16 %v9479_v28, %v9473_v26 }
  0x1e   :  { %8603 = vmatprep.subr.bf16.mxu0 %v8602_v29  ;;  %v8606_v42 = vpack.c.bf16 %v303_v31, %v291_v30  ;;  %v8616_v5 = vpack.c.bf16 %v9493_v40, %v9491_v39  ;;  %v8618_v10 = vpack.c.bf16 %v9505_v45, %v9495_v41  ;;  %v8620_v12 = vpack.c.bf16 %v9511_v48, %v9509_v47  ;;  %v74_v39 = vld [vmem:[%s11648_s5] sm:$0x3] }
  0x1f   :  { %v309_v43 = vand.u32 4294901760, %v308_v35  ;;  %v8622_v13 = vpack.c.bf16 %v9522_v57, %v9513_v50  ;;  %v8624_v14 = vpack.c.bf16 %v9530_v61, %v9524_v58  ;;  %v8642_v61 = vpack.c.bf16 %v229_v54, %v217_v53  ;;  %v9749_v35 = vld [vmem:[%s11649_s6 + $0x88] sm:$0xff] }
  0x20   :  { %v8644_v15 = vpack.c.bf16 %v235_v2, %v223_v1  ;;  %v8646_v21 = vpack.c.bf16 %v253_v6, %v241_v3  ;;  %v8648_v17 = vpack.c.bf16 %v259_v20, %v247_v7  ;;  %v8650_v18 = vpack.c.bf16 %v277_v36, %v265_v33 }
  0x21   :  { %8605 = vmatpush1.bf16.msra.mxu0 %v8604_v32  ;;  %v8608_v49 = vpack.c.bf16 %v309_v43, %v297_v34  ;;  %v8652_v19 = vpack.c.bf16 %v283_v51, %v271_v37  ;;  %v8654_v24 = vpack.c.bf16 %v301_v63, %v289_v62  ;;  %v8656_v26 = vpack.c.bf16 %v307_v27, %v295_v11  ;;  %v9744_v34 = vld [vmem:[%s11649_s6 + $0x80] sm:$0xff] }
  0x22   :  { %8607 = vmatprep.subr.bf16.mxu0 %v8606_v42  ;;  %vm772_vm1 = vcmask 64512   ;;  %v11662_v28 = vmov 0   ;;  %v11664_v33 = vmov 1.0   ;;  %v9754_v42 = vld [vmem:[%s11649_s6] sm:$0xff]  ;;  %v1795_v43 = vand.u32 4294901760, %v9744_v34 }
  0x23   :  { %vm2609_vm2 = vcmask 261120   ;;  %vm9328_vm3 = vmmov 0   ;;  %vm5063_vm4 = vcmask 258048   ;;  %vm5526_vm5 = vcmask 61440  }
  0x24   :  { %vm5056_vm6 = vcmask 57344   ;;  %vm6840_vm9 = vcmask 1041408   ;;  %vm6841_vm10 = vcmask 1042432   ;;  %vm6836_vm14 = vcmask 39936  }
  0x25   :  { %8609 = vmatpush1.bf16.msra.mxu0 %v8608_v49  ;;  %v1798_v49 = vand.u32 4294901760, %v9749_v35  ;;  %vm6177_vm15 = vcmask 4096  }
  0x26   :  { %8611 = vmatprep.subr.bf16.mxu0 %v8610_v52  ;;  %v9761_v52 = vld [vmem:[%s11649_s6 + $0x8] sm:$0xff] }
  0x28   :  { %361 = vmatmul.mubr.f32.vlgmr.msra.gmra.mrb[0].mxu0 %v9526_v59 }
  0x29   :  { %8613 = vmatpush1.bf16.msra.mxu0 %v8612_v55  ;;  %463 = vmatprep.mubr.f32.mxu0 %v11666_v9  ;;  %v1747_v55 = vand.u32 4294901760, %v9754_v42 }
  0x2a   :  { %8615 = vmatprep.subr.bf16.mxu0 %v8614_v4  ;;  %v9767_v4 = vld [vmem:[%s11649_s6 + $0x90] sm:$0xff] }
  0x2d   :  { %8617 = vmatpush1.bf16.msra.mxu0 %v8616_v5  ;;  %v9772_v5 = vld [vmem:[%s11649_s6 + $0x98] sm:$0xff] }
  0x2e   :  { %8619 = vmatprep.subr.bf16.mxu0 %v8618_v10  ;;  %v1750_v10 = vand.u32 4294901760, %v9761_v52 }
  0x31   :  { %8621 = vmatpush1.bf16.msra.mxu0 %v8620_v12  ;;  %v1801_v12 = vand.u32 4294901760, %v9767_v4 }
  0x32   :  { %8623 = vmatprep.subr.bf16.mxu0 %v8622_v13  ;;  %v1804_v13 = vand.u32 4294901760, %v9772_v5 }
  0x35   :  { %8625 = vmatpush1.bf16.msra.mxu0 %v8624_v14  ;;  %v9780_v14 = vld [vmem:[%s11649_s6 + $0x10] sm:$0xff] }
  0x36   :  { %8627 = vmatprep.subr.bf16.mxu0 %v9450_v16 }
  0x38   :  { %466 = vmatmul.mubr.f32.vlgmr.msra.gmra.mrb[0].mxu0 %v9539_v0 }
  0x39   :  { %8629 = vmatpush1.bf16.msra.mxu0 %v9467_v23  ;;  %552 = vmatprep.mubr.f32.mxu0 %v11666_v9 }
  0x3a   :  { %8631 = vmatprep.subr.bf16.mxu0 %v9471_v25 }
  0x3d   :  { %8633 = vmatpush1.bf16.msra.mxu0 %v9489_v38 }
  0x3e   :  { %8635 = vmatprep.subr.bf16.mxu0 %v9503_v44 }
  0x41   :  { %8637 = vmatpush1.bf16.msra.mxu0 %v9507_v46 }
  0x42   :  { %8639 = vmatprep.subr.bf16.mxu0 %v9520_v56 }
  0x45   :  { %8641 = vmatpush1.bf16.msra.mxu0 %v9528_v60 }
  0x46   :  { %8643 = vmatprep.subr.bf16.mxu0 %v8642_v61  ;;  %v9785_v61 = vld [vmem:[%s11649_s6 + $0x18] sm:$0xff] }
  0x48   :  { %556 = vmatmul.mubr.f32.vlgmr.msra.gmra.mrb[0].mxu0 %v206_v8 }
  0x49   :  { %8645 = vmatpush1.bf16.msra.mxu0 %v8644_v15  ;;  %674 = vmatprep.mubr.f32.mxu0 %v11666_v9  ;;  %v9790_v15 = vsub.f32 %v9744_v34, %v1795_v43  ;;  %v9999_v34 = vld [vmem:[%s11649_s6 + $0x48] sm:$0xff] }
  0x4a   :  { %8647 = vmatprep.subr.bf16.mxu0 %v8646_v21  ;;  %v9795_v21 = vsub.f32 %v9749_v35, %v1798_v49  ;;  %v10005_v35 = vpack.c.bf16 %v1750_v10, %v1747_v55 }
  0x4c   :  { %11789 = vst [vmem:[#allocation10_spill] sm:$0xff] %v9795_v21 }
  0x4d   :  { %8649 = vmatpush1.bf16.msra.mxu0 %v8648_v17  ;;  %v9800_v17 = vsub.f32 %v9754_v42, %v1747_v55 }
  0x4e   :  { %8651 = vmatprep.subr.bf16.mxu0 %v8650_v18  ;;  %v1753_v18 = vand.u32 4294901760, %v9780_v14 }
  0x51   :  { %8653 = vmatpush1.bf16.msra.mxu0 %v8652_v19  ;;  %v9806_v19 = vsub.f32 %v9761_v52, %v1750_v10 }
  0x52   :  { %8655 = vmatprep.subr.bf16.mxu0 %v8654_v24  ;;  %v9811_v24 = vsub.f32 %v9767_v4, %v1801_v12  ;;  %v10049_v4 = vld [vmem:[%s11649_s6 + $0x58] sm:$0xff] }
  0x55   :  { %8657 = vmatpush1.bf16.msra.mxu0 %v8656_v26  ;;  %v9816_v26 = vsub.f32 %v9772_v5, %v1804_v13 }
  0x56   :  { %8659 = vmatprep.subr.bf16.mxu0 %v9450_v16  ;;  %v11661_v16 = vlaneseq }
  0x58   :  { %676 = vmatmul.mubr.f32.vlgmr.msra.gmra.mrb[0].mxu0 %v9526_v59 }
  0x59   :  { %8661 = vmatpush1.bf16.msra.mxu0 %v9467_v23  ;;  %762 = vmatprep.mubr.f32.mxu0 %v11666_v9  ;;  %v9676_v23 = vshrl.u32 %v11661_v16, 7 }
  0x5a   :  { %8663 = vmatprep.subr.bf16.mxu0 %v9471_v25  ;;  %v774_v25 = vsel %vm772_vm1, 1.0, %v11662_v28 }
  0x5b   :  { %11784 = vst [vmem:[#allocation5_spill] sm:$0xff] %v9676_v23  ;;  %v9687_v40 = vsub.s32 1, %v9676_v23  ;;  %v9689_v41 = vsub.f32 %v774_v25, %v774_v25  ;;  %v1756_v25 = vand.u32 4294901760, %v9785_v61 }
  0x5d   :  { %8665 = vmatpush1.bf16.msra.mxu0 %v9489_v38  ;;  %v9681_v38 = vsub.s32 0, %v9676_v23  ;;  %11785 = vst [vmem:[#allocation6_spill] sm:$0xff] %v9687_v40  ;;  %11786 = vst [vmem:[#allocation7_spill] sm:$0xff] %v9689_v41  ;;  %v116_v45 = vrot.slane %v74_v39, %v9687_v40 }
  0x5e   :  { %8667 = vmatprep.subr.bf16.mxu0 %v9503_v44 }
  0x5f   :  { %v112_v44 = vrot.slane %v74_v39, %v9681_v38  ;;  %v11677_v39 = vand.u32 4294901760, %v9790_v15 }
  0x61   :  { %8669 = vmatpush1.bf16.msra.mxu0 %v9507_v46  ;;  %v9694_v46 = vand.u32 4294901760, %v9689_v41 }
  0x62   :  { %8671 = vmatprep.subr.bf16.mxu0 %v9520_v56 }
  0x63   :  { %11787 = vst [vmem:[#allocation8_spill] sm:$0xff] %v9694_v46  ;;  %v846_v54 = vsub.f32 %v9689_v41, %v9694_v46 }
  0x65   :  { %8673 = vmatpush1.bf16.msra.mxu0 %v9528_v60  ;;  %v9704_v60 = vand.u32 4294901760, %v846_v54  ;;  %v9833_v54 = vsub.f32 %v9785_v61, %v1756_v25 }
  0x67   :  { %11788 = vst [vmem:[#allocation9_spill] sm:$0xff] %v9704_v60 }
  0x68   :  { %764 = vmatmul.mubr.f32.vlgmr.msra.gmra.mrb[0].mxu0 %v9526_v59 }
 0x13b   :  { %v765_v47 = vpop.f32.mrb[0].mxu0 }
 0x13c   :  { %v9106_v48 = vadd.f32 %v765_v47, %v112_v44  ;;  %v767_v50 = vpop.f32.mrb[1].mxu0  ;;  %v11676_v44 = vand.u32 4294901760, %v9795_v21  ;;  %v9825_v47 = vsub.f32 %v9780_v14, %v1753_v18 }
 0x13d   :  { %v9107_v53 = vadd.f32 %v767_v50, %v116_v45  ;;  %v11675_v45 = vand.u32 4294901760, %v9800_v17  ;;  %v11671_v50 = vand.u32 4294901760, %v9811_v24 }
 0x13e   :  { %v9698_v56 = vmax.f32 %v9106_v48, 0.0  ;;  %v11672_v48 = vand.u32 4294901760, %v9806_v19 }
 0x13f   :  { %v9700_v57 = vmax.f32 %v9107_v53, 0.0  ;;  %v11670_v53 = vand.u32 4294901760, %v9816_v26 }
 0x140   :  { %v778_v58 = vand.u32 4294901760, %v9698_v56  ;;  %v1243_v37 = vmul.f32 %v9698_v56, %v9698_v56 }
 0x141   :  { %v776_v59 = vand.u32 4294901760, %v9700_v57  ;;  %v1244_v36 = vmul.f32 %v9700_v57, %v9700_v57 }
 0x142   :  { %v861_v0 = vsub.f32 %v9698_v56, %v778_v58  ;;  %v1247_v62 = vand.u32 4294901760, %v1243_v37 }
 0x143   :  { %777 = vmatprep.subr.mxu1 %v776_v59  ;;  %v855_v1 = vsub.f32 %v9700_v57, %v776_v59  ;;  %v1245_v51 = vand.u32 4294901760, %v1244_v36 }
 0x144   :  { %779 = vmatpush1.msra.mxu1 %v778_v58  ;;  %v862_v2 = vand.u32 4294901760, %v861_v0  ;;  %v1330_v11 = vsub.f32 %v1243_v37, %v1247_v62 }
 0x145   :  { %848 = vmatmul.mubr.f32.vlgmr.msra.gmra.mrb[0].mxu1 %v9704_v60  ;;  %v856_v3 = vand.u32 4294901760, %v855_v1  ;;  %v1324_v63 = vsub.f32 %v1244_v36, %v1245_v51 }
 0x146   :  { %v863_v6 = vsub.f32 %v861_v0, %v862_v2  ;;  %928 = vmatprep.mubr.f32.mxu1 %v11666_v9  ;;  %v1331_v27 = vand.u32 4294901760, %v1330_v11 }
 0x147   :  { %v857_v7 = vsub.f32 %v855_v1, %v856_v3  ;;  %v1325_v22 = vand.u32 4294901760, %v1324_v63 }
 0x148   :  { %v864_v20 = vand.u32 4294901760, %v863_v6  ;;  %v1332_v30 = vsub.f32 %v1330_v11, %v1331_v27  ;;  %v1995_v6 = vsub.f32 %v9816_v26, %v11670_v53 }
 0x149   :  { %v858_v8 = vand.u32 4294901760, %v857_v7  ;;  %v1326_v29 = vsub.f32 %v1324_v63, %v1325_v22  ;;  %v11668_v7 = vand.u32 4294901760, %v9833_v54 }
 0x14a   :  { %v1333_v32 = vand.u32 4294901760, %v1332_v30 }
 0x14b   :  { %859 = vmatprep.subr.mxu1 %v858_v8  ;;  %v1327_v31 = vand.u32 4294901760, %v1326_v29 }
 0x14c   :  { %865 = vmatpush1.msra.mxu1 %v864_v20 }
 0x14d   :  { %7944 = vmatmul.mubr.msk.f32.vlgmr.msra.gmra.mrb[0].mxu1 %vm772_vm1, %v11664_v33  ;;  %938 = vmatprep.subr.mxu1 %v855_v1  ;;  %v11669_v1 = vand.u32 4294901760, %v9825_v47 }
 0x14e   :  { %941 = vmatpush1.msra.mxu1 %v861_v0  ;;  %1004 = vmatprep.mubr.f32.mxu1 %v11666_v9  ;;  %v1862_v0 = vsub.f32 %v9800_v17, %v11675_v45 }
 0x14f   :  { %1014 = vmatprep.subr.mxu1 %v776_v59  ;;  %v1876_v37 = vsub.f32 %v9825_v47, %v11669_v1 }
 0x150   :  { %v1863_v36 = vand.u32 4294901760, %v1862_v0 }
 0x155   :  { %1007 = vmatmul.mubr.f32.vlgmr.msra.gmra.mrb[0].mxu1 %v9689_v41 }
 0x156   :  { %1016 = vmatpush1.msra.mxu1 %v778_v58  ;;  %1079 = vmatprep.mubr.f32.mxu1 %v11666_v9 }
 0x157   :  { %1092 = vmatprep.subr.mxu1 %v856_v3  ;;  %v1988_v3 = vsub.f32 %v9811_v24, %v11671_v50 }
 0x15d   :  { %1083 = vmatmul.mubr.f32.vlgmr.msra.gmra.mrb[0].mxu1 %v9694_v46 }
 0x15e   :  { %1096 = vmatpush1.msra.mxu1 %v862_v2  ;;  %1159 = vmatprep.mubr.f32.mxu1 %v11666_v9  ;;  %v1869_v2 = vsub.f32 %v9806_v19, %v11672_v48 }
 0x15f   :  { %1168 = vmatprep.subr.mxu1 %v776_v59  ;;  %v1981_v59 = vsub.f32 %v9795_v21, %v11676_v44 }
 0x161   :  { %v1982_v20 = vand.u32 4294901760, %v1981_v59  ;;  %v9869_v59 = vld [vmem:[%s11649_s6 + $0xa8] sm:$0xff] }
 0x165   :  { %7945 = vmatmul.mubr.msk.f32.vlgmr.msra.gmra.mrb[0].mxu1 %vm772_vm1, %v11664_v33 }
 0x166   :  { %1170 = vmatpush1.msra.mxu1 %v778_v58  ;;  %1233 = vmatprep.mubr.f32.mxu1 %v11666_v9  ;;  %v1974_v58 = vsub.f32 %v9790_v15, %v11677_v39 }
 0x167   :  { %1246 = vmatprep.subr.mxu1 %v1245_v51 }
 0x168   :  { %v1975_v8 = vand.u32 4294901760, %v1974_v58  ;;  %v9864_v58 = vld [vmem:[%s11649_s6 + $0xa0] sm:$0xff] }
 0x169   :  { %v1807_v0 = vand.u32 4294901760, %v9864_v58 }
 0x16d   :  { %7946 = vmatmul.mubr.msk.f32.vlgmr.msra.gmra.mrb[0].mxu1 %vm772_vm1, %v11664_v33 }
 0x16e   :  { %1248 = vmatpush1.msra.mxu1 %v1247_v62  ;;  %1311 = vmatprep.mubr.f32.mxu1 %v11666_v9 }
 0x16f   :  { %1328 = vmatprep.subr.mxu1 %v1327_v31 }
 0x171   :  { %1317 = vmatmul.mubr.f32.vlgmr.msra.gmra.mrb[2].mxu1 %v9704_v60 }
 0x172   :  { %1334 = vmatpush1.msra.mxu1 %v1333_v32  ;;  %1397 = vmatprep.mubr.f32.mxu1 %v11666_v9 }
 0x173   :  { %1407 = vmatprep.subr.mxu1 %v1324_v63  ;;  %v1996_v63 = vand.u32 4294901760, %v1995_v6  ;;  %v9881_v6 = vld [vmem:[%s11649_s6 + $0x28] sm:$0xff] }
 0x179   :  { %7947 = vmatmul.mubr.msk.f32.vlgmr.msra.gmra.mrb[2].mxu1 %vm772_vm1, %v11664_v33 }
 0x17a   :  { %1410 = vmatpush1.msra.mxu1 %v1330_v11  ;;  %1473 = vmatprep.mubr.f32.mxu1 %v11666_v9  ;;  %v1883_v11 = vsub.f32 %v9833_v54, %v11668_v7 }
 0x17b   :  { %1483 = vmatprep.subr.mxu1 %v1245_v51 }
 0x17c   :  { %v1884_v31 = vand.u32 4294901760, %v1883_v11  ;;  %v9913_v11 = vld [vmem:[%s11649_s6 + $0xb8] sm:$0xff] }
 0x181   :  { %1476 = vmatmul.mubr.f32.vlgmr.msra.gmra.mrb[2].mxu1 %v9689_v41 }
 0x182   :  { %1485 = vmatpush1.msra.mxu1 %v1247_v62  ;;  %1548 = vmatprep.mubr.f32.mxu1 %v11666_v9 }
 0x183   :  { %1561 = vmatprep.subr.mxu1 %v1325_v22  ;;  %v8706_v22 = vpack.c.bf16 %v1982_v20, %v1975_v8  ;;  %v11681_v20 = vand.u32 4294901760, %v9881_v6 }
 0x189   :  { %1552 = vmatmul.mubr.f32.vlgmr.msra.gmra.mrb[2].mxu1 %v9694_v46 }
 0x18a   :  { %1565 = vmatpush1.msra.mxu1 %v1331_v27  ;;  %1628 = vmatprep.mubr.f32.mxu1 %v11666_v9  ;;  %v1877_v27 = vand.u32 4294901760, %v1876_v37 }
 0x18b   :  { %1637 = vmatprep.subr.mxu1 %v1245_v51  ;;  %v1870_v51 = vand.u32 4294901760, %v1869_v2  ;;  %v11686_v2 = vand.u32 4294901760, %v9869_v59 }
 0x18c   :  { %v8712_v32 = vpack.c.bf16 %v1884_v31, %v1877_v27  ;;  %v9922_v31 = vld [vmem:[%s11649_s6 + $0x30] sm:$0xff] }
 0x18d   :  { %v8708_v29 = vpack.c.bf16 %v1870_v51, %v1863_v36  ;;  %v9888_v36 = vsub.f32 %v9864_v58, %v1807_v0  ;;  %v9893_v37 = vsub.f32 %v9869_v59, %v11686_v2  ;;  %v9994_v2 = vld [vmem:[%s11649_s6 + $0x40] sm:$0xff] }
 0x18f   :  { %v11674_v27 = vand.u32 4294901760, %v9893_v37 }
 0x191   :  { %7948 = vmatmul.mubr.msk.f32.vlgmr.msra.gmra.mrb[2].mxu1 %vm772_vm1, %v11664_v33  ;;  %v2009_v1 = vsub.f32 %v9893_v37, %v11674_v27 }
 0x192   :  { %1639 = vmatpush1.msra.mxu1 %v1247_v62  ;;  %1702 = vmatprep.mubr.f32.mxu1 %v11666_v9  ;;  %v1989_v62 = vand.u32 4294901760, %v1988_v3  ;;  %v9876_v3 = vld [vmem:[%s11649_s6 + $0x20] sm:$0xff] }
 0x193   :  { %8707 = vmatprep.subr.bf16.mxu1 %v8706_v22  ;;  %v11683_v8 = vand.u32 4294901760, %v9876_v3  ;;  %v11673_v22 = vand.u32 4294901760, %v9888_v36  ;;  %v2010_v39 = vand.u32 4294901760, %v2009_v1 }
 0x194   :  { %v8710_v30 = vpack.c.bf16 %v1996_v63, %v1989_v62  ;;  %v9903_v62 = vsub.f32 %v9881_v6, %v11681_v20  ;;  %v9908_v63 = vld [vmem:[%s11649_s6 + $0xb0] sm:$0xff] }
 0x195   :  { %v9898_v51 = vsub.f32 %v9876_v3, %v11683_v8  ;;  %v2002_v7 = vsub.f32 %v9888_v36, %v11673_v22 }
 0x196   :  { %v11682_v28 = vand.u32 4294901760, %v9903_v62 }
 0x197   :  { %v11679_v16 = vand.u32 4294901760, %v9898_v51  ;;  %v2003_v44 = vand.u32 4294901760, %v2002_v7  ;;  %v9977_v7 = vld [vmem:[%s11649_s6 + $0xc8] sm:$0xff] }
 0x198   :  { %v1897_v22 = vsub.f32 %v9903_v62, %v11682_v28  ;;  %v1822_v52 = vand.u32 4294901760, %v9977_v7 }
 0x199   :  { %7949 = vmatmul.mubr.msk.f32.vlgmr.msra.gmra.mrb[2].mxu1 %vm772_vm1, %v11664_v33  ;;  %v11684_v33 = vand.u32 4294901760, %v9922_v31  ;;  %v1890_v48 = vsub.f32 %v9898_v51, %v11679_v16  ;;  %v8714_v1 = vpack.c.bf16 %v2010_v39, %v2003_v44 }
 0x19a   :  { %8709 = vmatpush3.bf16.msra.mxu1 %v8708_v29  ;;  %v11680_v29 = vand.u32 4294901760, %v9908_v63  ;;  %v1898_v20 = vand.u32 4294901760, %v1897_v22 }
 0x19b   :  { %8711 = vmatprep.subr.bf16.mxu1 %v8710_v30  ;;  %v11678_v30 = vand.u32 4294901760, %v9913_v11  ;;  %v9958_v27 = vsub.f32 %v9922_v31, %v11684_v33  ;;  %v9972_v33 = vld [vmem:[%s11649_s6 + $0xc0] sm:$0xff] }
 0x19c   :  { %v9942_v53 = vsub.f32 %v9908_v63, %v11680_v29  ;;  %v1891_v29 = vand.u32 4294901760, %v1890_v48  ;;  %v9983_v48 = vpack.c.bf16 %v1798_v49, %v1795_v43  ;;  %v1819_v42 = vand.u32 4294901760, %v9972_v33 }
 0x19d   :  { %v9947_v50 = vsub.f32 %v9913_v11, %v11678_v30  ;;  %v11689_v28 = vand.u32 4294901760, %v9958_v27 }
 0x19e   :  { %8713 = vmatpush3.bf16.msra.mxu1 %v8712_v32  ;;  %v9927_v32 = vld [vmem:[%s11649_s6 + $0x38] sm:$0xff]  ;;  %v11690_v30 = vand.u32 4294901760, %v9942_v53  ;;  %v8716_v43 = vpack.c.bf16 %v1898_v20, %v1891_v29  ;;  %8675 = vmatprep.subr.bf16.mxu0 %v9983_v48  ;;  %v1771_v20 = vand.u32 4294901760, %v9994_v2  ;;  %v1774_v29 = vand.u32 4294901760, %v9999_v34 }
 0x19f   :  { %v11685_v9 = vand.u32 4294901760, %v9927_v32  ;;  %v11687_v16 = vand.u32 4294901760, %v9947_v50  ;;  %v1904_v49 = vsub.f32 %v9958_v27, %v11689_v28  ;;  %8715 = vmatprep.subr.bf16.mxu1 %v8714_v1  ;;  %8677 = vmatpush3.bf16.msra.mxu0 %v10005_v35  ;;  %v10033_v1 = vpack.c.bf16 %v1804_v13, %v1801_v12 }
 0x1a0   :  { %v2016_v22 = vsub.f32 %v9942_v53, %v11690_v30  ;;  %v10058_v5 = vsub.f32 %v9994_v2, %v1771_v20  ;;  %v10061_v12 = vsub.f32 %v9999_v34, %v1774_v29  ;;  %v11696_v34 = vand.u32 4294901760, %v10049_v4 }
 0x1a1   :  { %v9963_v45 = vsub.f32 %v9927_v32, %v11685_v9  ;;  %v2023_v9 = vsub.f32 %v9947_v50, %v11687_v16  ;;  %v1905_v55 = vand.u32 4294901760, %v1904_v49  ;;  %v10039_v49 = vsub.f32 %v9977_v7, %v1822_v52  ;;  %8679 = vmatprep.subr.bf16.mxu0 %v10033_v1 }
 0x1a2   :  { %v2017_v44 = vand.u32 4294901760, %v2016_v22  ;;  %8717 = vmatpush3.bf16.msra.mxu1 %v8716_v43  ;;  %v10036_v43 = vsub.f32 %v9972_v33, %v1819_v42  ;;  %v11792_v28 = vand.u32 4294901760, %v9881_v6 }
 0x1a3   :  { %v11688_v8 = vand.u32 4294901760, %v9963_v45  ;;  %v2024_v16 = vand.u32 4294901760, %v2023_v9  ;;  %v10027_v9 = vld [vmem:[%s11649_s6 + $0xd8] sm:$0xff]  ;;  %v11694_v7 = vand.u32 4294901760, %v10039_v49 }
 0x1a4   :  { %v11691_v13 = vand.u32 4294901760, %v10036_v43  ;;  %v1828_v61 = vand.u32 4294901760, %v10027_v9 }
 0x1a5   :  { %v1911_v39 = vsub.f32 %v9963_v45, %v11688_v8  ;;  %v10022_v8 = vld [vmem:[%s11649_s6 + $0xd0] sm:$0xff]  ;;  %v8718_v22 = vpack.c.bf16 %v2024_v16, %v2017_v44  ;;  %v10055_v16 = vpack.c.bf16 %v1756_v25, %v1753_v18  ;;  %v11692_v18 = vand.u32 4294901760, %v10058_v5 }
 0x1a6   :  { %v1825_v14 = vand.u32 4294901760, %v10022_v8  ;;  %v11693_v25 = vand.u32 4294901760, %v10061_v12  ;;  %v11790_v44 = vand.u32 4294901760, %v9869_v59 }
 0x1a7   :  { %v1912_v10 = vand.u32 4294901760, %v1911_v39  ;;  %v10044_v39 = vld [vmem:[%s11649_s6 + $0x50] sm:$0xff]  ;;  %8719 = vmatprep.subr.bf16.mxu1 %v8718_v22  ;;  %8681 = vmatpush3.bf16.msra.mxu0 %v10055_v16  ;;  %v2037_v22 = vsub.f32 %v10039_v49, %v11694_v7  ;;  %v1918_v58 = vsub.f32 %v10058_v5, %v11692_v18  ;;  %v11796_v18 = vand.u32 4294901760, %v9922_v31  ;;  %v10131_v31 = vld [vmem:[%s11649_s6 + $0xe8] sm:$0xff] }
 0x1a8   :  { %v11697_v2 = vand.u32 4294901760, %v10044_v39  ;;  %v1925_v59 = vsub.f32 %v10061_v12, %v11693_v25  ;;  %v11797_v25 = vand.u32 4294901760, %v9927_v32 }
 0x1a9   :  { %v8720_v33 = vpack.c.bf16 %v1912_v10, %v1905_v55  ;;  %v10077_v55 = vpack.c.bf16 %v11790_v44, %v1807_v0  ;;  %v2030_v10 = vsub.f32 %v10036_v43, %v11691_v13  ;;  %v11793_v0 = vand.u32 4294901760, %v9908_v63  ;;  %v10119_v63 = vld [vmem:[%s11649_s6 + $0xe0] sm:$0xff] }
 0x1aa   :  { %v11794_v44 = vand.u32 4294901760, %v9913_v11  ;;  %v2038_v6 = vand.u32 4294901760, %v2037_v22  ;;  %v10114_v7 = vpack.c.bf16 %v11797_v25, %v11796_v18  ;;  %v1926_v11 = vand.u32 4294901760, %v1925_v59 }
 0x1ab   :  { %8721 = vmatpush3.bf16.msra.mxu1 %v8720_v33  ;;  %v11791_v33 = vand.u32 4294901760, %v9876_v3  ;;  %v10104_v3 = vsub.f32 %v10022_v8, %v1825_v14  ;;  %8683 = vmatprep.subr.bf16.mxu0 %v10077_v55  ;;  %v1919_v8 = vand.u32 4294901760, %v1918_v58  ;;  %v10138_v25 = vsub.f32 %v10049_v4, %v11696_v34  ;;  %v10145_v58 = vld [vmem:[%s11649_s6 + $0x60] sm:$0xff] }
 0x1ac   :  { %v10101_v13 = vpack.c.bf16 %v11794_v44, %v11793_v0  ;;  %11798 = vst [vmem:[#allocation12_spill] sm:$0xff] %v10114_v7  ;;  %v10140_v22 = vpack.c.bf16 %v1822_v52, %v1819_v42 }
 0x1ad   :  { %v10089_v30 = vpack.c.bf16 %v11792_v28, %v11791_v33  ;;  %v2031_v28 = vand.u32 4294901760, %v2030_v10  ;;  %v10108_v33 = vsub.f32 %v10027_v9, %v1828_v61  ;;  %v11695_v10 = vand.u32 4294901760, %v10104_v3 }
 0x1ae   :  { %11795 = vst [vmem:[#allocation11_spill] sm:$0xff] %v10101_v13  ;;  %v10126_v9 = vsub.f32 %v10044_v39, %v11697_v2  ;;  %11799 = vst [vmem:[#allocation13_spill] sm:$0xff] %v10140_v22  ;;  %v8724_v59 = vpack.c.bf16 %v1926_v11, %v1919_v8  ;;  %v11702_v52 = vand.u32 4294901760, %v10138_v25  ;;  %v1834_v8 = vand.u32 4294901760, %v10131_v31 }
 0x1af   :  { %8685 = vmatpush3.bf16.msra.mxu0 %v10089_v30  ;;  %v8722_v32 = vpack.c.bf16 %v2038_v6, %v2031_v28  ;;  %v11698_v18 = vand.u32 4294901760, %v10108_v33  ;;  %v2044_v0 = vsub.f32 %v10104_v3, %v11695_v10  ;;  %v1831_v28 = vand.u32 4294901760, %v10119_v63  ;;  %v88_v6 = vld [vmem:[%s11649_s6 + $0x68] sm:$0xff] }
 0x1b0   :  { %8687 = vmatprep.subr.bf16.mxu0 %v10101_v13  ;;  %v11701_v44 = vand.u32 4294901760, %v10126_v9  ;;  %v10160_v11 = vpack.c.bf16 %v1774_v29, %v1771_v20  ;;  %v1783_v2 = vand.u32 4294901760, %v10145_v58  ;;  %v1939_v23 = vsub.f32 %v10138_v25, %v11702_v52 }
 0x1b1   :  { %8723 = vmatprep.subr.bf16.mxu1 %v8722_v32  ;;  %v2051_v42 = vsub.f32 %v10108_v33, %v11698_v18  ;;  %v2045_v10 = vand.u32 4294901760, %v2044_v0  ;;  %v10167_v32 = vsub.f32 %v10119_v63, %v1831_v28  ;;  %v10175_v20 = vsub.f32 %v10131_v31, %v1834_v8  ;;  %v106_v63 = vld [vmem:[%s11649_s6 + $0xf8] sm:$0xff] }
 0x1b2   :  { %11800 = vst [vmem:[#allocation14_spill] sm:$0xff] %v10160_v11  ;;  %8725 = vmatpush3.bf16.msra.mxu1 %v8724_v59  ;;  %v1932_v34 = vsub.f32 %v10126_v9, %v11701_v44  ;;  %v1786_v29 = vand.u32 4294901760, %v88_v6  ;;  %v105_v59 = vld [vmem:[%s11649_s6 + $0xf0] sm:$0xff]  ;;  %v10185_v44 = vsub.f32 %v10145_v58, %v1783_v2  ;;  %v10187_v52 = vpack.c.bf16 %v1828_v61, %v1825_v14 }
 0x1b3   :  { %8689 = vmatpush3.bf16.msra.mxu0 %v10114_v7  ;;  %v2052_v18 = vand.u32 4294901760, %v2051_v42  ;;  %v11715_v42 = vand.u32 4294901760, %v10167_v32  ;;  %v1940_v31 = vand.u32 4294901760, %v1939_v23  ;;  %v11718_v41 = vand.u32 4294901760, %v10175_v20  ;;  %v89_v14 = vld [vmem:[%s11649_s6 + $0x70] sm:$0xff]  ;;  %v90_v23 = vld [vmem:[%s11649_s6 + $0x78] sm:$0xff] }
 0x1b4   :  { %8691 = vmatprep.subr.bf16.mxu0 %v10140_v22  ;;  %v1933_v0 = vand.u32 4294901760, %v1932_v34  ;;  %11801 = vst [vmem:[#allocation15_spill] sm:$0xff] %v10187_v52  ;;  %v10190_v60 = vsub.f32 %v88_v6, %v1786_v29  ;;  %v1837_v22 = vand.u32 4294901760, %v105_v59  ;;  %v1840_v7 = vand.u32 4294901760, %v106_v63 }
 0x1b5   :  { %v8726_v46 = vpack.c.bf16 %v2052_v18, %v2045_v10  ;;  %v2058_v40 = vsub.f32 %v10167_v32, %v11715_v42  ;;  %v2065_v10 = vsub.f32 %v10175_v20, %v11718_v41  ;;  %v11802_v58 = vand.u32 4294901760, %v10044_v39 }
 0x1b6   :  { %v8728_v61 = vpack.c.bf16 %v1940_v31, %v1933_v0  ;;  %v11723_v18 = vand.u32 4294901760, %v10190_v60  ;;  %v11803_v6 = vand.u32 4294901760, %v10049_v4  ;;  %v10217_v0 = vsub.f32 %v105_v59, %v1837_v22 }
 0x1b7   :  { %8693 = vmatpush3.bf16.msra.mxu0 %v10160_v11  ;;  %8727 = vmatprep.subr.bf16.mxu1 %v8726_v46  ;;  %v2059_v34 = vand.u32 4294901760, %v2058_v40  ;;  %v11804_v11 = vand.u32 4294901760, %v10185_v44  ;;  %v10219_v31 = vsub.f32 %v106_v63, %v1840_v7  ;;  %v2066_v41 = vand.u32 4294901760, %v2065_v10 }
 0x1b8   :  { %8695 = vmatprep.subr.bf16.mxu0 %v10187_v52  ;;  %v10212_v42 = vpack.c.bf16 %v11803_v6, %v11802_v58  ;;  %8729 = vmatpush3.bf16.msra.mxu1 %v8728_v61  ;;  %v1953_v52 = vsub.f32 %v10190_v60, %v11723_v18  ;;  %v1789_v39 = vand.u32 4294901760, %v89_v14  ;;  %v1792_v13 = vand.u32 4294901760, %v90_v23 }
 0x1b9   :  { %v1946_v46 = vsub.f32 %v10185_v44, %v11804_v11  ;;  %v11725_v58 = vand.u32 4294901760, %v10217_v0  ;;  %v11724_v40 = vand.u32 4294901760, %v10219_v31  ;;  %v10227_v11 = vpack.c.bf16 %v1834_v8, %v1831_v28 }
 0x1ba   :  { %v8730_v59 = vpack.c.bf16 %v2066_v41, %v2059_v34  ;;  %v1954_v63 = vand.u32 4294901760, %v1953_v52  ;;  %v10229_v6 = vsub.f32 %v89_v14, %v1789_v39  ;;  %v10231_v61 = vsub.f32 %v90_v23, %v1792_v13 }
 0x1bb   :  { %v1947_v4 = vand.u32 4294901760, %v1946_v46  ;;  %8697 = vmatpush3.bf16.msra.mxu0 %v10212_v42  ;;  %v2072_v10 = vsub.f32 %v10217_v0, %v11725_v58  ;;  %v2079_v46 = vsub.f32 %v10219_v31, %v11724_v40  ;;  %v10240_v18 = vpack.c.bf16 %v1786_v29, %v1783_v2 }
 0x1bc   :  { %8699 = vmatprep.subr.bf16.mxu0 %v10227_v11  ;;  %8731 = vmatprep.subr.bf16.mxu1 %v8730_v59  ;;  %v1959_v41 = vand.u32 4294901760, %v10229_v6  ;;  %v1966_v52 = vand.u32 4294901760, %v10231_v61  ;;  %v10245_v14 = vpack.c.bf16 %v1840_v7, %v1837_v22  ;;  %v10250_v2 = vpack.c.bf16 %v1792_v13, %v1789_v39 }
 0x1bd   :  { %v8732_v28 = vpack.c.bf16 %v1954_v63, %v1947_v4  ;;  %v2073_v8 = vand.u32 4294901760, %v2072_v10  ;;  %v2080_v34 = vand.u32 4294901760, %v2079_v46  ;;  %v8738_v7 = vpack.c.bf16 %v9795_v21, %v9790_v15 }
 0x1be   :  { %v1960_v23 = vsub.f32 %v10229_v6, %v1959_v41  ;;  %v1967_v40 = vsub.f32 %v10231_v61, %v1966_v52 }
 0x1bf   :  { %8701 = vmatpush3.bf16.msra.mxu0 %v10240_v18  ;;  %8733 = vmatpush3.bf16.msra.mxu1 %v8732_v28  ;;  %v8734_v58 = vpack.c.bf16 %v2080_v34, %v2073_v8 }
 0x1c0   :  { %8703 = vmatprep.subr.bf16.mxu0 %v10245_v14  ;;  %v1961_v29 = vand.u32 4294901760, %v1960_v23  ;;  %v1968_v4 = vand.u32 4294901760, %v1967_v40 }
 0x1c1   :  { %8735 = vmatprep.subr.bf16.mxu1 %v8734_v58 }
 0x1c2   :  { %v8736_v59 = vpack.c.bf16 %v1968_v4, %v1961_v29 }
 0x1c3   :  { %8705 = vmatpush3.bf16.msra.mxu0 %v10250_v2 }
 0x1c4   :  { %8737 = vmatpush3.bf16.msra.mxu1 %v8736_v59  ;;  %8739 = vmatprep.subr.bf16.mxu0 %v8738_v7  ;;  %v10280_v59 = vpack.c.bf16 %v1966_v52, %v1959_v41 }
 0x1c5   :  { %8771 = vmatprep.subr.bf16.mxu1 %v9983_v48 }
 0x240   :  { %v1236_v29 = vpop.f32.mrb[0].mxu1 }
 0x241   :  { %v1238_v4 = vpop.f32.mrb[1].mxu1  ;;  %v1241_v7 = vmul.f32 0.125, %v1236_v29 }
 0x242   :  { %v1242_v10 = vmul.f32 0.125, %v1238_v4 }
 0x243   :  { %v1712_v46 = vmul.f32 %v1241_v7, %v1241_v7  ;;  %v1719_v23 = vrot.slane %v1241_v7, %v9681_v38  ;;  %v8742_v7 = vpack.c.bf16 %v9816_v26, %v9811_v24 }
 0x244   :  { %v1713_v28 = vmul.f32 %v1242_v10, %v1242_v10  ;;  %v1723_v34 = vrot.slane %v1242_v10, %v9681_v38 }
 0x245   :  { %v1724_v29 = vsub.f32 %v9698_v56, %v1719_v23 }
 0x26c   :  { %v1705_v63 = vpop.f32.mrb[2].mxu1 }
 0x26d   :  { %v1710_v40 = vmul.f32 0.125, %v1705_v63  ;;  %v1707_v58 = vpop.f32.mrb[3].mxu1  ;;  %v1725_v63 = vsub.f32 %v9700_v57, %v1723_v34  ;;  %v8740_v34 = vpack.c.bf16 %v9806_v19, %v9800_v17 }
 0x26e   :  { %v1711_v39 = vmul.f32 0.125, %v1707_v58 }
 0x26f   :  { %v1714_v13 = vsub.f32 %v1710_v40, %v1712_v46 }
 0x270   :  { %v1715_v8 = vsub.f32 %v1711_v39, %v1713_v28 }
 0x271   :  { %v1726_v22 = vadd.f32 1e-05, %v1714_v13 }
 0x272   :  { %v1727_v21 = vadd.f32 1e-05, %v1715_v8 }
 0x273   :  { %9243 = vrsqrt.f32 %v1726_v22 }
 0x274   :  { %9245 = vrsqrt.f32 %v1727_v21 }
 0x27d   :  { %v9244_v41 = vpop.eup %9243 }
 0x27e   :  { %v9246_v52 = vpop.eup %9245  ;;  %v1733_v4 = vrot.slane %v9244_v41, %v9681_v38  ;;  %v8744_v41 = vpack.c.bf16 %v9833_v54, %v9825_v47 }
 0x27f   :  { %v1737_v58 = vrot.slane %v9246_v52, %v9681_v38  ;;  %v11805_v52 = vld [vmem:[#allocation11_spill] sm:$0xff] }
 0x280   :  { %v1738_v40 = vmul.f32 %v1733_v4, %v1724_v29  ;;  %v11806_v29 = vld [vmem:[#allocation12_spill] sm:$0xff]  ;;  %v11807_v4 = vpack.c.bf16 %v9893_v37, %v9888_v36 }
 0x281   :  { %v1739_v39 = vmul.f32 %v1737_v58, %v1725_v63  ;;  %v11808_v63 = vld [vmem:[#allocation13_spill] sm:$0xff]  ;;  %v11809_v58 = vpack.c.bf16 %v9903_v62, %v9898_v51 }
 0x282   :  { %v10288_v13 = vand.u32 4294901760, %v1738_v40 }
 0x283   :  { %v1842_v22 = vand.u32 4294901760, %v1739_v39 }
 0x284   :  { %v1849_v21 = vsub.f32 %v1738_v40, %v10288_v13  ;;  %v11810_v40 = vld [vmem:[#allocation14_spill] sm:$0xff] }
 0x285   :  { %2083 = vmatprep.mubr.f32.mxu1 %v1842_v22  ;;  %v1843_v46 = vsub.f32 %v1739_v39, %v1842_v22  ;;  %v11811_v39 = vpack.c.bf16 %v9947_v50, %v9942_v53 }
 0x286   :  { %2085 = vmatmul.mubr.f32.vlgmr.msra.gmra.mrb[4].mxu1 %v10288_v13  ;;  %v1850_v10 = vand.u32 4294901760, %v1849_v21 }
 0x287   :  { %8773 = vmatpush3.bf16.msra.mxu1 %v10005_v35  ;;  %v1844_v56 = vand.u32 4294901760, %v1843_v46 }
 0x288   :  { %8775 = vmatprep.subr.bf16.mxu1 %v10033_v1  ;;  %v1851_v57 = vsub.f32 %v1849_v21, %v1850_v10 }
 0x289   :  { %2327 = vmatprep.mubr.f32.mxu1 %v1844_v56  ;;  %v1845_v28 = vsub.f32 %v1843_v46, %v1844_v56  ;;  %v11813_v56 = vpack.c.bf16 %v9963_v45, %v9958_v27 }
 0x28a   :  { %v1852_v23 = vand.u32 4294901760, %v1851_v57  ;;  %v11814_v57 = vpack.c.bf16 %v10039_v49, %v10036_v43 }
 0x28b   :  { %8777 = vmatpush3.bf16.msra.mxu1 %v10055_v16  ;;  %v1846_v8 = vand.u32 4294901760, %v1845_v28  ;;  %v11815_v28 = vpack.c.bf16 %v10061_v12, %v10058_v5 }
 0x28c   :  { %8779 = vmatprep.subr.bf16.mxu1 %v10077_v55 }
 0x28d   :  { %1847 = vmatprep.mubr.f32.mxu0 %v1846_v8  ;;  %v11816_v8 = vpack.c.bf16 %v10108_v33, %v10104_v3 }
 0x28e   :  { %1853 = vmatmul.mubr.f32.vlgmr.msra.gmra.mrb[2].mxu0 %v1852_v23  ;;  %v11818_v23 = vpack.c.bf16 %v10175_v20, %v10167_v32 }
 0x28f   :  { %8741 = vmatpush3.bf16.msra.mxu0 %v8740_v34  ;;  %8781 = vmatpush3.bf16.msra.mxu1 %v10089_v30  ;;  %v11817_v34 = vpack.c.bf16 %v10138_v25, %v10126_v9 }
 0x290   :  { %2220 = vmatprep.mubr.f32.mxu0 %v1843_v46  ;;  %8743 = vmatprep.subr.bf16.mxu0 %v8742_v7  ;;  %v11812_v46 = vld [vmem:[#allocation15_spill] sm:$0xff]  ;;  %v11819_v7 = vpack.c.bf16 %v10190_v60, %v10185_v44 }
 0x291   :  { %8783 = vmatprep.subr.bf16.mxu1 %v11805_v52 }
 0x293   :  { %8745 = vmatpush3.bf16.msra.mxu0 %v8744_v41  ;;  %8785 = vmatpush3.bf16.msra.mxu1 %v11806_v29  ;;  %v11820_v41 = vpack.c.bf16 %v10219_v31, %v10217_v0 }
 0x294   :  { %8747 = vmatprep.subr.bf16.mxu0 %v11807_v4  ;;  %8787 = vmatprep.subr.bf16.mxu1 %v11808_v63  ;;  %v11821_v4 = vand.u32 4294901760, %v9790_v15  ;;  %v11827_v15 = vand.u32 4294901760, %v9811_v24  ;;  %v11832_v24 = vand.u32 4294901760, %v9893_v37  ;;  %v11835_v37 = vand.u32 4294901760, %v9942_v53  ;;  %v10416_v53 = vld [vmem:[%s11651_s8 + $0x38] sm:$0xff] }
 0x297   :  { %8749 = vmatpush3.bf16.msra.mxu0 %v11809_v58  ;;  %8789 = vmatpush3.bf16.msra.mxu1 %v11810_v40  ;;  %v11822_v58 = vld [vmem:[#allocation10_spill] sm:$0xff] }
 0x298   :  { %8751 = vmatprep.subr.bf16.mxu0 %v11811_v39  ;;  %8791 = vmatprep.subr.bf16.mxu1 %v11812_v46  ;;  %v11823_v39 = vand.u32 4294901760, %v11822_v58 }
 0x29b   :  { %8753 = vmatpush3.bf16.msra.mxu0 %v11813_v56  ;;  %8793 = vmatpush3.bf16.msra.mxu1 %v10212_v42  ;;  %v8802_v56 = vpack.c.bf16 %v11823_v39, %v11821_v4  ;;  %v11840_v4 = vand.u32 4294901760, %v10039_v49  ;;  %v11842_v49 = vand.u32 4294901760, %v10061_v12 }
 0x29c   :  { %8755 = vmatprep.subr.bf16.mxu0 %v11814_v57  ;;  %8795 = vmatprep.subr.bf16.mxu1 %v10227_v11 }
 0x29f   :  { %8757 = vmatpush3.bf16.msra.mxu0 %v11815_v28  ;;  %8797 = vmatpush3.bf16.msra.mxu1 %v10240_v18  ;;  %v11828_v28 = vand.u32 4294901760, %v9816_v26 }
 0x2a0   :  { %8759 = vmatprep.subr.bf16.mxu0 %v11816_v8  ;;  %8799 = vmatprep.subr.bf16.mxu1 %v10245_v14 }
 0x2a1   :  { %v8806_v8 = vpack.c.bf16 %v11828_v28, %v11827_v15  ;;  %v11844_v15 = vand.u32 4294901760, %v10108_v33  ;;  %v2615_v33 = vld [vmem:[%s11845_s26] sm:$0xff] }
 0x2a3   :  { %8761 = vmatpush3.bf16.msra.mxu0 %v11817_v34  ;;  %8801 = vmatpush3.bf16.msra.mxu1 %v10250_v2  ;;  %v11838_v34 = vand.u32 4294901760, %v9963_v45  ;;  %v10442_v45 = vld [vmem:[%s11651_s8 + $0x20] sm:$0xff] }
 0x2a4   :  { %8763 = vmatprep.subr.bf16.mxu0 %v11818_v23  ;;  %8835 = vmatprep.subr.bf16.mxu1 %v9983_v48  ;;  %v11824_v48 = vpack.c.bf16 %v10231_v61, %v10229_v6 }
 0x2a6   :  { %2331 = vmatmul.mubr.f32.vlgmr.msra.gmra.mrb[6].mxu1 %v1850_v10  ;;  %v11826_v10 = vand.u32 4294901760, %v9806_v19  ;;  %v11831_v19 = vand.u32 4294901760, %v9888_v36  ;;  %v10394_v36 = vld [vmem:[%s11651_s8] sm:$0xff] }
 0x2a7   :  { %8765 = vmatpush3.bf16.msra.mxu0 %v11819_v7  ;;  %8837 = vmatpush3.bf16.msra.mxu1 %v10005_v35  ;;  %v11825_v35 = vand.u32 4294901760, %v9800_v17  ;;  %v10373_v17 = vld [vmem:[%s11651_s8 + $0x8] sm:$0xff] }
 0x2a8   :  { %2601 = vmatprep.mubr.f32.mxu1 %v1842_v22  ;;  %8767 = vmatprep.subr.bf16.mxu0 %v11820_v41  ;;  %v8810_v26 = vpack.c.bf16 %v11832_v24, %v11831_v19  ;;  %v11839_v41 = vand.u32 4294901760, %v10036_v43  ;;  %v11841_v43 = vand.u32 4294901760, %v10058_v5 }
 0x2a9   :  { %8839 = vmatprep.subr.bf16.mxu1 %v10033_v1  ;;  %v8804_v57 = vpack.c.bf16 %v11826_v10, %v11825_v35  ;;  %v11829_v1 = vand.u32 4294901760, %v9825_v47  ;;  %v10384_v47 = vld [vmem:[%s11651_s8 + $0x18] sm:$0xff] }
 0x2aa   :  { %v8818_v58 = vpack.c.bf16 %v11840_v4, %v11839_v41 }
 0x2ab   :  { %8769 = vmatpush3.bf16.msra.mxu0 %v11824_v48  ;;  %8841 = vmatpush3.bf16.msra.mxu1 %v10055_v16  ;;  %v11830_v16 = vand.u32 4294901760, %v9833_v54  ;;  %v2672_v54 = vand.u32 4294901760, %v10373_v17  ;;  %v8820_v48 = vpack.c.bf16 %v11842_v49, %v11841_v43 }
 0x2ac   :  { %8803 = vmatprep.subr.bf16.mxu0 %v8802_v56  ;;  %8843 = vmatprep.subr.bf16.mxu1 %v10077_v55  ;;  %v11833_v55 = vand.u32 4294901760, %v9898_v51  ;;  %v10405_v51 = vld [vmem:[%s11651_s8 + $0x10] sm:$0xff] }
 0x2ad   :  { %v8808_v6 = vpack.c.bf16 %v11830_v16, %v11829_v1  ;;  %v2678_v7 = vand.u32 4294901760, %v10405_v51  ;;  %v11846_v16 = vand.u32 4294901760, %v10126_v9  ;;  %v2670_v9 = vsel %vm2609_vm2, %v2615_v33, 0 }
 0x2ae   :  { %2223 = vmatmul.mubr.f32.vlgmr.msra.gmra.mrb[4].mxu0 %v1849_v21 }
 0x2af   :  { %8805 = vmatpush3.bf16.msra.mxu0 %v8804_v57  ;;  %2497 = vmatprep.mubr.f32.mxu0 %v1842_v22  ;;  %v11836_v22 = vand.u32 4294901760, %v9947_v50  ;;  %v10421_v50 = vsub.f32 %v10373_v17, %v2672_v54  ;;  %v11843_v57 = vand.u32 4294901760, %v10104_v3 }
 0x2b0   :  { %8845 = vmatpush3.bf16.msra.mxu1 %v10089_v30  ;;  %8807 = vmatprep.subr.bf16.mxu0 %v8806_v8  ;;  %v11834_v30 = vand.u32 4294901760, %v9903_v62  ;;  %v10411_v62 = vld [vmem:[%s11651_s8 + $0x28] sm:$0xff]  ;;  %v10463_v8 = vsub.f32 %v10405_v51, %v2678_v7 }
 0x2b1   :  { %8847 = vmatprep.subr.bf16.mxu1 %v11805_v52  ;;  %v8814_v21 = vpack.c.bf16 %v11836_v22, %v11835_v37  ;;  %v2676_v52 = vand.u32 4294901760, %v10384_v47  ;;  %v2680_v56 = vand.u32 4294901760, %v10411_v62  ;;  %v2758_v35 = vand.u32 4294901760, %v10421_v50 }
 0x2b2   :  { %v8812_v61 = vpack.c.bf16 %v11834_v30, %v11833_v55  ;;  %v8822_v28 = vpack.c.bf16 %v11844_v15, %v11843_v57  ;;  %v11850_v22 = vand.u32 4294901760, %v10185_v44 }
 0x2b3   :  { %8809 = vmatpush3.bf16.msra.mxu0 %v8808_v6  ;;  %v10435_v39 = vsub.f32 %v10384_v47, %v2676_v52  ;;  %v10470_v1 = vsub.f32 %v10411_v62, %v2680_v56  ;;  %v2759_v19 = vsub.f32 %v10421_v50, %v2758_v35 }
 0x2b4   :  { %8849 = vmatpush3.bf16.msra.mxu1 %v11806_v29  ;;  %8811 = vmatprep.subr.bf16.mxu0 %v8810_v26  ;;  %v2674_v29 = vand.u32 4294901760, %v10394_v36  ;;  %v2776_v26 = vand.u32 4294901760, %v10463_v8 }
 0x2b5   :  { %8851 = vmatprep.subr.bf16.mxu1 %v11808_v63  ;;  %v11837_v63 = vand.u32 4294901760, %v9958_v27  ;;  %v2684_v27 = vand.u32 4294901760, %v10416_v53  ;;  %v2770_v12 = vand.u32 4294901760, %v10435_v39  ;;  %v2760_v62 = vand.u32 4294901760, %v2759_v19 }
 0x2b6   :  { %v10456_v10 = vsub.f32 %v10394_v36, %v2674_v29  ;;  %v2782_v36 = vand.u32 4294901760, %v10470_v1  ;;  %v2777_v44 = vsub.f32 %v10463_v8, %v2776_v26  ;;  %v8868_v17 = vpack.c.bf16 %v2678_v7, %v2674_v29 }
 0x2b7   :  { %8813 = vmatpush3.bf16.msra.mxu0 %v8812_v61  ;;  %v8816_v23 = vpack.c.bf16 %v11838_v34, %v11837_v63  ;;  %v10473_v3 = vsub.f32 %v10416_v53, %v2684_v27  ;;  %v2771_v61 = vsub.f32 %v10435_v39, %v2770_v12  ;;  %v10517_v63 = vand.u32 4294901760, %v2670_v9 }
 0x2b8   :  { %8853 = vmatpush3.bf16.msra.mxu1 %v11810_v40  ;;  %8815 = vmatprep.subr.bf16.mxu0 %v8814_v21  ;;  %v10447_v40 = vld [vmem:[%s11651_s8 + $0x30] sm:$0xff]  ;;  %v2764_v24 = vand.u32 4294901760, %v10456_v10  ;;  %v2783_v34 = vsub.f32 %v10470_v1, %v2782_v36  ;;  %v11854_v7 = vmov 0.0  }
 0x2b9   :  { %8855 = vmatprep.subr.bf16.mxu1 %v11812_v46  ;;  %v2682_v46 = vand.u32 4294901760, %v10442_v45  ;;  %v2686_v5 = vand.u32 4294901760, %v10447_v40  ;;  %v2794_v37 = vand.u32 4294901760, %v10473_v3  ;;  %v2746_v41 = vsub.f32 %v2670_v9, %v10517_v63 }
 0x2ba   :  { %v2765_v53 = vsub.f32 %v10456_v10, %v2764_v24  ;;  %v2784_v43 = vand.u32 4294901760, %v2783_v34 }
 0x2bb   :  { %8817 = vmatpush3.bf16.msra.mxu0 %v8816_v23  ;;  %v10489_v47 = vsub.f32 %v10442_v45, %v2682_v46  ;;  %v10492_v55 = vsub.f32 %v10447_v40, %v2686_v5  ;;  %v2795_v23 = vsub.f32 %v10473_v3, %v2794_v37  ;;  %v8870_v45 = vpack.c.bf16 %v2684_v27, %v2680_v56 }
 0x2bc   :  { %8857 = vmatpush3.bf16.msra.mxu1 %v10212_v42  ;;  %8819 = vmatprep.subr.bf16.mxu0 %v8818_v58  ;;  %v11847_v42 = vand.u32 4294901760, %v10138_v25  ;;  %v11848_v25 = vand.u32 4294901760, %v10167_v32  ;;  %v11852_v32 = vand.u32 4294901760, %v10217_v0  ;;  %v10526_v0 = vpack.c.bf16 %v2676_v52, %v2672_v54 }
 0x2bd   :  { %8859 = vmatprep.subr.bf16.mxu1 %v10227_v11  ;;  %v11849_v11 = vand.u32 4294901760, %v10175_v20  ;;  %v11853_v20 = vand.u32 4294901760, %v10219_v31  ;;  %v2772_v31 = vand.u32 4294901760, %v2771_v61  ;;  %v2766_v4 = vand.u32 4294901760, %v2765_v53 }
 0x2be   :  { %v8824_v6 = vpack.c.bf16 %v11847_v42, %v11846_v16  ;;  %v2747_v54 = vand.u32 4294901760, %v2746_v41  ;;  %v2796_v49 = vand.u32 4294901760, %v2795_v23  ;;  %v8882_v27 = vpack.c.bf16 %v10435_v39, %v10421_v50 }
 0x2bf   :  { %8821 = vmatpush3.bf16.msra.mxu0 %v8820_v48  ;;  %v8826_v30 = vpack.c.bf16 %v11849_v11, %v11848_v25  ;;  %v8830_v51 = vpack.c.bf16 %v11853_v20, %v11852_v32  ;;  %v8874_v40 = vpack.c.bf16 %v2772_v31, %v2760_v62  ;;  %v8872_v48 = vpack.c.bf16 %v2686_v5, %v2682_v46 }
 0x2c0   :  { %8861 = vmatpush3.bf16.msra.mxu1 %v10240_v18  ;;  %8823 = vmatprep.subr.bf16.mxu0 %v8822_v28  ;;  %v11851_v18 = vand.u32 4294901760, %v10190_v60  ;;  %v2788_v60 = vand.u32 4294901760, %v10489_v47  ;;  %v2748_v29 = vsub.f32 %v2746_v41, %v2747_v54  ;;  %v8878_v33 = vpack.c.bf16 %v2796_v49, %v2784_v43 }
 0x2c1   :  { %8863 = vmatprep.subr.bf16.mxu1 %v10245_v14  ;;  %v2800_v14 = vand.u32 4294901760, %v10492_v55  ;;  %v8886_v46 = vpack.c.bf16 %v10473_v3, %v10470_v1  ;;  %v8898_v5 = vpack.c.bf16 %v2770_v12, %v2758_v35  ;;  %v8900_v42 = vpack.c.bf16 %v2776_v26, %v2764_v24  ;;  %v7950_v12 = vld [vmem:[%s11650_s7] ss:$0 sm:$0xff] }
 0x2c2   :  { %v8828_v21 = vpack.c.bf16 %v11851_v18, %v11850_v22  ;;  %v2789_v52 = vsub.f32 %v10489_v47, %v2788_v60  ;;  %v2749_v16 = vand.u32 4294901760, %v2748_v29  ;;  %v11857_v29 = vld [vmem:[#allocation9_spill] sm:$0xff] }
 0x2c3   :  { %8825 = vmatpush3.bf16.msra.mxu0 %v8824_v6  ;;  %v2801_v58 = vsub.f32 %v10492_v55, %v2800_v14  ;;  %v8902_v6 = vpack.c.bf16 %v2794_v37, %v2782_v36  ;;  %v8904_v50 = vpack.c.bf16 %v2800_v14, %v2788_v60  ;;  %v2624_v60 = vld [vmem:[%s11652_s9] sm:$0x3] }
 0x2c4   :  { %8865 = vmatpush3.bf16.msra.mxu1 %v10250_v2  ;;  %8827 = vmatprep.subr.bf16.mxu0 %v8826_v30  ;;  %v2778_v2 = vand.u32 4294901760, %v2777_v44  ;;  %v2790_v15 = vand.u32 4294901760, %v2789_v52  ;;  %v2662_v14 = vrot.slane %v2624_v60, %v9681_v38 }
 0x2c5   :  { %8867 = vmatprep.subr.bf16.mxu1 %v10526_v0  ;;  %v2802_v28 = vand.u32 4294901760, %v2801_v58 }
 0x2c6   :  { %v8876_v57 = vpack.c.bf16 %v2778_v2, %v2766_v4 }
 0x2c7   :  { %2603 = vmatmul.mubr.f32.vlgmr.msra.gmra.mrb[8].mxu1 %v10288_v13  ;;  %8829 = vmatpush3.bf16.msra.mxu0 %v8828_v21  ;;  %v8880_v56 = vpack.c.bf16 %v2802_v28, %v2790_v15 }
 0x2c8   :  { %8831 = vmatprep.subr.bf16.mxu0 %v8830_v51  ;;  %8869 = vmatpush1.bf16.msra.mxu1 %v8868_v17 }
 0x2c9   :  { %8871 = vmatprep.subr.bf16.mxu1 %v8870_v45  ;;  %2744 = vmatprep.mubr.f32.mxu1 %v11854_v7 }
 0x2cb   :  { %8833 = vmatpush3.bf16.msra.mxu0 %v10280_v59  ;;  %v8884_v59 = vpack.c.bf16 %v10463_v8, %v10456_v10 }
 0x2cc   :  { %8875 = vmatprep.subr.bf16.mxu0 %v8874_v40  ;;  %8873 = vmatpush1.bf16.msra.mxu1 %v8872_v48 }
 0x2ce   :  { %2499 = vmatmul.mubr.f32.vlgmr.msra.gmra.mrb[6].mxu0 %v10288_v13  ;;  %v8888_v13 = vpack.c.bf16 %v10492_v55, %v10489_v47 }
 0x2cf   :  { %8877 = vmatpush1.bf16.msra.mxu0 %v8876_v57  ;;  %2860 = vmatprep.mubr.f32.mxu0 %v11854_v7 }
 0x2d0   :  { %8879 = vmatprep.subr.bf16.mxu0 %v8878_v33  ;;  %2750 = vmatmul.mubr.f32.vlgmr.msra.gmra.mrb[10].mxu1 %v2749_v16  ;;  %v11858_v16 = vmov 1.0  }
 0x2d1   :  { %3283 = vmatprep.mubr.f32.mxu1 %v11854_v7 }
 0x2d3   :  { %8881 = vmatpush1.bf16.msra.mxu0 %v8880_v56  ;;  %v11859_v56 = vld [vmem:[#allocation7_spill] sm:$0xff] }
 0x2d4   :  { %8883 = vmatprep.subr.bf16.mxu0 %v8882_v27 }
 0x2d6   :  { %2862 = vmatmul.mubr.f32.vlgmr.msra.gmra.mrb[8].mxu0 %v10517_v63 }
 0x2d7   :  { %8885 = vmatpush1.bf16.msra.mxu0 %v8884_v59  ;;  %2948 = vmatprep.mubr.f32.mxu0 %v11854_v7 }
 0x2d8   :  { %8887 = vmatprep.subr.bf16.mxu0 %v8886_v46  ;;  %v11860_v46 = vld [vmem:[#allocation8_spill] sm:$0xff] }
 0x2db   :  { %8889 = vmatpush1.bf16.msra.mxu0 %v8888_v13 }
 0x2dc   :  { %8891 = vmatprep.subr.bf16.mxu0 %v10526_v0 }
 0x2de   :  { %2951 = vmatmul.mubr.f32.vlgmr.msra.gmra.mrb[8].mxu0 %v2746_v41 }
 0x2df   :  { %8893 = vmatpush1.bf16.msra.mxu0 %v8868_v17  ;;  %3029 = vmatprep.mubr.f32.mxu0 %v11854_v7 }
 0x2e0   :  { %8895 = vmatprep.subr.bf16.mxu0 %v8870_v45 }
 0x2e3   :  { %8897 = vmatpush1.bf16.msra.mxu0 %v8872_v48 }
 0x2e4   :  { %8899 = vmatprep.subr.bf16.mxu0 %v8898_v5 }
 0x2e6   :  { %3033 = vmatmul.mubr.f32.vlgmr.msra.gmra.mrb[8].mxu0 %v2747_v54 }
 0x2e7   :  { %8901 = vmatpush1.bf16.msra.mxu0 %v8900_v42  ;;  %3127 = vmatprep.mubr.f32.mxu0 %v11854_v7 }
 0x2e8   :  { %8903 = vmatprep.subr.bf16.mxu0 %v8902_v6 }
 0x2eb   :  { %8905 = vmatpush1.bf16.msra.mxu0 %v8904_v50 }
 0x2ec   :  { %8907 = vmatprep.subr.bf16.mxu0 %v10526_v0  ;;  %v11856_v0 = vld [vmem:[#allocation6_spill] sm:$0xff] }
 0x2ed   :  { %v2666_v31 = vrot.slane %v2624_v60, %v11856_v0 }
 0x2ee   :  { %3129 = vmatmul.mubr.f32.vlgmr.msra.gmra.mrb[8].mxu0 %v10517_v63 }
 0x2ef   :  { %8909 = vmatpush1.bf16.msra.mxu0 %v8868_v17  ;;  %3207 = vmatprep.mubr.f32.mxu0 %v11854_v7 }
 0x2f0   :  { %8911 = vmatprep.subr.bf16.mxu0 %v8870_v45 }
 0x2f3   :  { %8913 = vmatpush1.bf16.msra.mxu0 %v8872_v48 }
 0x2f6   :  { %3209 = vmatmul.mubr.f32.vlgmr.msra.gmra.mrb[8].mxu0 %v10517_v63 }
 0x359   :  { %v8041_v39 = vpop.f32.mrb[4].mxu1 }
 0x35a   :  { %v8042_v35 = vpop.f32.mrb[5].mxu1 }
 0x35b   :  { %v8043_v10 = vadd.f32 %v8042_v35, %v8041_v39 }
 0x361   :  { %v8006_v8 = vpop.f32.mrb[2].mxu0 }
 0x362   :  { %v8007_v1 = vpop.f32.mrb[3].mxu0 }
 0x363   :  { %v8008_v3 = vadd.f32 %v8007_v1, %v8006_v8  ;;  %v10639_v1 = vld [vmem:[%s11653_s10 + $0x80] sm:$0xff] }
 0x365   :  { %v1855_v19 = vadd.f32 %v8008_v3, %v7950_v12  ;;  %v10644_v3 = vld [vmem:[%s11653_s10 + $0x88] sm:$0xff] }
 0x367   :  { %v2087_v24 = vadd.f32 %v8043_v10, %v1855_v19  ;;  %v10649_v19 = vld [vmem:[%s11653_s10] sm:$0xff] }
 0x379   :  { %v8111_v26 = vpop.f32.mrb[6].mxu1 }
 0x37a   :  { %v8112_v47 = vpop.f32.mrb[7].mxu1 }
 0x37b   :  { %v8113_v55 = vadd.f32 %v8112_v47, %v8111_v26  ;;  %v4239_v26 = vand.u32 4294901760, %v10644_v3  ;;  %v10656_v47 = vld [vmem:[%s11653_s10 + $0x8] sm:$0xff] }
 0x381   :  { %v8076_v9 = vpop.f32.mrb[4].mxu0 }
 0x382   :  { %v8077_v25 = vpop.f32.mrb[5].mxu0 }
 0x383   :  { %v8078_v11 = vadd.f32 %v8077_v25, %v8076_v9  ;;  %v10662_v9 = vld [vmem:[%s11653_s10 + $0x90] sm:$0xff]  ;;  %v10667_v25 = vld [vmem:[%s11653_s10 + $0x98] sm:$0xff] }
 0x385   :  { %v2225_v30 = vadd.f32 %v8078_v11, %v2087_v24  ;;  %v4236_v24 = vand.u32 4294901760, %v10639_v1  ;;  %v4191_v11 = vand.u32 4294901760, %v10656_v47 }
 0x387   :  { %v2333_v61 = vadd.f32 %v8113_v55, %v2225_v30  ;;  %v4188_v55 = vand.u32 4294901760, %v10649_v19  ;;  %v4242_v30 = vand.u32 4294901760, %v10662_v9 }
 0x39a   :  { %v8181_v36 = vpop.f32.mrb[8].mxu1 }
 0x39b   :  { %v8182_v37 = vpop.f32.mrb[9].mxu1 }
 0x39c   :  { %v8183_v22 = vadd.f32 %v8182_v37, %v8181_v36  ;;  %v10675_v36 = vld [vmem:[%s11653_s10 + $0x10] sm:$0xff]  ;;  %v10680_v37 = vld [vmem:[%s11653_s10 + $0x18] sm:$0xff] }
 0x3a1   :  { %v8146_v18 = vpop.f32.mrb[6].mxu0 }
 0x3a2   :  { %v8147_v21 = vpop.f32.mrb[7].mxu0 }
 0x3a3   :  { %v8148_v32 = vadd.f32 %v8147_v21, %v8146_v18  ;;  %v2751_v20 = vpop.f32.mrb[10].mxu1  ;;  %v10690_v18 = vsub.f32 %v10644_v3, %v4239_v26  ;;  %v10695_v21 = vsub.f32 %v10649_v19, %v4188_v55  ;;  %v10900_v3 = vpack.c.bf16 %v4191_v11, %v4188_v55 }
 0x3a4   :  { %v2753_v51 = vpop.f32.mrb[11].mxu1  ;;  %v2752_v34 = vadd.f32 %v2751_v20, %v2662_v14  ;;  %v10701_v20 = vsub.f32 %v10656_v47, %v4191_v11 }
 0x3a5   :  { %v2501_v62 = vadd.f32 %v8148_v32, %v2333_v61  ;;  %v2754_v23 = vadd.f32 %v2753_v51, %v2666_v31  ;;  %v4245_v61 = vand.u32 4294901760, %v10667_v25  ;;  %11861 = vst [vmem:[#allocation12_spill] sm:$0xff] %v10690_v18  ;;  %v4194_v32 = vand.u32 4294901760, %v10675_v36 }
 0x3a6   :  { %v10706_v51 = vsub.f32 %v10662_v9, %v4242_v30  ;;  %v11733_v60 = vand.u32 4294901760, %v10690_v18  ;;  %v11732_v14 = vand.u32 4294901760, %v10695_v21  ;;  %v10944_v9 = vld [vmem:[%s11653_s10 + $0x58] sm:$0xff] }
 0x3a7   :  { %v10585_v53 = vadd.f32 %v8183_v22, %v2501_v62  ;;  %v10685_v22 = vsub.f32 %v10639_v1, %v4236_v24  ;;  %v10711_v62 = vsub.f32 %v10667_v25, %v4245_v61  ;;  %v10720_v31 = vsub.f32 %v10675_v36, %v4194_v32  ;;  %v10894_v1 = vld [vmem:[%s11653_s10 + $0x48] sm:$0xff] }
 0x3a8   :  { %v11862_v25 = vand.u32 4294901760, %v10680_v37 }
 0x3a9   :  { %11855 = vst [vmem:[#allocation11_spill] sm:$0xff] %v10585_v53  ;;  %v2608_v63 = vmul.f32 %v10585_v53, %v10585_v53 }
 0x3ab   :  { %v2610_v44 = vsel %vm2609_vm2, %v2608_v63, 0.0  ;;  %v11747_v63 = vand.u32 4294901760, %v10680_v37 }
 0x3ac   :  { %2611 = vadd.xlane.f32.xlu0 %v2610_v44  ;;  %v11736_v44 = vand.u32 4294901760, %v10685_v22 }
 0x3c9   :  { %v3210_v41 = vpop.f32.mrb[8].mxu0 }
 0x3ca   :  { %v9109_v4 = vadd.f32 %v3210_v41, %v2752_v34  ;;  %v3212_v17 = vpop.f32.mrb[9].mxu0  ;;  %v11731_v34 = vand.u32 4294901760, %v10701_v20  ;;  %v11729_v41 = vand.u32 4294901760, %v10711_v62 }
 0x3cb   :  { %v9111_v54 = vadd.f32 %v3212_v17, %v2754_v23  ;;  %v11730_v23 = vand.u32 4294901760, %v10706_v51  ;;  %v4415_v17 = vsub.f32 %v10685_v22, %v11736_v44 }
 0x3cc   :  { %v10595_v2 = vmax.f32 %v9109_v4, 0.0  ;;  %v10728_v4 = vsub.f32 %v10680_v37, %v11747_v63  ;;  %v10889_v63 = vld [vmem:[%s11653_s10 + $0x40] sm:$0xff] }
 0x3cd   :  { %v10597_v52 = vmax.f32 %v9111_v54, 0.0  ;;  %v4422_v54 = vsub.f32 %v10690_v18, %v11733_v60 }
 0x3ce   :  { %v3219_v58 = vand.u32 4294901760, %v10595_v2  ;;  %v3684_v59 = vmul.f32 %v10595_v2, %v10595_v2 }
 0x3cf   :  { %v3217_v45 = vand.u32 4294901760, %v10597_v52  ;;  %v3685_v27 = vmul.f32 %v10597_v52, %v10597_v52 }
 0x3d0   :  { %v3302_v40 = vsub.f32 %v10595_v2, %v3219_v58  ;;  %v3688_v5 = vand.u32 4294901760, %v3684_v59 }
 0x3d1   :  { %3218 = vmatprep.subr.mxu1 %v3217_v45  ;;  %v3296_v43 = vsub.f32 %v10597_v52, %v3217_v45  ;;  %v3686_v13 = vand.u32 4294901760, %v3685_v27 }
 0x3d2   :  { %3220 = vmatpush1.msra.mxu1 %v3219_v58  ;;  %v3303_v49 = vand.u32 4294901760, %v3302_v40  ;;  %v3771_v6 = vsub.f32 %v3684_v59, %v3688_v5 }
 0x3d3   :  { %3289 = vmatmul.mubr.f32.vlgmr.msra.gmra.mrb[12].mxu1 %v11857_v29  ;;  %v3297_v48 = vand.u32 4294901760, %v3296_v43  ;;  %v3765_v42 = vsub.f32 %v3685_v27, %v3686_v13 }
 0x3d4   :  { %v3304_v57 = vsub.f32 %v3302_v40, %v3303_v49  ;;  %3369 = vmatprep.mubr.f32.mxu1 %v11854_v7  ;;  %v3772_v39 = vand.u32 4294901760, %v3771_v6 }
 0x3d5   :  { %v3298_v15 = vsub.f32 %v3296_v43, %v3297_v48  ;;  %v3766_v50 = vand.u32 4294901760, %v3765_v42 }
 0x3d6   :  { %v3305_v33 = vand.u32 4294901760, %v3304_v57  ;;  %v3773_v10 = vsub.f32 %v3771_v6, %v3772_v39  ;;  %v4416_v57 = vand.u32 4294901760, %v4415_v17 }
 0x3d7   :  { %v3299_v28 = vand.u32 4294901760, %v3298_v15  ;;  %v3767_v35 = vsub.f32 %v3765_v42, %v3766_v50  ;;  %v4423_v15 = vand.u32 4294901760, %v4422_v54 }
 0x3d8   :  { %v3774_v12 = vand.u32 4294901760, %v3773_v10 }
 0x3d9   :  { %3300 = vmatprep.subr.mxu1 %v3299_v28  ;;  %v3768_v8 = vand.u32 4294901760, %v3767_v35 }
 0x3da   :  { %3306 = vmatpush1.msra.mxu1 %v3305_v33 }
 0x3db   :  { %7951 = vmatmul.mubr.msk.f32.vlgmr.msra.gmra.mrb[12].mxu1 %vm772_vm1, %v11858_v16  ;;  %3379 = vmatprep.subr.mxu1 %v3296_v43  ;;  %v4429_v43 = vsub.f32 %v10706_v51, %v11730_v23 }
 0x3dc   :  { %3382 = vmatpush1.msra.mxu1 %v3302_v40  ;;  %3445 = vmatprep.mubr.f32.mxu1 %v11854_v7  ;;  %v4310_v40 = vsub.f32 %v10701_v20, %v11731_v34 }
 0x3dd   :  { %3455 = vmatprep.subr.mxu1 %v3217_v45  ;;  %v4430_v59 = vand.u32 4294901760, %v4429_v43 }
 0x3de   :  { %v4311_v27 = vand.u32 4294901760, %v4310_v40  ;;  %v10776_v40 = vld [vmem:[%s11653_s10 + $0x28] sm:$0xff] }
 0x3e3   :  { %3448 = vmatmul.mubr.f32.vlgmr.msra.gmra.mrb[12].mxu1 %v11859_v56 }
 0x3e4   :  { %3457 = vmatpush1.msra.mxu1 %v3219_v58  ;;  %3520 = vmatprep.mubr.f32.mxu1 %v11854_v7 }
 0x3e5   :  { %3533 = vmatprep.subr.mxu1 %v3297_v48  ;;  %v11727_v48 = vand.u32 4294901760, %v10728_v4 }
 0x3eb   :  { %3524 = vmatmul.mubr.f32.vlgmr.msra.gmra.mrb[12].mxu1 %v11860_v46 }
 0x3ec   :  { %3537 = vmatpush1.msra.mxu1 %v3303_v49  ;;  %3600 = vmatprep.mubr.f32.mxu1 %v11854_v7  ;;  %v4436_v49 = vsub.f32 %v10711_v62, %v11729_v41 }
 0x3ed   :  { %3609 = vmatprep.subr.mxu1 %v3217_v45  ;;  %v11728_v45 = vand.u32 4294901760, %v10720_v31 }
 0x3ef   :  { %v4317_v33 = vsub.f32 %v10720_v31, %v11728_v45 }
 0x3f3   :  { %7952 = vmatmul.mubr.msk.f32.vlgmr.msra.gmra.mrb[12].mxu1 %vm772_vm1, %v11858_v16 }
 0x3f4   :  { %3611 = vmatpush1.msra.mxu1 %v3219_v58  ;;  %3674 = vmatprep.mubr.f32.mxu1 %v11854_v7  ;;  %v4303_v58 = vsub.f32 %v10695_v21, %v11732_v14 }
 0x3f5   :  { %3687 = vmatprep.subr.mxu1 %v3686_v13 }
 0x3f6   :  { %v4304_v28 = vand.u32 4294901760, %v4303_v58  ;;  %v10771_v58 = vld [vmem:[%s11653_s10 + $0x20] sm:$0xff] }
 0x3f7   :  { %v11741_v43 = vand.u32 4294901760, %v10771_v58 }
 0x3fb   :  { %7953 = vmatmul.mubr.msk.f32.vlgmr.msra.gmra.mrb[12].mxu1 %vm772_vm1, %v11858_v16 }
 0x3fc   :  { %3689 = vmatpush1.msra.mxu1 %v3688_v5  ;;  %3752 = vmatprep.mubr.f32.mxu1 %v11854_v7 }
 0x3fd   :  { %3769 = vmatprep.subr.mxu1 %v3768_v8  ;;  %v10759_v8 = vld [vmem:[%s11653_s10 + $0xa0] sm:$0xff] }
 0x3fe   :  { %v11744_v17 = vand.u32 4294901760, %v10759_v8 }
 0x3ff   :  { %3758 = vmatmul.mubr.f32.vlgmr.msra.gmra.mrb[14].mxu1 %v11857_v29 }
 0x400   :  { %3775 = vmatpush1.msra.mxu1 %v3774_v12  ;;  %3838 = vmatprep.mubr.f32.mxu1 %v11854_v7  ;;  %v10764_v12 = vld [vmem:[%s11653_s10 + $0xa8] sm:$0xff] }
 0x401   :  { %3848 = vmatprep.subr.mxu1 %v3765_v42  ;;  %v8946_v42 = vpack.c.bf16 %v4423_v15, %v4416_v57  ;;  %v11742_v54 = vand.u32 4294901760, %v10764_v12  ;;  %v10783_v57 = vsub.f32 %v10759_v8, %v11744_v17 }
 0x403   :  { %v10788_v15 = vsub.f32 %v10764_v12, %v11742_v54 }
 0x407   :  { %7954 = vmatmul.mubr.msk.f32.vlgmr.msra.gmra.mrb[14].mxu1 %vm772_vm1, %v11858_v16 }
 0x408   :  { %3851 = vmatpush1.msra.mxu1 %v3771_v6  ;;  %3914 = vmatprep.mubr.f32.mxu1 %v11854_v7  ;;  %v4318_v6 = vand.u32 4294901760, %v4317_v33 }
 0x409   :  { %3924 = vmatprep.subr.mxu1 %v3686_v13 }
 0x40f   :  { %3917 = vmatmul.mubr.f32.vlgmr.msra.gmra.mrb[14].mxu1 %v11859_v56 }
 0x410   :  { %3926 = vmatpush1.msra.mxu1 %v3688_v5  ;;  %3989 = vmatprep.mubr.f32.mxu1 %v11854_v7 }
 0x411   :  { %4002 = vmatprep.subr.mxu1 %v3766_v50  ;;  %v8948_v50 = vpack.c.bf16 %v4311_v27, %v4304_v28  ;;  %v10793_v28 = vsub.f32 %v10771_v58, %v11741_v43  ;;  %v10803_v27 = vld [vmem:[%s11653_s10 + $0xb0] sm:$0xff] }
 0x417   :  { %3993 = vmatmul.mubr.f32.vlgmr.msra.gmra.mrb[14].mxu1 %v11860_v46 }
 0x418   :  { %4006 = vmatpush1.msra.mxu1 %v3772_v39  ;;  %4069 = vmatprep.mubr.f32.mxu1 %v11854_v7 }
 0x419   :  { %4078 = vmatprep.subr.mxu1 %v3686_v13  ;;  %v4437_v13 = vand.u32 4294901760, %v4436_v49  ;;  %v11739_v49 = vand.u32 4294901760, %v10776_v40 }
 0x41b   :  { %v8950_v39 = vpack.c.bf16 %v4437_v13, %v4430_v59  ;;  %v10798_v33 = vsub.f32 %v10776_v40, %v11739_v49  ;;  %v10808_v59 = vld [vmem:[%s11653_s10 + $0xb8] sm:$0xff]  ;;  %v11734_v13 = vand.u32 4294901760, %v10783_v57 }
 0x41d   :  { %v4443_v41 = vsub.f32 %v10783_v57, %v11734_v13 }
 0x41f   :  { %7955 = vmatmul.mubr.msk.f32.vlgmr.msra.gmra.mrb[14].mxu1 %vm772_vm1, %v11858_v16 }
 0x420   :  { %4080 = vmatpush1.msra.mxu1 %v3688_v5  ;;  %4143 = vmatprep.mubr.f32.mxu1 %v11854_v7  ;;  %v4324_v5 = vsub.f32 %v10728_v4, %v11727_v48 }
 0x421   :  { %8947 = vmatprep.subr.bf16.mxu1 %v8946_v42  ;;  %v11738_v42 = vand.u32 4294901760, %v10803_v27 }
 0x422   :  { %v4325_v35 = vand.u32 4294901760, %v4324_v5  ;;  %v11735_v5 = vand.u32 4294901760, %v10788_v15 }
 0x423   :  { %v10837_v34 = vsub.f32 %v10803_v27, %v11738_v42 }
 0x424   :  { %v8952_v10 = vpack.c.bf16 %v4325_v35, %v4318_v6  ;;  %v11737_v6 = vand.u32 4294901760, %v10808_v59  ;;  %v11740_v35 = vand.u32 4294901760, %v10793_v28  ;;  %v4450_v23 = vsub.f32 %v10788_v15, %v11735_v5 }
 0x425   :  { %v11751_v49 = vand.u32 4294901760, %v10837_v34 }
 0x426   :  { %v10842_v14 = vsub.f32 %v10808_v59, %v11737_v6  ;;  %v4331_v60 = vsub.f32 %v10793_v28, %v11740_v35  ;;  %v4444_v6 = vand.u32 4294901760, %v4443_v41  ;;  %v4451_v42 = vand.u32 4294901760, %v4450_v23  ;;  %v10872_v41 = vld [vmem:[%s11653_s10 + $0xc8] sm:$0xff] }
 0x427   :  { %7956 = vmatmul.mubr.msk.f32.vlgmr.msra.gmra.mrb[14].mxu1 %vm772_vm1, %v11858_v16  ;;  %v4263_v47 = vand.u32 4294901760, %v10872_v41 }
 0x428   :  { %8949 = vmatpush3.bf16.msra.mxu1 %v8948_v50  ;;  %v10817_v50 = vld [vmem:[%s11653_s10 + $0x30] sm:$0xff]  ;;  %v11748_v35 = vand.u32 4294901760, %v10842_v14  ;;  %v4332_v43 = vand.u32 4294901760, %v4331_v60  ;;  %v10878_v60 = vpack.c.bf16 %v4239_v26, %v4236_v24  ;;  %v8954_v23 = vpack.c.bf16 %v4451_v42, %v4444_v6 }
 0x429   :  { %8951 = vmatprep.subr.bf16.mxu1 %v8950_v39  ;;  %v10822_v39 = vld [vmem:[%s11653_s10 + $0x38] sm:$0xff]  ;;  %v11745_v48 = vand.u32 4294901760, %v10817_v50 }
 0x42a   :  { %v11746_v45 = vand.u32 4294901760, %v10822_v39  ;;  %8915 = vmatprep.subr.bf16.mxu0 %v10878_v60 }
 0x42b   :  { %v10853_v5 = vsub.f32 %v10817_v50, %v11745_v48  ;;  %v10867_v48 = vld [vmem:[%s11653_s10 + $0xc0] sm:$0xff]  ;;  %8917 = vmatpush3.bf16.msra.mxu0 %v10900_v3 }
 0x42c   :  { %8953 = vmatpush3.bf16.msra.mxu1 %v8952_v10  ;;  %v11743_v10 = vand.u32 4294901760, %v10798_v33  ;;  %v10858_v44 = vsub.f32 %v10822_v39, %v11746_v45  ;;  %v4464_v45 = vsub.f32 %v10842_v14, %v11748_v35  ;;  %v4260_v19 = vand.u32 4294901760, %v10867_v48 }
 0x42d   :  { %8955 = vmatprep.subr.bf16.mxu1 %v8954_v23  ;;  %v10928_v23 = vpack.c.bf16 %v4245_v61, %v4242_v30  ;;  %v10950_v30 = vpack.c.bf16 %v11862_v25, %v4194_v32 }
 0x42e   :  { %v4338_v13 = vsub.f32 %v10798_v33, %v11743_v10  ;;  %v11750_v10 = vand.u32 4294901760, %v10853_v5  ;;  %v11749_v17 = vand.u32 4294901760, %v10858_v44  ;;  %v4465_v35 = vand.u32 4294901760, %v4464_v45  ;;  %v10922_v45 = vld [vmem:[%s11653_s10 + $0xd8] sm:$0xff] }
 0x42f   :  { %8919 = vmatprep.subr.bf16.mxu0 %v10928_v23  ;;  %v4269_v37 = vand.u32 4294901760, %v10922_v45 }
 0x430   :  { %v4339_v54 = vand.u32 4294901760, %v4338_v13  ;;  %v4457_v13 = vsub.f32 %v10837_v34, %v11751_v49  ;;  %v4345_v26 = vsub.f32 %v10853_v5, %v11750_v10  ;;  %v4352_v42 = vsub.f32 %v10858_v44, %v11749_v17  ;;  %v10917_v17 = vld [vmem:[%s11653_s10 + $0xd0] sm:$0xff]  ;;  %8921 = vmatpush3.bf16.msra.mxu0 %v10950_v30 }
 0x431   :  { %v4266_v36 = vand.u32 4294901760, %v10917_v17  ;;  %v11865_v49 = vand.u32 4294901760, %v10771_v58 }
 0x432   :  { %v8956_v24 = vpack.c.bf16 %v4339_v54, %v4332_v43  ;;  %v4458_v6 = vand.u32 4294901760, %v4457_v13  ;;  %v4346_v55 = vand.u32 4294901760, %v4345_v26  ;;  %v4353_v11 = vand.u32 4294901760, %v4352_v42  ;;  %v10939_v42 = vld [vmem:[%s11653_s10 + $0x50] sm:$0xff] }
 0x433   :  { %v4212_v54 = vand.u32 4294901760, %v10889_v63  ;;  %v4215_v43 = vand.u32 4294901760, %v10894_v1  ;;  %v10934_v26 = vsub.f32 %v10872_v41, %v4263_v47  ;;  %v10999_v58 = vsub.f32 %v10917_v17, %v4266_v36 }
 0x434   :  { %8957 = vmatpush3.bf16.msra.mxu1 %v8956_v24  ;;  %v8958_v13 = vpack.c.bf16 %v4465_v35, %v4458_v6  ;;  %v10931_v24 = vsub.f32 %v10867_v48, %v4260_v19  ;;  %v8960_v61 = vpack.c.bf16 %v4353_v11, %v4346_v55  ;;  %v11863_v11 = vand.u32 4294901760, %v10759_v8 }
 0x435   :  { %v10953_v48 = vsub.f32 %v10889_v63, %v4212_v54  ;;  %v10956_v35 = vsub.f32 %v10894_v1, %v4215_v43  ;;  %v11754_v6 = vand.u32 4294901760, %v10934_v26  ;;  %v11866_v1 = vand.u32 4294901760, %v10776_v40 }
 0x436   :  { %8959 = vmatprep.subr.bf16.mxu1 %v8958_v13  ;;  %v11752_v41 = vand.u32 4294901760, %v10931_v24  ;;  %v11864_v13 = vand.u32 4294901760, %v10764_v12 }
 0x437   :  { %v11753_v32 = vand.u32 4294901760, %v10953_v48  ;;  %v10984_v63 = vpack.c.bf16 %v11866_v1, %v11865_v49  ;;  %v11867_v12 = vand.u32 4294901760, %v10956_v35  ;;  %v11003_v1 = vsub.f32 %v10922_v45, %v4269_v37 }
 0x438   :  { %8961 = vmatpush3.bf16.msra.mxu1 %v8960_v61  ;;  %v10972_v25 = vpack.c.bf16 %v11864_v13, %v11863_v11  ;;  %v4471_v10 = vsub.f32 %v10931_v24, %v11752_v41  ;;  %v4478_v61 = vsub.f32 %v10934_v26, %v11754_v6  ;;  %v11868_v13 = vand.u32 4294901760, %v10803_v27  ;;  %v11014_v27 = vld [vmem:[%s11653_s10 + $0xe0] sm:$0xff] }
 0x439   :  { %v4359_v8 = vsub.f32 %v10953_v48, %v11753_v32  ;;  %v4366_v11 = vsub.f32 %v10956_v35, %v11867_v12  ;;  %v11869_v41 = vand.u32 4294901760, %v10808_v59  ;;  %v11871_v32 = vand.u32 4294901760, %v10817_v50  ;;  %v11026_v50 = vld [vmem:[%s11653_s10 + $0xe8] sm:$0xff] }
 0x43a   :  { %8923 = vmatprep.subr.bf16.mxu0 %v10972_v25  ;;  %v4472_v40 = vand.u32 4294901760, %v4471_v10  ;;  %v4479_v49 = vand.u32 4294901760, %v4478_v61  ;;  %v11872_v12 = vand.u32 4294901760, %v10822_v39  ;;  %v11755_v10 = vand.u32 4294901760, %v10999_v58 }
 0x43b   :  { %v10996_v55 = vpack.c.bf16 %v11869_v41, %v11868_v13  ;;  %8925 = vmatpush3.bf16.msra.mxu0 %v10984_v63  ;;  %v4360_v17 = vand.u32 4294901760, %v4359_v8  ;;  %v4367_v59 = vand.u32 4294901760, %v4366_v11  ;;  %v11874_v45 = vand.u32 4294901760, %v10939_v42  ;;  %v11040_v13 = vld [vmem:[%s11653_s10 + $0x60] sm:$0xff] }
 0x43c   :  { %v11009_v6 = vpack.c.bf16 %v11872_v12, %v11871_v32  ;;  %v8962_v39 = vpack.c.bf16 %v4479_v49, %v4472_v40  ;;  %v11758_v32 = vand.u32 4294901760, %v11003_v1  ;;  %v11875_v61 = vand.u32 4294901760, %v10944_v9 }
 0x43d   :  { %11870 = vst [vmem:[#allocation13_spill] sm:$0xff] %v10996_v55  ;;  %v11021_v41 = vsub.f32 %v10939_v42, %v11874_v45  ;;  %8927 = vmatprep.subr.bf16.mxu0 %v10996_v55  ;;  %v11035_v11 = vpack.c.bf16 %v4263_v47, %v4260_v19  ;;  %v8964_v12 = vpack.c.bf16 %v4367_v59, %v4360_v17  ;;  %v4272_v45 = vand.u32 4294901760, %v11014_v27 }
 0x43e   :  { %11873 = vst [vmem:[#allocation14_spill] sm:$0xff] %v11009_v6  ;;  %v11033_v8 = vsub.f32 %v10944_v9, %v11875_v61  ;;  %v4485_v40 = vsub.f32 %v10999_v58, %v11755_v10  ;;  %v2638_v61 = vld [vmem:[%s11653_s10 + $0x68] sm:$0xff]  ;;  %8963 = vmatprep.subr.bf16.mxu1 %v8962_v39  ;;  %v4492_v19 = vsub.f32 %v11003_v1, %v11758_v32  ;;  %v4275_v17 = vand.u32 4294901760, %v11026_v50 }
 0x43f   :  { %11876 = vst [vmem:[#allocation15_spill] sm:$0xff] %v11035_v11  ;;  %v11760_v49 = vand.u32 4294901760, %v11021_v41  ;;  %v11055_v59 = vpack.c.bf16 %v4215_v43, %v4212_v54  ;;  %8965 = vmatpush3.bf16.msra.mxu1 %v8964_v12  ;;  %8929 = vmatpush3.bf16.msra.mxu0 %v11009_v6  ;;  %v11062_v39 = vsub.f32 %v11014_v27, %v4272_v45  ;;  %v4224_v56 = vand.u32 4294901760, %v11040_v13  ;;  %v2655_v12 = vld [vmem:[%s11653_s10 + $0xf0] sm:$0xff]  ;;  %v2656_v27 = vld [vmem:[%s11653_s10 + $0xf8] sm:$0xff] }
 0x440   :  { %v11761_v47 = vand.u32 4294901760, %v11033_v8  ;;  %v4486_v10 = vand.u32 4294901760, %v4485_v40  ;;  %v4493_v32 = vand.u32 4294901760, %v4492_v19  ;;  %8931 = vmatprep.subr.bf16.mxu0 %v11035_v11  ;;  %v11070_v54 = vsub.f32 %v11026_v50, %v4275_v17 }
 0x441   :  { %11877 = vst [vmem:[#allocation10_spill] sm:$0xff] %v11055_v59  ;;  %v4373_v46 = vsub.f32 %v11021_v41, %v11760_v49  ;;  %v4227_v43 = vand.u32 4294901760, %v2638_v61  ;;  %v11769_v19 = vand.u32 4294901760, %v11062_v39  ;;  %v11080_v49 = vsub.f32 %v11040_v13, %v4224_v56 }
 0x442   :  { %v4380_v29 = vsub.f32 %v11033_v8, %v11761_v47  ;;  %v11082_v47 = vpack.c.bf16 %v4269_v37, %v4266_v36  ;;  %v8966_v16 = vpack.c.bf16 %v4493_v32, %v4486_v10  ;;  %v11772_v0 = vand.u32 4294901760, %v11070_v54  ;;  %v2639_v36 = vld [vmem:[%s11653_s10 + $0x70] sm:$0xff] }
 0x443   :  { %v4374_v40 = vand.u32 4294901760, %v4373_v46  ;;  %v11085_v7 = vsub.f32 %v2638_v61, %v4227_v43  ;;  %v4499_v53 = vsub.f32 %v11062_v39, %v11769_v19  ;;  %8933 = vmatpush3.bf16.msra.mxu0 %v11055_v59  ;;  %v4278_v11 = vand.u32 4294901760, %v2655_v12 }
 0x444   :  { %11878 = vst [vmem:[#allocation16_spill] sm:$0xff] %v11082_v47  ;;  %v4381_v50 = vand.u32 4294901760, %v4380_v29  ;;  %v4281_v6 = vand.u32 4294901760, %v2656_v27  ;;  %v2640_v29 = vld [vmem:[%s11653_s10 + $0x78] sm:$0xff]  ;;  %8967 = vmatprep.subr.bf16.mxu1 %v8966_v16  ;;  %v4506_v10 = vsub.f32 %v11070_v54, %v11772_v0  ;;  %8935 = vmatprep.subr.bf16.mxu0 %v11082_v47  ;;  %v11879_v13 = vand.u32 4294901760, %v10939_v42 }
 0x445   :  { %v11777_v32 = vand.u32 4294901760, %v11085_v7  ;;  %v11880_v61 = vand.u32 4294901760, %v10944_v9  ;;  %v4500_v46 = vand.u32 4294901760, %v4499_v53  ;;  %v11881_v59 = vand.u32 4294901760, %v11080_v49 }
 0x446   :  { %v8968_v37 = vpack.c.bf16 %v4381_v50, %v4374_v40  ;;  %v11112_v40 = vsub.f32 %v2655_v12, %v4278_v11  ;;  %v11114_v50 = vsub.f32 %v2656_v27, %v4281_v6  ;;  %v4507_v0 = vand.u32 4294901760, %v4506_v10 }
 0x447   :  { %v11107_v19 = vpack.c.bf16 %v11880_v61, %v11879_v13  ;;  %v4387_v16 = vsub.f32 %v11080_v49, %v11881_v59  ;;  %v4394_v47 = vsub.f32 %v11085_v7, %v11777_v32  ;;  %v4230_v42 = vand.u32 4294901760, %v2639_v36 }
 0x448   :  { %8969 = vmatpush3.bf16.msra.mxu1 %v8968_v37  ;;  %v4233_v55 = vand.u32 4294901760, %v2640_v29  ;;  %v11779_v13 = vand.u32 4294901760, %v11112_v40  ;;  %v11778_v53 = vand.u32 4294901760, %v11114_v50  ;;  %v11122_v59 = vpack.c.bf16 %v4275_v17, %v4272_v45 }
 0x449   :  { %v4388_v9 = vand.u32 4294901760, %v4387_v16  ;;  %8937 = vmatpush3.bf16.msra.mxu0 %v11107_v19  ;;  %v8970_v12 = vpack.c.bf16 %v4507_v0, %v4500_v46  ;;  %v4395_v27 = vand.u32 4294901760, %v4394_v47  ;;  %v11124_v61 = vsub.f32 %v2639_v36, %v4230_v42 }
 0x44a   :  { %v11126_v37 = vsub.f32 %v2640_v29, %v4233_v55  ;;  %v4513_v10 = vsub.f32 %v11112_v40, %v11779_v13  ;;  %v4520_v16 = vsub.f32 %v11114_v50, %v11778_v53  ;;  %8939 = vmatprep.subr.bf16.mxu0 %v11122_v59  ;;  %v11135_v32 = vpack.c.bf16 %v4227_v43, %v4224_v56 }
 0x44b   :  { %8971 = vmatprep.subr.bf16.mxu1 %v8970_v12  ;;  %v8972_v45 = vpack.c.bf16 %v4395_v27, %v4388_v9  ;;  %v4400_v0 = vand.u32 4294901760, %v11124_v61  ;;  %v11140_v36 = vpack.c.bf16 %v4281_v6, %v4278_v11  ;;  %v11145_v56 = vpack.c.bf16 %v4233_v55, %v4230_v42 }
 0x44c   :  { %v4407_v47 = vand.u32 4294901760, %v11126_v37  ;;  %v4514_v17 = vand.u32 4294901760, %v4513_v10  ;;  %v4521_v46 = vand.u32 4294901760, %v4520_v16  ;;  %v8978_v6 = vpack.c.bf16 %v10690_v18, %v10685_v22 }
 0x44d   :  { %8941 = vmatpush3.bf16.msra.mxu0 %v11135_v32  ;;  %8973 = vmatpush3.bf16.msra.mxu1 %v8972_v45  ;;  %v4401_v29 = vsub.f32 %v11124_v61, %v4400_v0 }
 0x44e   :  { %v4408_v53 = vsub.f32 %v11126_v37, %v4407_v47  ;;  %v8974_v13 = vpack.c.bf16 %v4521_v46, %v4514_v17  ;;  %8943 = vmatprep.subr.bf16.mxu0 %v11140_v36 }
 0x44f   :  { %v4402_v43 = vand.u32 4294901760, %v4401_v29 }
 0x450   :  { %v4409_v9 = vand.u32 4294901760, %v4408_v53  ;;  %8975 = vmatprep.subr.bf16.mxu1 %v8974_v13 }
 0x451   :  { %8945 = vmatpush3.bf16.msra.mxu0 %v11145_v56 }
 0x452   :  { %v8976_v12 = vpack.c.bf16 %v4409_v9, %v4402_v43  ;;  %8979 = vmatprep.subr.bf16.mxu0 %v8978_v6 }
 0x454   :  { %8977 = vmatpush3.bf16.msra.mxu1 %v8976_v12  ;;  %v11175_v12 = vpack.c.bf16 %v4407_v47, %v4400_v0 }
 0x455   :  { %9011 = vmatprep.subr.bf16.mxu1 %v10878_v60 }
 0x4ce   :  { %v3677_v43 = vpop.f32.mrb[12].mxu1 }
 0x4cf   :  { %v3679_v9 = vpop.f32.mrb[13].mxu1  ;;  %v3682_v6 = vmul.f32 0.125, %v3677_v43 }
 0x4d0   :  { %v3683_v10 = vmul.f32 0.125, %v3679_v9 }
 0x4d1   :  { %v4153_v16 = vmul.f32 %v3682_v6, %v3682_v6  ;;  %v4160_v29 = vrot.slane %v3682_v6, %v9681_v38  ;;  %v8982_v6 = vpack.c.bf16 %v10711_v62, %v10706_v51 }
 0x4d2   :  { %v4154_v45 = vmul.f32 %v3683_v10, %v3683_v10  ;;  %v4164_v46 = vrot.slane %v3683_v10, %v9681_v38 }
 0x4d3   :  { %v4165_v43 = vsub.f32 %v10595_v2, %v4160_v29 }
 0x4fa   :  { %v4146_v27 = vpop.f32.mrb[14].mxu1 }
 0x4fb   :  { %v4151_v53 = vmul.f32 0.125, %v4146_v27  ;;  %v4148_v13 = vpop.f32.mrb[15].mxu1  ;;  %v4166_v27 = vsub.f32 %v10597_v52, %v4164_v46  ;;  %v8980_v46 = vpack.c.bf16 %v10701_v20, %v10695_v21 }
 0x4fc   :  { %v4152_v42 = vmul.f32 0.125, %v4148_v13 }
 0x4fd   :  { %v4155_v55 = vsub.f32 %v4151_v53, %v4153_v16 }
 0x4fe   :  { %v4156_v17 = vsub.f32 %v4152_v42, %v4154_v45 }
 0x4ff   :  { %v4167_v11 = vadd.f32 1e-05, %v4155_v55 }
 0x500   :  { %v4168_v18 = vadd.f32 1e-05, %v4156_v17 }
 0x501   :  { %9247 = vrsqrt.f32 %v4167_v11 }
 0x502   :  { %9249 = vrsqrt.f32 %v4168_v18 }
 0x50b   :  { %v9248_v0 = vpop.eup %9247 }
 0x50c   :  { %v9250_v47 = vpop.eup %9249  ;;  %v4174_v9 = vrot.slane %v9248_v0, %v9681_v38  ;;  %v8984_v0 = vpack.c.bf16 %v10728_v4, %v10720_v31 }
 0x50d   :  { %v4178_v13 = vrot.slane %v9250_v47, %v9681_v38  ;;  %v11882_v47 = vld [vmem:[#allocation13_spill] sm:$0xff] }
 0x50e   :  { %v4179_v53 = vmul.f32 %v4174_v9, %v4165_v43  ;;  %v11883_v43 = vld [vmem:[#allocation14_spill] sm:$0xff]  ;;  %v11884_v9 = vpack.c.bf16 %v10788_v15, %v10783_v57 }
 0x50f   :  { %v4180_v42 = vmul.f32 %v4178_v13, %v4166_v27  ;;  %v11885_v27 = vld [vmem:[#allocation15_spill] sm:$0xff]  ;;  %v11886_v13 = vpack.c.bf16 %v10798_v33, %v10793_v28 }
 0x510   :  { %v11183_v55 = vand.u32 4294901760, %v4179_v53 }
 0x511   :  { %v4283_v11 = vand.u32 4294901760, %v4180_v42 }
 0x512   :  { %v4290_v18 = vsub.f32 %v4179_v53, %v11183_v55  ;;  %v11887_v53 = vld [vmem:[#allocation10_spill] sm:$0xff] }
 0x513   :  { %4524 = vmatprep.mubr.f32.mxu1 %v4283_v11  ;;  %v4284_v16 = vsub.f32 %v4180_v42, %v4283_v11  ;;  %v11888_v42 = vpack.c.bf16 %v10842_v14, %v10837_v34 }
 0x514   :  { %4526 = vmatmul.mubr.f32.vlgmr.msra.gmra.mrb[16].mxu1 %v11183_v55  ;;  %v4291_v10 = vand.u32 4294901760, %v4290_v18 }
 0x515   :  { %9013 = vmatpush3.bf16.msra.mxu1 %v10900_v3  ;;  %v4285_v2 = vand.u32 4294901760, %v4284_v16 }
 0x516   :  { %9015 = vmatprep.subr.bf16.mxu1 %v10928_v23  ;;  %v4292_v52 = vsub.f32 %v4290_v18, %v4291_v10 }
 0x517   :  { %4768 = vmatprep.mubr.f32.mxu1 %v4285_v2  ;;  %v4286_v45 = vsub.f32 %v4284_v16, %v4285_v2  ;;  %v11890_v2 = vpack.c.bf16 %v10858_v44, %v10853_v5 }
 0x518   :  { %v4293_v29 = vand.u32 4294901760, %v4292_v52  ;;  %v11891_v52 = vpack.c.bf16 %v10934_v26, %v10931_v24 }
 0x519   :  { %9017 = vmatpush3.bf16.msra.mxu1 %v10950_v30  ;;  %v4287_v17 = vand.u32 4294901760, %v4286_v45  ;;  %v11892_v45 = vpack.c.bf16 %v10956_v35, %v10953_v48 }
 0x51a   :  { %9019 = vmatprep.subr.bf16.mxu1 %v10972_v25 }
 0x51b   :  { %4288 = vmatprep.mubr.f32.mxu0 %v4287_v17  ;;  %v11893_v17 = vpack.c.bf16 %v11003_v1, %v10999_v58 }
 0x51c   :  { %4294 = vmatmul.mubr.f32.vlgmr.msra.gmra.mrb[10].mxu0 %v4293_v29  ;;  %v11895_v29 = vpack.c.bf16 %v11070_v54, %v11062_v39 }
 0x51d   :  { %8981 = vmatpush3.bf16.msra.mxu0 %v8980_v46  ;;  %9021 = vmatpush3.bf16.msra.mxu1 %v10984_v63  ;;  %v11894_v46 = vpack.c.bf16 %v11033_v8, %v11021_v41 }
 0x51e   :  { %4661 = vmatprep.mubr.f32.mxu0 %v4284_v16  ;;  %8983 = vmatprep.subr.bf16.mxu0 %v8982_v6  ;;  %v11889_v16 = vld [vmem:[#allocation16_spill] sm:$0xff]  ;;  %v11896_v6 = vpack.c.bf16 %v11085_v7, %v11080_v49 }
 0x51f   :  { %9023 = vmatprep.subr.bf16.mxu1 %v11882_v47 }
 0x521   :  { %8985 = vmatpush3.bf16.msra.mxu0 %v8984_v0  ;;  %9025 = vmatpush3.bf16.msra.mxu1 %v11883_v43  ;;  %v11897_v0 = vpack.c.bf16 %v11114_v50, %v11112_v40 }
 0x522   :  { %8987 = vmatprep.subr.bf16.mxu0 %v11884_v9  ;;  %9027 = vmatprep.subr.bf16.mxu1 %v11885_v27  ;;  %v11898_v9 = vand.u32 4294901760, %v10685_v22  ;;  %v11904_v22 = vand.u32 4294901760, %v10706_v51 }
 0x525   :  { %8989 = vmatpush3.bf16.msra.mxu0 %v11886_v13  ;;  %9029 = vmatpush3.bf16.msra.mxu1 %v11887_v53  ;;  %v11899_v13 = vld [vmem:[#allocation12_spill] sm:$0xff] }
 0x526   :  { %8991 = vmatprep.subr.bf16.mxu0 %v11888_v42  ;;  %9031 = vmatprep.subr.bf16.mxu1 %v11889_v16  ;;  %v11900_v42 = vand.u32 4294901760, %v11899_v13  ;;  %v6201_v13 = vld [vmem:[%s11655_s12 + $0x18] sm:$0xff] }
 0x529   :  { %8993 = vmatpush3.bf16.msra.mxu0 %v11890_v2  ;;  %9033 = vmatpush3.bf16.msra.mxu1 %v11107_v19  ;;  %v9042_v2 = vpack.c.bf16 %v11900_v42, %v11898_v9  ;;  %v6199_v9 = vld [vmem:[%s11655_s12 + $0x8] sm:$0xff] }
 0x52a   :  { %8995 = vmatprep.subr.bf16.mxu0 %v11891_v52  ;;  %9035 = vmatprep.subr.bf16.mxu1 %v11122_v59  ;;  %v11903_v52 = vand.u32 4294901760, %v10701_v20  ;;  %v11908_v20 = vand.u32 4294901760, %v10783_v57  ;;  %v11914_v57 = vand.u32 4294901760, %v10853_v5  ;;  %v6207_v42 = vpack.c.bf16 %v6201_v13, %v6199_v9  ;;  %v7958_v9 = vld [vmem:[%s11646_s3 + $0x8] sm:$0x1f] }
 0x52d   :  { %8997 = vmatpush3.bf16.msra.mxu0 %v11892_v45  ;;  %9037 = vmatpush3.bf16.msra.mxu1 %v11135_v32 }
 0x52e   :  { %8999 = vmatprep.subr.bf16.mxu0 %v11893_v17  ;;  %9039 = vmatprep.subr.bf16.mxu1 %v11140_v36  ;;  %v11905_v17 = vand.u32 4294901760, %v10711_v62  ;;  %v11910_v62 = vand.u32 4294901760, %v10793_v28 }
 0x531   :  { %9001 = vmatpush3.bf16.msra.mxu0 %v11894_v46  ;;  %9041 = vmatpush3.bf16.msra.mxu1 %v11145_v56 }
 0x532   :  { %9003 = vmatprep.subr.bf16.mxu0 %v11895_v29  ;;  %9075 = vmatprep.subr.bf16.mxu1 %v10878_v60  ;;  %v2612_v60 = vpop.xlane.xlu0 %2611 }
 0x533   :  { %9251 = vrsqrt.f32 %v2612_v60  ;;  %v6200_v60 = vld [vmem:[%s11655_s12 + $0x10] sm:$0xff] }
 0x534   :  { %4772 = vmatmul.mubr.f32.vlgmr.msra.gmra.mrb[18].mxu1 %v4291_v10  ;;  %v11901_v10 = vpack.c.bf16 %v11126_v37, %v11124_v61  ;;  %v11906_v61 = vand.u32 4294901760, %v10720_v31  ;;  %v11911_v37 = vand.u32 4294901760, %v10798_v33  ;;  %v11912_v31 = vand.u32 4294901760, %v10837_v34 }
 0x535   :  { %9005 = vmatpush3.bf16.msra.mxu0 %v11896_v6  ;;  %9077 = vmatpush3.bf16.msra.mxu1 %v10900_v3  ;;  %v11902_v3 = vand.u32 4294901760, %v10695_v21  ;;  %v11916_v33 = vand.u32 4294901760, %v10931_v24  ;;  %v11922_v24 = vand.u32 4294901760, %v11003_v1  ;;  %v11930_v6 = vand.u32 4294901760, %v11114_v50 }
 0x536   :  { %5042 = vmatprep.mubr.f32.mxu1 %v4283_v11  ;;  %9007 = vmatprep.subr.bf16.mxu0 %v11897_v0  ;;  %v11931_v0 = vmov 0.0  }
 0x537   :  { %9079 = vmatprep.subr.bf16.mxu1 %v10928_v23  ;;  %v9044_v45 = vpack.c.bf16 %v11903_v52, %v11902_v3  ;;  %v9046_v23 = vpack.c.bf16 %v11905_v17, %v11904_v22  ;;  %v6205_v3 = vld [vmem:[%s11655_s12 + $0x38] sm:$0xff]  ;;  %v6202_v22 = vld [vmem:[%s11655_s12 + $0x20] sm:$0xff]  ;;  %v6204_v17 = vld [vmem:[%s11655_s12 + $0x30] sm:$0xff] }
 0x539   :  { %9009 = vmatpush3.bf16.msra.mxu0 %v11901_v10  ;;  %9081 = vmatpush3.bf16.msra.mxu1 %v10950_v30  ;;  %v11907_v30 = vand.u32 4294901760, %v10728_v4  ;;  %v11913_v4 = vand.u32 4294901760, %v10842_v14  ;;  %v11918_v14 = vand.u32 4294901760, %v10953_v48  ;;  %v11924_v48 = vand.u32 4294901760, %v11033_v8  ;;  %v6203_v10 = vld [vmem:[%s11655_s12 + $0x28] sm:$0xff] }
 0x53a   :  { %9043 = vmatprep.subr.bf16.mxu0 %v9042_v2  ;;  %9083 = vmatprep.subr.bf16.mxu1 %v10972_v25  ;;  %v11909_v25 = vand.u32 4294901760, %v10788_v15  ;;  %v11915_v15 = vand.u32 4294901760, %v10858_v44  ;;  %v11928_v8 = vand.u32 4294901760, %v11085_v7  ;;  %v6198_v2 = vld [vmem:[%s11655_s12] sm:$0xff] }
 0x53b   :  { %v9048_v21 = vpack.c.bf16 %v11907_v30, %v11906_v61  ;;  %v6206_v52 = vpack.c.bf16 %v6200_v60, %v6198_v2  ;;  %v11932_v61 = vmov 0  }
 0x53c   :  { %4664 = vmatmul.mubr.f32.vlgmr.msra.gmra.mrb[12].mxu0 %v4290_v18  ;;  %v9050_v51 = vpack.c.bf16 %v11909_v25, %v11908_v20  ;;  %v9056_v18 = vpack.c.bf16 %v11915_v15, %v11914_v57 }
 0x53d   :  { %9045 = vmatpush3.bf16.msra.mxu0 %v9044_v45  ;;  %4938 = vmatprep.mubr.f32.mxu0 %v4283_v11  ;;  %v9052_v11 = vpack.c.bf16 %v11911_v37, %v11910_v62  ;;  %v9252_v28 = vpop.eup %9251  ;;  %v6209_v45 = vpack.c.bf16 %v6205_v3, %v6203_v10 }
 0x53e   :  { %9085 = vmatpush3.bf16.msra.mxu1 %v10984_v63  ;;  %9047 = vmatprep.subr.bf16.mxu0 %v9046_v23  ;;  %v9054_v63 = vpack.c.bf16 %v11913_v4, %v11912_v31  ;;  %v6208_v23 = vpack.c.bf16 %v6204_v17, %v6202_v22 }
 0x53f   :  { %9087 = vmatprep.subr.bf16.mxu1 %v11882_v47  ;;  %v11917_v47 = vand.u32 4294901760, %v10934_v26 }
 0x541   :  { %9049 = vmatpush3.bf16.msra.mxu0 %v9048_v21  ;;  %v9058_v34 = vpack.c.bf16 %v11917_v47, %v11916_v33 }
 0x542   :  { %9089 = vmatpush3.bf16.msra.mxu1 %v11883_v43  ;;  %9051 = vmatprep.subr.bf16.mxu0 %v9050_v51  ;;  %v11919_v43 = vand.u32 4294901760, %v10956_v35 }
 0x543   :  { %9091 = vmatprep.subr.bf16.mxu1 %v11885_v27  ;;  %v11920_v27 = vld [vmem:[#allocation11_spill] sm:$0xff] }
 0x544   :  { %v9060_v5 = vpack.c.bf16 %v11919_v43, %v11918_v14  ;;  %v11296_v44 = vmul.f32 %v9252_v28, %v11920_v27 }
 0x545   :  { %9053 = vmatpush3.bf16.msra.mxu0 %v9052_v11  ;;  %v7957_v11 = vld [vmem:[%s11654_s11] ss:$0 sm:$0xff] }
 0x546   :  { %9093 = vmatpush3.bf16.msra.mxu1 %v11887_v53  ;;  %9055 = vmatprep.subr.bf16.mxu0 %v9054_v63  ;;  %v11921_v53 = vand.u32 4294901760, %v10999_v58  ;;  %v5071_v46 = vsel %vm2609_vm2, %v11296_v44, 0  ;;  %v11926_v58 = vand.u32 4294901760, %v11070_v54  ;;  %v6197_v30 = vpack.c.bf16 %v11296_v44, %v11296_v44 }
 0x547   :  { %9095 = vmatprep.subr.bf16.mxu1 %v11889_v16  ;;  %v11923_v16 = vand.u32 4294901760, %v11021_v41  ;;  %v11927_v41 = vand.u32 4294901760, %v11080_v49  ;;  %v11334_v49 = vld [vmem:[%s11646_s3] sm:$0x1f] }
 0x548   :  { %v9062_v26 = vpack.c.bf16 %v11922_v24, %v11921_v53  ;;  %v5068_v50 = vsel %vm2609_vm2, %v11334_v49, 0  ;;  %v5062_v13 = vmul.f32 %v11334_v49, %v11334_v49 }
 0x549   :  { %9057 = vmatpush3.bf16.msra.mxu0 %v9056_v18  ;;  %v9064_v35 = vpack.c.bf16 %v11924_v48, %v11923_v16  ;;  %v9068_v29 = vpack.c.bf16 %v11928_v8, %v11927_v41  ;;  %v6269_v41 = vld [vmem:[%s11657_s14 + $0x10] sm:$0xff] }
 0x54a   :  { %9097 = vmatpush3.bf16.msra.mxu1 %v11107_v19  ;;  %9059 = vmatprep.subr.bf16.mxu0 %v9058_v34  ;;  %v11925_v19 = vand.u32 4294901760, %v11062_v39  ;;  %v5064_v2 = vsel %vm5063_vm4, %v5062_v13, 0.0 }
 0x54b   :  { %9099 = vmatprep.subr.bf16.mxu1 %v11122_v59  ;;  %v5074_v59 = vand.u32 4294901760, %v5071_v46  ;;  %5065 = vadd.xlane.f32.xlu1 %v5064_v2 }
 0x54c   :  { %v9066_v1 = vpack.c.bf16 %v11926_v58, %v11925_v19  ;;  %v6268_v19 = vld [vmem:[%s11657_s14 + $0x8] sm:$0xff]  ;;  %v6270_v58 = vld [vmem:[%s11657_s14 + $0x18] sm:$0xff] }
 0x54d   :  { %9061 = vmatpush3.bf16.msra.mxu0 %v9060_v5  ;;  %v5151_v54 = vsub.f32 %v5071_v46, %v5074_v59 }
 0x54e   :  { %9101 = vmatpush3.bf16.msra.mxu1 %v11135_v32  ;;  %9063 = vmatprep.subr.bf16.mxu0 %v9062_v26  ;;  %v11929_v32 = vand.u32 4294901760, %v11112_v40 }
 0x54f   :  { %9103 = vmatprep.subr.bf16.mxu1 %v11140_v36  ;;  %v5152_v7 = vand.u32 4294901760, %v5151_v54 }
 0x550   :  { %v9070_v39 = vpack.c.bf16 %v11930_v6, %v11929_v32  ;;  %v6274_v32 = vld [vmem:[%s11657_s14 + $0x38] sm:$0xff] }
 0x551   :  { %9065 = vmatpush3.bf16.msra.mxu0 %v9064_v35  ;;  %v5153_v40 = vsub.f32 %v5151_v54, %v5152_v7 }
 0x552   :  { %9105 = vmatpush3.bf16.msra.mxu1 %v11145_v56  ;;  %9067 = vmatprep.subr.bf16.mxu0 %v9066_v1  ;;  %v5139_v56 = vand.u32 4294901760, %v5068_v50  ;;  %v6276_v1 = vpack.c.bf16 %v6270_v58, %v6268_v19 }
 0x553   :  { %8446 = vmatprep.subr.mxu1 %v11931_v0  ;;  %v5154_v36 = vand.u32 4294901760, %v5153_v40 }
 0x555   :  { %5044 = vmatmul.mubr.f32.vlgmr.msra.gmra.mrb[20].mxu1 %v11183_v55  ;;  %9069 = vmatpush3.bf16.msra.mxu0 %v9068_v29  ;;  %v6272_v29 = vld [vmem:[%s11657_s14 + $0x28] sm:$0xff] }
 0x556   :  { %9071 = vmatprep.subr.bf16.mxu0 %v9070_v39  ;;  %8448 = vmatprep.mubr.msk.f32.mxu1 %vm9328_vm3, %v11931_v0  ;;  %v6278_v6 = vpack.c.bf16 %v6274_v32, %v6272_v29  ;;  %v6271_v39 = vld [vmem:[%s11657_s14 + $0x20] sm:$0xff] }
 0x559   :  { %9073 = vmatpush3.bf16.msra.mxu0 %v11175_v12  ;;  %v5140_v12 = vsub.f32 %v5068_v50, %v5139_v56 }
 0x55a   :  { %8451 = vmatprep.subr.mxu0 %v11931_v0 }
 0x55b   :  { %8447 = vmatpush3.xpose.msra.mxu1 %v5074_v59 }
 0x55c   :  { %4940 = vmatmul.mubr.f32.vlgmr.msra.gmra.mrb[14].mxu0 %v11183_v55  ;;  %8476 = vmatprep.subr.mxu1 %v11931_v0  ;;  %v5141_v55 = vand.u32 4294901760, %v5140_v12 }
 0x55d   :  { %8453 = vmatprep.mubr.msk.f32.mxu0 %vm9328_vm3, %v11931_v0 }
 0x55e   :  { %v5142_v21 = vsub.f32 %v5140_v12, %v5141_v55 }
 0x560   :  { %v5143_v20 = vand.u32 4294901760, %v5142_v21 }
 0x562   :  { %8452 = vmatpush3.xpose.msra.mxu0 %v5154_v36  ;;  %8449 = vmatmul.mubr.f32.vlgmr.msra.gmra.mrb[22].mxu1 %v5143_v20 }
 0x563   :  { %8456 = vmatprep.subr.mxu0 %v11931_v0  ;;  %8478 = vmatprep.mubr.msk.f32.mxu1 %vm9328_vm3, %v11931_v0 }
 0x565   :  { %8454 = vmatmul.mubr.f32.vlgmr.msra.gmra.mrb[16].mxu0 %v5139_v56 }
 0x566   :  { %8457 = vmatpush3.xpose.msra.mxu0 %v5151_v54  ;;  %8458 = vmatprep.mubr.msk.f32.mxu0 %vm9328_vm3, %v11931_v0  ;;  %v6273_v54 = vld [vmem:[%s11657_s14 + $0x30] sm:$0xff] }
 0x567   :  { %8461 = vmatprep.subr.mxu0 %v11931_v0 }
 0x56d   :  { %8459 = vmatmul.mubr.f32.vlgmr.msra.gmra.mrb[16].mxu0 %v5140_v12 }
 0x56e   :  { %8462 = vmatpush3.xpose.msra.mxu0 %v5074_v59  ;;  %8463 = vmatprep.mubr.msk.f32.mxu0 %vm9328_vm3, %v11931_v0 }
 0x56f   :  { %8466 = vmatprep.subr.mxu0 %v11931_v0 }
 0x575   :  { %8464 = vmatmul.mubr.f32.vlgmr.msra.gmra.mrb[16].mxu0 %v5141_v55 }
 0x576   :  { %8467 = vmatpush3.xpose.msra.mxu0 %v5152_v7  ;;  %8468 = vmatprep.mubr.msk.f32.mxu0 %vm9328_vm3, %v11931_v0  ;;  %v6277_v7 = vpack.c.bf16 %v6273_v54, %v6271_v39 }
 0x577   :  { %8471 = vmatprep.subr.mxu0 %v11931_v0 }
 0x57d   :  { %8469 = vmatmul.mubr.f32.vlgmr.msra.gmra.mrb[16].mxu0 %v5139_v56 }
 0x57e   :  { %8472 = vmatpush3.xpose.msra.mxu0 %v5074_v59  ;;  %8473 = vmatprep.mubr.msk.f32.mxu0 %vm9328_vm3, %v11931_v0  ;;  %v6267_v59 = vld [vmem:[%s11657_s14] sm:$0xff] }
 0x57f   :  { %6225 = vmatprep.subr.bf16.mxu0 %v6207_v42  ;;  %v6275_v8 = vpack.c.bf16 %v6269_v41, %v6267_v59  ;;  %v5580_v42 = vmul.f32 %v7958_v9, %v7958_v9 }
 0x581   :  { %v5581_v60 = vsel %vm5063_vm4, %v5580_v42, 0.0 }
 0x582   :  { %5582 = vadd.xlane.f32.xlu1 %v5581_v60 }
 0x585   :  { %8474 = vmatmul.mubr.f32.vlgmr.msra.gmra.mrb[16].mxu0 %v5139_v56 }
 0x586   :  { %6226 = vmatpush1.bf16.msra.mxu0 %v6206_v52  ;;  %6257 = vmatprep.mubr.bf16.mxu0 %v11932_v61 }
 0x587   :  { %6227 = vmatprep.subr.bf16.mxu0 %v6209_v45  ;;  %v5585_v45 = vsel %vm2609_vm2, %v7958_v9, 0 }
 0x588   :  { %v5656_v17 = vand.u32 4294901760, %v5585_v45 }
 0x58a   :  { %6228 = vmatpush1.bf16.msra.mxu0 %v6208_v23  ;;  %v5657_v23 = vsub.f32 %v5585_v45, %v5656_v17  ;;  %v11933_v45 = vld [vmem:[#allocation6_spill] sm:$0xff] }
 0x58b   :  { %6294 = vmatprep.subr.bf16.mxu0 %v6276_v1 }
 0x58d   :  { %7961 = vmatmul.mubr.msk.bf16.vlgmr.msra.gmra.mrb[20].mxu0 %vm2609_vm2, %v6197_v30 }
 0x58e   :  { %6326 = vmatprep.mubr.bf16.mxu0 %v11932_v61  ;;  %6295 = vmatpush1.bf16.msra.mxu0 %v6275_v8  ;;  %v5658_v61 = vand.u32 4294901760, %v5657_v23 }
 0x58f   :  { %6296 = vmatprep.subr.bf16.mxu0 %v6278_v6 }
 0x590   :  { %v5659_v20 = vsub.f32 %v5657_v23, %v5658_v61 }
 0x592   :  { %6297 = vmatpush1.bf16.msra.mxu0 %v6277_v7 }
 0x593   :  { %8506 = vmatprep.subr.bf16.mxu0 %v11931_v0 }
 0x5e7   :  { %v8251_v25 = vpop.f32.mrb[16].mxu1 }
 0x5e8   :  { %v8252_v51 = vpop.f32.mrb[17].mxu1 }
 0x5e9   :  { %v8253_v62 = vadd.f32 %v8252_v51, %v8251_v25 }
 0x5ef   :  { %v8216_v37 = vpop.f32.mrb[10].mxu0 }
 0x5f0   :  { %v8217_v31 = vpop.f32.mrb[11].mxu0 }
 0x5f1   :  { %v8218_v4 = vadd.f32 %v8217_v31, %v8216_v37 }
 0x5f3   :  { %v4296_v63 = vadd.f32 %v8218_v4, %v7957_v11 }
 0x5f5   :  { %v4528_v57 = vadd.f32 %v8253_v62, %v4296_v63  ;;  %v5660_v62 = vand.u32 4294901760, %v5659_v20 }
 0x607   :  { %v8321_v15 = vpop.f32.mrb[18].mxu1 }
 0x608   :  { %v8322_v18 = vpop.f32.mrb[19].mxu1 }
 0x609   :  { %v8323_v28 = vadd.f32 %v8322_v18, %v8321_v15 }
 0x60f   :  { %v8286_v33 = vpop.f32.mrb[12].mxu0 }
 0x610   :  { %v8287_v47 = vpop.f32.mrb[13].mxu0 }
 0x611   :  { %v8288_v34 = vadd.f32 %v8287_v47, %v8286_v33 }
 0x613   :  { %v4666_v14 = vadd.f32 %v8288_v34, %v4528_v57  ;;  %v5066_v57 = vpop.xlane.xlu1 %5065 }
 0x614   :  { %v5519_v15 = vadd.f32 1.0, %v5066_v57 }
 0x615   :  { %v4774_v43 = vadd.f32 %v8323_v28, %v4666_v14 }
 0x617   :  { %v5583_v41 = vpop.xlane.xlu1 %5582 }
 0x618   :  { %v6036_v8 = vadd.f32 1.0, %v5583_v41 }
 0x628   :  { %v8391_v5 = vpop.f32.mrb[20].mxu1 }
 0x629   :  { %v8392_v27 = vpop.f32.mrb[21].mxu1 }
 0x62a   :  { %v8393_v44 = vadd.f32 %v8392_v27, %v8391_v5 }
 0x62f   :  { %v8356_v53 = vpop.f32.mrb[14].mxu0 }
 0x630   :  { %v8357_v24 = vpop.f32.mrb[15].mxu0 }
 0x631   :  { %v8358_v26 = vadd.f32 %v8357_v24, %v8356_v53 }
 0x633   :  { %v4942_v16 = vadd.f32 %v8358_v26, %v4774_v43 }
 0x635   :  { %v5046_v48 = vadd.f32 %v8393_v44, %v4942_v16  ;;  %v5145_v10 = vpop.f32.mrb[22].mxu1 }
 0x636   :  { %v8450_v52 = vpop.f32.mrb[23].mxu1 }
 0x637   :  { %v5049_v35 = vmul.f32 %v5046_v48, %v5046_v48 }
 0x639   :  { %v5050_v46 = vsel %vm2609_vm2, %v5049_v35, 0.0  ;;  %v11455_v35 = vld [vmem:[%s11645_s2] sm:$0x1] }
 0x63a   :  { %5051 = vadd.xlane.f32.xlu0 %v5050_v46  ;;  %v5057_v46 = vsel %vm5056_vm6, %v11455_v35, 0.0 }
 0x658   :  { %v5515_v40 = vpop.f32.mrb[16].mxu0 }
 0x659   :  { %v8475_v50 = vpop.f32.mrb[17].mxu0  ;;  %v9112_v3 = vadd.f32 %v5515_v40, %v5145_v10  ;;  %v6210_v10 = vld [vmem:[%s11656_s13] sm:$0x3] }
 0x65a   :  { %v6215_v52 = vrot.slane %v6210_v10, %v9681_v38 }
 0x65b   :  { %v5520_v63 = vmul.f32 2.0, %v9112_v3  ;;  %v6279_v3 = vld [vmem:[%s11658_s15] sm:$0x3] }
 0x65d   :  { %v5521_v18 = vsub.f32 %v5519_v15, %v5520_v63 }
 0x65f   :  { %v11444_v28 = vsub.f32 0.0, %v5521_v18 }
 0x660   :  { %v11414_v36 = vpop.f32.mrb[20].mxu0 }
 0x661   :  { %v11416_v56 = vpop.f32.mrb[21].mxu0  ;;  %v5523_v33 = vmul.f32 1.442695, %v11444_v28 }
 0x662   :  { %v6263_v12 = vpop.f32.mrb[22].mxu0 }
 0x663   :  { %v6264_v55 = vpop.f32.mrb[23].mxu0 }
 0x6c7   :  { %v5052_v22 = vpop.xlane.xlu0 %5051 }
 0x6c8   :  { %9253 = vrsqrt.f32 %v5052_v22  ;;  %v6219_v22 = vrot.slane %v6210_v10, %v11933_v45 }
 0x6c9   :  { %9255 = vpow2.f32 %v5523_v33 }
 0x6ca   :  { %v6262_v20 = vadd.f32 %v11416_v56, %v6219_v22 }
 0x6d2   :  { %v9254_v30 = vpop.eup %9253 }
 0x6d3   :  { %v5054_v21 = vmul.f32 %v9254_v30, %v5046_v48  ;;  %v11447_v47 = vpop.eup %9255 }
 0x6d4   :  { %v5525_v34 = vadd.f32 1e-05, %v11447_v47 }
 0x6d5   :  { %v6266_v49 = vpack.c.bf16 %v5054_v21, %v5054_v21  ;;  %v5588_v25 = vsel %vm2609_vm2, %v5054_v21, 0  ;;  %v6260_v21 = vadd.f32 %v11414_v36, %v6215_v52 }
 0x6d6   :  { %v5591_v51 = vand.u32 4294901760, %v5588_v25  ;;  %v5527_v14 = vsel %vm5526_vm5, %v5525_v34, 0.0 }
 0x6d7   :  { %7962 = vmatmul.mubr.msk.bf16.vlgmr.msra.gmra.mrb[24].mxu0 %vm2609_vm2, %v6266_v49  ;;  %v5528_v43 = vrot.slane %v5527_v14, 4 }
 0x6d8   :  { %8477 = vmatpush3.xpose.msra.mxu1 %v5591_v51  ;;  %v5668_v37 = vsub.f32 %v5588_v25, %v5591_v51  ;;  %8508 = vmatprep.mubr.msk.bf16.mxu0 %vm9328_vm3, %v11931_v0 }
 0x6d9   :  { %8481 = vmatprep.subr.mxu1 %v11931_v0  ;;  %v5529_v5 = vadd.f32 %v5528_v43, %v5527_v14 }
 0x6da   :  { %v5669_v11 = vand.u32 4294901760, %v5668_v37 }
 0x6db   :  { %8479 = vmatmul.mubr.f32.vlgmr.msra.gmra.mrb[24].mxu1 %v5660_v62  ;;  %v5530_v27 = vrot.slane %v5529_v5, 2 }
 0x6dc   :  { %v5670_v31 = vsub.f32 %v5668_v37, %v5669_v11  ;;  %8483 = vmatprep.mubr.msk.f32.mxu1 %vm9328_vm3, %v11931_v0 }
 0x6dd   :  { %v5531_v44 = vadd.f32 %v5530_v27, %v5529_v5 }
 0x6de   :  { %v5671_v4 = vand.u32 4294901760, %v5670_v31  ;;  %v6335_v31 = vmul.f32 %v6260_v21, %v6260_v21 }
 0x6df   :  { %v5532_v53 = vrot.slane %v5531_v44, 1 }
 0x6e0   :  { %8482 = vmatpush3.xpose.msra.mxu1 %v5671_v4  ;;  %v6336_v4 = vmul.f32 %v6262_v20, %v6262_v20 }
 0x6e1   :  { %8486 = vmatprep.subr.mxu1 %v11931_v0  ;;  %v5533_v24 = vadd.f32 %v5532_v53, %v5531_v44 }
 0x6e2   :  { %v6337_v56 = vadd.f32 %v6336_v4, %v6335_v31 }
 0x6e3   :  { %8484 = vmatmul.mubr.f32.vlgmr.msra.gmra.mrb[24].mxu1 %v5656_v17  ;;  %9257 = vrcp.f32 %v5533_v24 }
 0x6e4   :  { %8487 = vmatpush3.xpose.msra.mxu1 %v5668_v37  ;;  %8488 = vmatprep.mubr.msk.f32.mxu1 %vm9328_vm3, %v11931_v0 }
 0x6e5   :  { %8491 = vmatprep.subr.mxu1 %v11931_v0 }
 0x6eb   :  { %8489 = vmatmul.mubr.f32.vlgmr.msra.gmra.mrb[24].mxu1 %v5657_v23  ;;  %v6288_v23 = vrot.slane %v6279_v3, %v11933_v45 }
 0x6ec   :  { %8492 = vmatpush3.xpose.msra.mxu1 %v5591_v51  ;;  %8493 = vmatprep.mubr.msk.f32.mxu1 %vm9328_vm3, %v11931_v0 }
 0x6ed   :  { %8496 = vmatprep.subr.mxu1 %v11931_v0  ;;  %v9258_v26 = vpop.eup %9257 }
 0x6ee   :  { %v5535_v16 = vmul.f32 %v9258_v26, %v5525_v34 }
 0x6f0   :  { %v5536_v48 = vsel %vm5526_vm5, %v5535_v16, 0.0 }
 0x6f1   :  { %5537 = vadd.xlane.f32.xlu0 %v5536_v48 }
 0x6f3   :  { %8494 = vmatmul.mubr.f32.vlgmr.msra.gmra.mrb[24].mxu1 %v5658_v61  ;;  %v11478_v61 = vrot.slane %v11455_v35, %v9681_v38 }
 0x6f4   :  { %8497 = vmatpush3.xpose.msra.mxu1 %v5669_v11  ;;  %8498 = vmatprep.mubr.msk.f32.mxu1 %vm9328_vm3, %v11931_v0 }
 0x6f5   :  { %8501 = vmatprep.subr.mxu1 %v11931_v0  ;;  %5058 = vadd.xlane.f32.xlu0 %v5057_v46  ;;  %v5546_v11 = vmul.f32 %v11478_v61, %v5535_v16 }
 0x6f7   :  { %v5547_v36 = vsel %vm5526_vm5, %v5546_v11, 0.0 }
 0x6fb   :  { %8499 = vmatmul.mubr.f32.vlgmr.msra.gmra.mrb[24].mxu1 %v5656_v17 }
 0x6fc   :  { %8502 = vmatpush3.xpose.msra.mxu1 %v5591_v51  ;;  %8503 = vmatprep.mubr.msk.f32.mxu1 %vm9328_vm3, %v11931_v0 }
 0x703   :  { %8504 = vmatmul.mubr.f32.vlgmr.msra.gmra.mrb[24].mxu1 %v5656_v17  ;;  %v6284_v17 = vrot.slane %v6279_v3, %v9681_v38 }
 0x704   :  { %6419 = vmatprep.mubr.f32.mxu1 %v11931_v0 }
 0x77e   :  { %v5538_v33 = vpop.xlane.xlu0 %5537 }
 0x77f   :  { %v5539_v34 = vadd.f32 1.0, %v5538_v33 }
 0x782   :  { %v5059_v14 = vpop.xlane.xlu0 %5058 }
 0x783   :  { %v5060_v43 = vmul.f32 0.125, %v5059_v14 }
 0x785   :  { %v5557_v27 = vsub.f32 %v5060_v43, %v11455_v35  ;;  %v11489_v24 = vrot.slane %v5060_v43, %v9681_v38 }
 0x787   :  { %v5561_v48 = vrot.slane %v5557_v27, %v9681_v38 }
 0x7aa   :  { %v6328_v19 = vpop.f32.mrb[24].mxu0 }
 0x7ab   :  { %v6330_v58 = vpop.f32.mrb[25].mxu0  ;;  %v6329_v25 = vadd.f32 %v6328_v19, %v6284_v17 }
 0x7ac   :  { %v6332_v1 = vpop.f32.mrb[26].mxu0  ;;  %v6331_v51 = vadd.f32 %v6330_v58, %v6288_v23 }
 0x7ad   :  { %v6333_v59 = vpop.f32.mrb[27].mxu0  ;;  %v6343_v57 = vmul.f32 %v6329_v25, %v6329_v25 }
 0x7ae   :  { %v6344_v15 = vmul.f32 %v6331_v51, %v6331_v51 }
 0x7b0   :  { %v6345_v18 = vadd.f32 %v6344_v15, %v6343_v57 }
 0x7d6   :  { %v6032_v29 = vpop.f32.mrb[24].mxu1 }
 0x7d7   :  { %v6037_v32 = vmul.f32 2.0, %v6032_v29  ;;  %v8505_v6 = vpop.f32.mrb[25].mxu1 }
 0x7d9   :  { %v6038_v39 = vsub.f32 %v6036_v8, %v6037_v32 }
 0x7db   :  { %v11459_v54 = vsub.f32 0.0, %v6038_v39 }
 0x7dd   :  { %v6040_v7 = vmul.f32 1.442695, %v11459_v54 }
 0x7df   :  { %9259 = vpow2.f32 %v6040_v7 }
 0x7e9   :  { %v11462_v40 = vpop.eup %9259 }
 0x7ea   :  { %v6042_v50 = vadd.f32 1e-05, %v11462_v40 }
 0x7ec   :  { %v6043_v12 = vsel %vm5526_vm5, %v6042_v50, 0.0 }
 0x7ed   :  { %v6044_v55 = vrot.slane %v6043_v12, 4 }
 0x7ef   :  { %v6045_v9 = vadd.f32 %v6044_v55, %v6043_v12 }
 0x7f1   :  { %v6046_v13 = vrot.slane %v6045_v9, 2 }
 0x7f3   :  { %v6047_v42 = vadd.f32 %v6046_v13, %v6045_v9 }
 0x7f5   :  { %v6048_v2 = vrot.slane %v6047_v42, 1 }
 0x7f7   :  { %v6049_v60 = vadd.f32 %v6048_v2, %v6047_v42 }
 0x7f9   :  { %9261 = vrcp.f32 %v6049_v60 }
 0x7fa   :  { %9263 = vrcp.f32 %v5539_v34 }
 0x803   :  { %v9262_v30 = vpop.eup %9261 }
 0x804   :  { %v6051_v49 = vmul.f32 %v9262_v30, %v6042_v50  ;;  %v9264_v26 = vpop.eup %9263 }
 0x806   :  { %v6052_v62 = vsel %vm5526_vm5, %v6051_v49, 0.0  ;;  %v6056_v37 = vmul.f32 %v6051_v49, %v11478_v61 }
 0x807   :  { %6053 = vadd.xlane.f32.xlu1 %v6052_v62 }
 0x808   :  { %v6057_v63 = vsel %vm5526_vm5, %v6056_v37, 0.0 }
 0x809   :  { %6058 = vadd.xlane.f32.xlu0 %v6057_v63 }
 0x80b   :  { %5548 = vadd.xlane.f32.xlu1 %v5547_v36 }
 0x80d   :  { %6338 = vadd.xlane.f32.xlu0 %v6337_v56 }
 0x80f   :  { %6346 = vadd.xlane.f32.xlu1 %v6345_v18 }
 0x894   :  { %v6054_v5 = vpop.xlane.xlu1 %6053 }
 0x895   :  { %v6055_v44 = vadd.f32 1.0, %v6054_v5 }
 0x896   :  { %v6059_v53 = vpop.xlane.xlu0 %6058 }
 0x897   :  { %9265 = vrcp.f32 %v6055_v44 }
 0x898   :  { %v5549_v16 = vpop.xlane.xlu1 %5548 }
 0x899   :  { %v5551_v46 = vmul.f32 %v9264_v26, %v5549_v16 }
 0x89a   :  { %v6339_v19 = vpop.xlane.xlu0 %6338 }
 0x89b   :  { %v5556_v58 = vsub.f32 %v11489_v24, %v5551_v46  ;;  %9267 = vrsqrt.f32 %v6339_v19 }
 0x89c   :  { %v6347_v1 = vpop.xlane.xlu1 %6346 }
 0x89d   :  { %v5562_v59 = vmul.f32 %v5561_v48, %v5556_v58  ;;  %9269 = vrsqrt.f32 %v6347_v1 }
 0x89f   :  { %v5563_v41 = vmul.f32 0.1, %v5562_v59 }
 0x8a1   :  { %v9266_v35 = vpop.eup %9265  ;;  %v5564_v8 = vadd.f32 %v5563_v41, %v11444_v28 }
 0x8a2   :  { %v6061_v29 = vmul.f32 %v9266_v35, %v6059_v53 }
 0x8a3   :  { %v5565_v32 = vmul.f32 1.442695, %v5564_v8 }
 0x8a4   :  { %v6062_v6 = vsub.f32 %v11489_v24, %v6061_v29 }
 0x8a5   :  { %v9268_v39 = vpop.eup %9267  ;;  %9271 = vpow2.f32 %v5565_v32 }
 0x8a6   :  { %v6063_v7 = vmul.f32 %v6062_v6, %v5561_v48  ;;  %v11495_v50 = vmul.f32 %v9268_v39, %v6262_v20  ;;  %v11499_v9 = vmul.f32 %v9268_v39, %v6260_v21 }
 0x8a7   :  { %v9270_v38 = vpop.eup %9269 }
 0x8a8   :  { %v6064_v12 = vmul.f32 0.1, %v6063_v7  ;;  %v11497_v55 = vmul.f32 %v9270_v38, %v6331_v51  ;;  %v11501_v13 = vmul.f32 %v9270_v38, %v6329_v25  ;;  %v11934_v25 = vmov 1.0  }
 0x8aa   :  { %v6065_v42 = vadd.f32 %v6064_v12, %v11459_v54  ;;  %v6352_v28 = vmul.f32 %v11497_v55, %v11495_v50  ;;  %v6351_v2 = vmul.f32 %v11501_v13, %v11499_v9 }
 0x8ac   :  { %v6066_v60 = vmul.f32 1.442695, %v6065_v42  ;;  %v6353_v10 = vand.u32 4294901760, %v6352_v28  ;;  %v6355_v3 = vand.u32 4294901760, %v6351_v2 }
 0x8ae   :  { %9273 = vpow2.f32 %v6066_v60  ;;  %6354 = vmatprep.subr.mxu1 %v6353_v10  ;;  %v6432_v52 = vsub.f32 %v6351_v2, %v6355_v3  ;;  %v6426_v45 = vsub.f32 %v6352_v28, %v6353_v10 }
 0x8af   :  { %v9272_v22 = vpop.eup %9271  ;;  %6356 = vmatpush1.xpose.msra.mxu1 %v6355_v3 }
 0x8b0   :  { %v5567_v17 = vadd.f32 1e-05, %v9272_v22  ;;  %v6427_v23 = vand.u32 4294901760, %v6426_v45  ;;  %v6433_v30 = vand.u32 4294901760, %v6432_v52  ;;  %v11935_v22 = vld [vmem:[#allocation5_spill] sm:$0xff] }
 0x8b2   :  { %v5568_v54 = vsel %vm5526_vm5, %v5567_v17, 0.0  ;;  %6420 = vmatmul.mubr.f32.vlgmr.msra.gmra.mrb[26].mxu1 %v11931_v0  ;;  %v6428_v21 = vsub.f32 %v6426_v45, %v6427_v23  ;;  %v6434_v20 = vsub.f32 %v6432_v52, %v6433_v30 }
 0x8b3   :  { %v5569_v49 = vrot.slane %v5568_v54, 4  ;;  %6499 = vmatprep.mubr.f32.mxu1 %v11934_v25 }
 0x8b4   :  { %v6429_v51 = vand.u32 4294901760, %v6428_v21  ;;  %v6435_v62 = vand.u32 4294901760, %v6434_v20 }
 0x8b5   :  { %v5570_v37 = vadd.f32 %v5569_v49, %v5568_v54 }
 0x8b6   :  { %6430 = vmatprep.subr.mxu1 %v6429_v51  ;;  %v9329_v51 = vmov 65535  }
 0x8b7   :  { %v5571_v11 = vrot.slane %v5570_v37, 2  ;;  %6436 = vmatpush1.xpose.msra.mxu1 %v6435_v62  ;;  %v6842_v62 = vsel %vm6840_vm9, 4294967295, %v9329_v51 }
 0x8b8   :  { %v9274_v31 = vpop.eup %9273  ;;  %6507 = vmatprep.subr.mxu1 %v6426_v45 }
 0x8b9   :  { %v6068_v4 = vadd.f32 1e-05, %v9274_v31  ;;  %v5572_v63 = vadd.f32 %v5571_v11, %v5570_v37 }
 0x8ba   :  { %6500 = vmatmul.mubr.f32.vlgmr.msra.gmra.mrb[26].mxu1 %v11934_v25 }
 0x8bb   :  { %v6069_v57 = vsel %vm5526_vm5, %v6068_v4, 0.0  ;;  %v5573_v15 = vrot.slane %v5572_v63, 1  ;;  %6510 = vmatpush1.xpose.msra.mxu1 %v6432_v52  ;;  %6573 = vmatprep.mubr.f32.mxu1 %v11931_v0 }
 0x8bc   :  { %v6070_v36 = vrot.slane %v6069_v57, 4  ;;  %6580 = vmatprep.subr.mxu1 %v6353_v10 }
 0x8bd   :  { %v5574_v56 = vadd.f32 %v5573_v15, %v5572_v63  ;;  %v6843_v15 = vsel %vm6841_vm10, %v6842_v62, 0 }
 0x8be   :  { %v6071_v18 = vadd.f32 %v6070_v36, %v6069_v57 }
 0x8bf   :  { %9275 = vrcp.f32 %v5574_v56 }
 0x8c0   :  { %v6072_v33 = vrot.slane %v6071_v18, 2 }
 0x8c2   :  { %v6073_v34 = vadd.f32 %v6072_v33, %v6071_v18  ;;  %6574 = vmatmul.mubr.f32.vlgmr.msra.gmra.mrb[26].mxu1 %v11931_v0 }
 0x8c3   :  { %6582 = vmatpush1.xpose.msra.mxu1 %v6355_v3  ;;  %6645 = vmatprep.mubr.f32.mxu1 %v11931_v0 }
 0x8c4   :  { %v6074_v14 = vrot.slane %v6073_v34, 1  ;;  %6654 = vmatprep.subr.mxu1 %v6427_v23 }
 0x8c6   :  { %v6075_v43 = vadd.f32 %v6074_v14, %v6073_v34 }
 0x8c8   :  { %9277 = vrcp.f32 %v6075_v43 }
 0x8c9   :  { %v9276_v5 = vpop.eup %9275 }
 0x8ca   :  { %v5576_v27 = vmul.f32 %v9276_v5, %v5567_v17  ;;  %6646 = vmatmul.mubr.f32.vlgmr.msra.gmra.mrb[26].mxu1 %v11931_v0 }
 0x8cb   :  { %6658 = vmatpush1.xpose.msra.mxu1 %v6433_v30  ;;  %6721 = vmatprep.mubr.f32.mxu1 %v11934_v25 }
 0x8cc   :  { %5577 = vst.msk [vmem:[%s11659_s16] sm:$0x1f] %vm5526_vm5, %v5576_v27  ;;  %6728 = vmatprep.subr.mxu1 %v6353_v10  ;;  %9279 = vlog2.f32 %v5576_v27  ;;  %v6801_v26 = vmul.f32 %v5576_v27, %v5576_v27 }
 0x8d2   :  { %v9278_v44 = vpop.eup %9277  ;;  %6722 = vmatmul.mubr.f32.vlgmr.msra.gmra.mrb[26].mxu1 %v11934_v25 }
 0x8d3   :  { %v6077_v53 = vmul.f32 %v9278_v44, %v6068_v4  ;;  %6730 = vmatpush1.xpose.msra.mxu1 %v6355_v3  ;;  %6793 = vmatprep.mubr.f32.mxu1 %v11934_v25 }
 0x8d4   :  { %8518 = vmatprep.subr.mxu1 %v11931_v0 }
 0x8d5   :  { %7959 = vst.msk [vmem:[%s11659_s16 + $0x8] sm:$0x1f] %vm5526_vm5, %v6077_v53  ;;  %v6802_v16 = vmul.f32 %v6077_v53, %v6077_v53  ;;  %v6107_v48 = vadd.f32 %v6077_v53, %v5576_v27  ;;  %9281 = vlog2.f32 %v6077_v53  ;;  %v6080_v52 = vsub.f32 %v5576_v27, %v6077_v53 }
 0x8d6   :  { %v9280_v29 = vpop.eup %9279 }
 0x8d7   :  { %v6803_v46 = vadd.f32 %v6802_v16, %v6801_v26  ;;  %v11529_v19 = vmul.f32 0.5, %v6107_v48  ;;  %v6082_v12 = vmul.f32 0.6931472, %v9280_v29  ;;  %v6816_v29 = vpack.c.bf16 %v11499_v9, %v11499_v9 }
 0x8d9   :  { %v6804_v58 = vsel %vm5526_vm5, %v6803_v46, 0.0  ;;  %v6109_v1 = vsel %vm5526_vm5, %v11529_v19, -inf  ;;  %v6169_v5 = vmul.f32 %v11529_v19, %v11478_v61 }
 0x8da   :  { %v6805_v59 = vrot.slane %v6804_v58, 4  ;;  %v6110_v41 = vrot.slane %v6109_v1, 4  ;;  %6794 = vmatmul.mubr.f32.vlgmr.msra.gmra.mrb[26].mxu1 %v11934_v25 }
 0x8db   :  { %8520 = vmatprep.mubr.msk.f32.mxu1 %vm9328_vm3, %v11931_v0  ;;  %v6170_v26 = vsel %vm5526_vm5, %v6169_v5, 0.0 }
 0x8dc   :  { %v6806_v35 = vadd.f32 %v6805_v59, %v6804_v58  ;;  %v6111_v8 = vmax.f32 %v6109_v1, %v6110_v41 }
 0x8de   :  { %v6807_v32 = vrot.slane %v6806_v35, 2  ;;  %v6112_v6 = vrot.slane %v6111_v8, 2 }
 0x8df   :  { %v9282_v39 = vpop.eup %9281 }
 0x8e0   :  { %v6808_v7 = vadd.f32 %v6807_v32, %v6806_v35  ;;  %v6113_v38 = vmax.f32 %v6111_v8, %v6112_v6  ;;  %v6084_v42 = vmul.f32 0.6931472, %v9282_v39  ;;  %v6818_v35 = vpack.c.bf16 %v11501_v13, %v11501_v13 }
 0x8e1   :  { %v6817_v8 = vpack.c.bf16 %v11495_v50, %v11495_v50 }
 0x8e2   :  { %v6809_v28 = vrot.slane %v6808_v7, 1  ;;  %v6114_v2 = vrot.slane %v6113_v38, 1  ;;  %v6085_v60 = vsub.f32 %v6082_v12, %v6084_v42 }
 0x8e4   :  { %v6810_v10 = vadd.f32 %v6809_v28, %v6808_v7  ;;  %v6115_v3 = vmax.f32 %v6113_v38, %v6114_v2  ;;  %v6086_v45 = vmul.f32 %v6085_v60, %v6080_v52 }
 0x8e6   :  { %9283 = vrsqrt.f32 %v6810_v10  ;;  %vm6118_vm7 = vcmp.eq.f32.partialorder %v11529_v19, %v6115_v3  ;;  %v6087_v54 = vsel %vm5526_vm5, %v6086_v45, 0.0 }
 0x8e7   :  { %v6119_v17 = vsel %vm6118_vm7, %v11935_v22, 5  ;;  %v6088_v49 = vrot.slane %v6087_v54, 4  ;;  %9285 = vrcp.f32 %v11447_v47  ;;  %v6165_v47 = vsel %vm5526_vm5, %v11529_v19, 0.0 }
 0x8e8   :  { %v6120_v23 = vsel %vm5526_vm5, %v6119_v17, 2147483647  ;;  %9287 = vrcp.f32 %v11462_v40  ;;  %v6819_v19 = vpack.c.bf16 %v11497_v55, %v11497_v55 }
 0x8e9   :  { %v6121_v30 = vrot.slane %v6120_v23, 4  ;;  %v6089_v57 = vadd.f32 %v6088_v49, %v6087_v54 }
 0x8eb   :  { %vm6122_vm8 = vcmp.lt.s32.totalorder %v6120_v23, %v6121_v30  ;;  %v6090_v34 = vrot.slane %v6089_v57, 2 }
 0x8ec   :  { %v6123_v21 = vsel %vm6122_vm8, %v6120_v23, %v6121_v30 }
 0x8ed   :  { %v6124_v20 = vrot.slane %v6123_v21, 2  ;;  %v6091_v43 = vadd.f32 %v6090_v34, %v6089_v57 }
 0x8ef   :  { %vm6125_vm11 = vcmp.lt.s32.totalorder %v6123_v21, %v6124_v20 }
 0x8f0   :  { %v9284_v37 = vpop.eup %9283  ;;  %v6126_v11 = vsel %vm6125_vm11, %v6123_v21, %v6124_v20 }
 0x8f1   :  { %v6814_v31 = vmul.f32 %v9284_v37, %v6077_v53  ;;  %v6812_v4 = vmul.f32 %v9284_v37, %v5576_v27  ;;  %v6127_v63 = vrot.slane %v6126_v11, 1  ;;  %v6092_v27 = vrot.slane %v6091_v43, 1  ;;  %v9286_v53 = vpop.eup %9285 }
 0x8f2   :  { %v9288_v46 = vpop.eup %9287 }
 0x8f3   :  { %v6815_v36 = vpack.c.bf16 %v6814_v31, %v6814_v31  ;;  %v6813_v56 = vpack.c.bf16 %v6812_v4, %v6812_v4  ;;  %vm6128_vm12 = vcmp.lt.s32.totalorder %v6126_v11, %v6127_v63  ;;  %v6093_v48 = vadd.f32 %v6092_v27, %v6091_v43 }
 0x8f4   :  { %v6129_v14 = vsel %vm6128_vm12, %v6126_v11, %v6127_v63 }
 0x8f5   :  { %6820 = vxpose.xlu1.c.b16.start.end [1/1] (short) (narrow) %v6815_v36, 16  ;;  %v6845_v18 = vand.u32 %v6843_v15, %v6815_v36  ;;  %6887 = vxpose.xlu0.c.b16.start.end [1/1] (short) (narrow) %v6813_v56, 16  ;;  %v6907_v33 = vand.u32 %v6843_v15, %v6813_v56  ;;  %vm6130_vm13 = vcmp.eq.s32.totalorder %v11935_v22, %v6129_v14  ;;  %v6094_v58 = vsel %vm5056_vm6, %v6093_v48, 0.0 }
 0x8f6   :  { %v7960_v44 = vsel %vm6130_vm13, 1.0, %v11931_v0 }
 0x8f7   :  { %8507 = vmatpush3.bf16.msra.mxu0 %v6845_v18  ;;  %v6134_v16 = vmul.f32 %v9286_v53, %v7960_v44  ;;  %v6150_v1 = vmul.f32 %v9288_v46, %v7960_v44 }
 0x8f8   :  { %8512 = vmatprep.subr.bf16.mxu0 %v11931_v0 }
 0x8f9   :  { %v6135_v40 = vsel %vm5526_vm5, %v6134_v16, 0.0  ;;  %v6151_v61 = vsel %vm5526_vm5, %v6150_v1, 0.0  ;;  %v11936_v1 = vld [vmem:[#allocation9_spill] sm:$0xff] }
 0x902   :  { %6171 = vadd.xlane.f32.xlu0 %v6170_v26  ;;  %6166 = vadd.xlane.f32.xlu1 %v6165_v47 }
 0x906   :  { %6136 = vadd.xlane.f32.xlu0 %v6135_v40  ;;  %6095 = vadd.xlane.f32.xlu1 %v6094_v58 }
 0x90a   :  { %6152 = vadd.xlane.f32.xlu1 %v6151_v61 }
 0x95b   :  { %v6828_v59 = vpop.trf.xlu1  ;;  %v6895_v41 = vpop.trf.xlu0 }
 0x95c   :  { %8509 = vmatmul.mubr.msk.bf16.vlgmr.msra.gmra.mrb[28].mxu0 %vm6836_vm14, %v6828_v59 }
 0x95d   :  { %8513 = vmatpush3.bf16.msra.mxu0 %v6907_v33  ;;  %8514 = vmatprep.mubr.msk.bf16.mxu0 %vm9328_vm3, %v11931_v0 }
 0x95e   :  { %6949 = vmatprep.subr.bf16.mxu0 %v6819_v19  ;;  %v11937_v19 = vld [vmem:[#allocation7_spill] sm:$0xff] }
 0x968   :  { %8515 = vmatmul.mubr.msk.bf16.vlgmr.msra.gmra.mrb[28].mxu0 %vm6836_vm14, %v6895_v41 }
 0x969   :  { %6950 = vmatpush1.bf16.xpose.msra.mxu0 %v6818_v35  ;;  %6981 = vmatprep.mubr.bf16.mxu0 %v6817_v8  ;;  %v11938_v35 = vld [vmem:[#allocation8_spill] sm:$0xff] }
 0x970   :  { %6982 = vmatmul.mubr.bf16.vlgmr.msra.gmra.mrb[32].mxu0 %v6816_v29 }
 0x98f   :  { %v6167_v55 = vpop.xlane.xlu1 %6166  ;;  %v6172_v32 = vpop.xlane.xlu0 %6171 }
 0x990   :  { %v6168_v6 = vadd.f32 1.0, %v6167_v55 }
 0x992   :  { %9289 = vrcp.f32 %v6168_v6 }
 0x993   :  { %v6096_v39 = vpop.xlane.xlu1 %6095  ;;  %v6137_v7 = vpop.xlane.xlu0 %6136 }
 0x994   :  { %v6097_v38 = vrot.slane %v6096_v39, 4  ;;  %v6138_v12 = vrot.slane %v6137_v7, 4 }
 0x996   :  { %v6098_v42 = vadd.f32 %v6097_v38, %v6096_v39  ;;  %v6139_v13 = vadd.f32 %v6138_v12, %v6137_v7 }
 0x997   :  { %v6153_v28 = vpop.xlane.xlu1 %6152 }
 0x998   :  { %v6099_v2 = vrot.slane %v6098_v42, 2  ;;  %v6140_v50 = vrot.slane %v6139_v13, 2  ;;  %v6154_v60 = vrot.slane %v6153_v28, 4 }
 0x99a   :  { %v6155_v10 = vadd.f32 %v6154_v60, %v6153_v28  ;;  %v6100_v3 = vadd.f32 %v6099_v2, %v6098_v42  ;;  %v6141_v52 = vadd.f32 %v6140_v50, %v6139_v13 }
 0x99c   :  { %v9290_v45 = vpop.eup %9289  ;;  %v6156_v9 = vrot.slane %v6155_v10, 2  ;;  %v6101_v22 = vrot.slane %v6100_v3, 1  ;;  %v6142_v17 = vrot.slane %v6141_v52, 1 }
 0x99d   :  { %v6174_v23 = vmul.f32 %v9290_v45, %v6172_v32 }
 0x99e   :  { %v6102_v30 = vadd.f32 %v6101_v22, %v6100_v3  ;;  %v6143_v54 = vadd.f32 %v6142_v17, %v6141_v52  ;;  %v6157_v21 = vadd.f32 %v6156_v9, %v6155_v10 }
 0x99f   :  { %v6175_v20 = vsub.f32 %v6174_v23, %v11489_v24 }
 0x9a0   :  { %9225 = vpush %v6102_v30  ;;  %v6158_v49 = vrot.slane %v6157_v21, 1 }
 0x9a1   :  { %9227 = vpush %v6143_v54  ;;  %v6176_v51 = vmul.f32 %v6175_v20, %v6175_v20  ;;  %v11939_v20 = vlaneseq }
 0x9a2   :  { %v6159_v62 = vadd.f32 %v6158_v49, %v6157_v21 }
 0x9a3   :  { %v6178_v37 = vsel %vm6177_vm15, %v6176_v51, 0.0  ;;  %v7907_v49 = vand.u32 127, %v11939_v20 }
 0x9a4   :  { %6179 = vadd.xlane.f32.xlu0 %v6178_v37  ;;  %9229 = vpush %v6159_v62 }
 0x9a5   :  { %vm7919_vm4 = vcmp.eq.s32.totalorder %v7907_v49, 2 }
 0x9ad   :  { %v11567_v4 = vpop.f32.mrb[26].mxu1 }
 0x9ae   :  { %v6797_v63 = vpop.f32.mrb[27].mxu1  ;;  %v6799_v13 = vmul.f32 1.442695, %v11567_v4 }
 0x9d1   :  { %s9226_s16 = spop %9225 }
 0x9d2   :  { %s6106_s27 = smul.f32 0.125, %s9226_s16  ;;  %s9228_s11 = spop %9227 }
 0x9d3   :  { %s6147_s7 = smul.f32 0.025, %s9228_s11 }
 0x9d5   :  { %s11565_s28 = sadd.f32 %s6147_s7, %s6106_s27  ;;  %s11584_s9 = spop %9229 }
 0x9d6   :  { %s6163_s4 = smul.f32 0.025, %s11584_s9 }
 0x9d8   :  { %s6164_s29 = sadd.f32 %s6163_s4, %s11565_s28 }
 0x9da   :  { %v7911_v62 = vstv %s6164_s29 }
 0xa31   :  { %v6180_v11 = vpop.xlane.xlu0 %6179 }
 0xa32   :  { %v6181_v31 = vrot.slane %v6180_v11, 4 }
 0xa34   :  { %v6182_v24 = vadd.f32 %v6181_v31, %v6180_v11  ;;  %v7973_v11 = vsel %vm7919_vm4, 1.0, %v11931_v0 }
 0xa36   :  { %v6183_v57 = vrot.slane %v6182_v24, 2 }
 0xa38   :  { %v6184_v15 = vadd.f32 %v6183_v57, %v6182_v24 }
 0xa3a   :  { %v6185_v36 = vrot.slane %v6184_v15, 1 }
 0xa3b   :  { %v6943_v56 = vpop.f32.mrb[28].mxu0 }
 0xa3c   :  { %v8516_v18 = vpop.f32.mrb[29].mxu0  ;;  %v6186_v33 = vadd.f32 %v6185_v36, %v6184_v15  ;;  %v6989_v43 = vsub.f32 1.0, %v6943_v56 }
 0xa3d   :  { %v6946_v34 = vpop.f32.mrb[30].mxu0 }
 0xa3e   :  { %9231 = vpush %v6186_v33  ;;  %v8517_v14 = vpop.f32.mrb[31].mxu0 }
 0xa43   :  { %v6983_v5 = vpop.f32.mrb[32].mxu0 }
 0xa44   :  { %v6990_v27 = vadd.f32 %v6989_v43, %v6983_v5  ;;  %v6985_v44 = vpop.f32.mrb[33].mxu0 }
 0xa45   :  { %v6986_v53 = vpop.f32.mrb[34].mxu0 }
 0xa46   :  { %v6991_v26 = vmul.f32 1.442695, %v6990_v27  ;;  %v6987_v47 = vpop.f32.mrb[35].mxu0 }
 0xa48   :  { %9291 = vpow2.f32 %v6991_v26 }
 0xa52   :  { %v9292_v16 = vpop.eup %9291 }
 0xa53   :  { %v6994_v48 = vsel %vm772_vm1, %v9292_v16, 0  ;;  %v7443_v8 = vand.u32 4294901760, %v9292_v16 }
 0xa54   :  { %v6997_v46 = vand.u32 4294901760, %v6994_v48 }
 0xa55   :  { %v7520_v32 = vsub.f32 %v9292_v16, %v7443_v8 }
 0xa56   :  { %8519 = vmatpush3.xpose.msra.mxu1 %v6997_v46  ;;  %v7074_v40 = vsub.f32 %v6994_v48, %v6997_v46 }
 0xa57   :  { %8523 = vmatprep.subr.mxu1 %v11931_v0  ;;  %v7521_v38 = vand.u32 4294901760, %v7520_v32 }
 0xa58   :  { %v7075_v58 = vand.u32 4294901760, %v7074_v40 }
 0xa59   :  { %8521 = vmatmul.mubr.f32.vlgmr.msra.gmra.mrb[28].mxu1 %v11936_v1  ;;  %v7522_v12 = vsub.f32 %v7520_v32, %v7521_v38 }
 0xa5a   :  { %v7076_v61 = vsub.f32 %v7074_v40, %v7075_v58  ;;  %8525 = vmatprep.mubr.msk.f32.mxu1 %vm9328_vm3, %v11931_v0 }
 0xa5b   :  { %v7523_v42 = vand.u32 4294901760, %v7522_v12 }
 0xa5c   :  { %v7077_v59 = vand.u32 4294901760, %v7076_v61 }
 0xa5e   :  { %8524 = vmatpush3.xpose.msra.mxu1 %v7077_v59 }
 0xa5f   :  { %8528 = vmatprep.subr.mxu1 %v11931_v0 }
 0xa61   :  { %8526 = vmatmul.mubr.msk.f32.vlgmr.msra.gmra.mrb[28].mxu1 %vm772_vm1, %v11934_v25 }
 0xa62   :  { %8529 = vmatpush3.xpose.msra.mxu1 %v7074_v40  ;;  %8530 = vmatprep.mubr.msk.f32.mxu1 %vm9328_vm3, %v11931_v0 }
 0xa63   :  { %8533 = vmatprep.subr.mxu1 %v11931_v0 }
 0xa69   :  { %8531 = vmatmul.mubr.f32.vlgmr.msra.gmra.mrb[28].mxu1 %v11937_v19 }
 0xa6a   :  { %8534 = vmatpush3.xpose.msra.mxu1 %v6997_v46  ;;  %8535 = vmatprep.mubr.msk.f32.mxu1 %vm9328_vm3, %v11931_v0 }
 0xa6b   :  { %8538 = vmatprep.subr.mxu1 %v11931_v0 }
 0xa6f   :  { %s9232_s10 = spop %9231 }
 0xa70   :  { %v6188_v41 = vstv %s9232_s10 }
 0xa71   :  { %9293 = vrsqrt.f32 %v6188_v41  ;;  %8536 = vmatmul.mubr.f32.vlgmr.msra.gmra.mrb[28].mxu1 %v11938_v35  ;;  %vm6191_vm0 = vcmp.eq.f32.partialorder %v6188_v41, inf  ;;  %v6194_v6 = vand.u32 2147483648, %v6188_v41  ;;  %vm6193_vm2 = vcmp.eq.f32.partialorder %v6188_v41, 0.0 }
 0xa72   :  { %8539 = vmatpush3.xpose.msra.mxu1 %v7075_v58  ;;  %8540 = vmatprep.mubr.msk.f32.mxu1 %vm9328_vm3, %v11931_v0  ;;  %9295 = vpow2.f32 %v6799_v13 }
 0xa73   :  { %8543 = vmatprep.subr.mxu1 %v11931_v0 }
 0xa79   :  { %8541 = vmatmul.mubr.msk.f32.vlgmr.msra.gmra.mrb[28].mxu1 %vm772_vm1, %v11934_v25 }
 0xa7a   :  { %8544 = vmatpush3.xpose.msra.mxu1 %v6997_v46  ;;  %8545 = vmatprep.mubr.msk.f32.mxu1 %vm9328_vm3, %v11931_v0 }
 0xa7b   :  { %v9294_v29 = vpop.eup %9293  ;;  %8548 = vmatprep.subr.mxu1 %v11931_v0 }
 0xa7c   :  { %v6190_v55 = vmul.f32 %v9294_v29, %v6188_v41  ;;  %v9296_v28 = vpop.eup %9295 }
 0xa7d   :  { %v7888_v2 = vmul.f32 8.0, %v9296_v28 }
 0xa7e   :  { %v6192_v39 = vsel %vm6191_vm0, %v6188_v41, %v6190_v55 }
 0xa7f   :  { %v6195_v7 = vsel %vm6193_vm2, %v6194_v6, %v6192_v39  ;;  %9297 = vrcp.f32 %v7888_v2 }
 0xa80   :  { %9233 = vpush %v6195_v7 }
 0xa81   :  { %8546 = vmatmul.mubr.msk.f32.vlgmr.msra.gmra.mrb[28].mxu1 %vm772_vm1, %v11934_v25 }
 0xa82   :  { %8549 = vmatpush3.msra.mxu1 %v7443_v8  ;;  %8550 = vmatprep.mubr.msk.f32.mxu1 %vm9328_vm3, %v11931_v0 }
 0xa83   :  { %8553 = vmatprep.subr.mxu1 %v11931_v0 }
 0xa89   :  { %8551 = vmatmul.mubr.f32.vlgmr.msra.gmra.mrb[28].mxu1 %v11936_v1  ;;  %v9298_v50 = vpop.eup %9297 }
 0xa8a   :  { %8554 = vmatpush3.msra.mxu1 %v7523_v42  ;;  %8555 = vmatprep.mubr.msk.f32.mxu1 %vm9328_vm3, %v11931_v0 }
 0xa8b   :  { %8558 = vmatprep.subr.mxu1 %v11931_v0 }
 0xa91   :  { %8556 = vmatmul.mubr.msk.f32.vlgmr.msra.gmra.mrb[28].mxu1 %vm772_vm1, %v11934_v25 }
 0xa92   :  { %8559 = vmatpush3.msra.mxu1 %v7520_v32  ;;  %8560 = vmatprep.mubr.msk.f32.mxu1 %vm9328_vm3, %v11931_v0 }
 0xa93   :  { %8563 = vmatprep.subr.mxu1 %v11931_v0 }
 0xa99   :  { %8561 = vmatmul.mubr.f32.vlgmr.msra.gmra.mrb[28].mxu1 %v11937_v19 }
 0xa9a   :  { %8564 = vmatpush3.msra.mxu1 %v7443_v8  ;;  %8565 = vmatprep.mubr.msk.f32.mxu1 %vm9328_vm3, %v11931_v0 }
 0xa9b   :  { %8568 = vmatprep.subr.mxu1 %v11931_v0 }
 0xaa1   :  { %8566 = vmatmul.mubr.f32.vlgmr.msra.gmra.mrb[28].mxu1 %v11938_v35 }
 0xaa2   :  { %8569 = vmatpush3.msra.mxu1 %v7521_v38  ;;  %8570 = vmatprep.mubr.msk.f32.mxu1 %vm9328_vm3, %v11931_v0 }
 0xaa3   :  { %8573 = vmatprep.subr.mxu1 %v11931_v0 }
 0xaa9   :  { %8571 = vmatmul.mubr.msk.f32.vlgmr.msra.gmra.mrb[28].mxu1 %vm772_vm1, %v11934_v25 }
 0xaaa   :  { %8574 = vmatpush3.msra.mxu1 %v7443_v8  ;;  %8575 = vmatprep.mubr.msk.f32.mxu1 %vm9328_vm3, %v11931_v0  ;;  %vm7913_vm3 = vcmp.eq.s32.totalorder %v7907_v49, 1 }
 0xaab   :  { %v7972_v37 = vsel %vm7913_vm3, 1.0, %v11931_v0 }
 0xab1   :  { %8576 = vmatmul.mubr.msk.f32.vlgmr.msra.gmra.mrb[28].mxu1 %vm772_vm1, %v11934_v25  ;;  %vm7908_vm1 = vcmp.eq.s32.totalorder %v7907_v49, 0  ;;  %s9234_s5 = spop %9233 }
 0xab2   :  { %v7971_v51 = vsel %vm7908_vm1, 1.0, %v11931_v0  ;;  %v7922_v31 = vstv %s9234_s5 }
 0xab3   :  { %v7912_v24 = vmul.f32 %v7971_v51, %v7911_v62  ;;  %v7923_v57 = vmul.f32 %v7973_v11, %v7922_v31 }
 0xb84   :  { %v7884_v60 = vpop.f32.mrb[28].mxu1 }
 0xb85   :  { %v7890_v10 = vmul.f32 %v9298_v50, %v7884_v60  ;;  %v8577_v3 = vpop.f32.mrb[29].mxu1 }
 0xb87   :  { %9299 = vlog2.f32 %v7890_v10 }
 0xb91   :  { %v9300_v52 = vpop.eup %9299 }
 0xb92   :  { %v7892_v45 = vmul.f32 0.6931472, %v9300_v52 }
 0xb94   :  { %v7893_v9 = vsel %vm5056_vm6, %v7892_v45, 0.0 }
 0xb95   :  { %7894 = vadd.xlane.f32.xlu1 %v7893_v9 }
 0xc22   :  { %v7895_v22 = vpop.xlane.xlu1 %7894 }
 0xc23   :  { %v7896_v25 = vrot.slane %v7895_v22, 4 }
 0xc25   :  { %v7897_v17 = vadd.f32 %v7896_v25, %v7895_v22 }
 0xc27   :  { %v7898_v23 = vrot.slane %v7897_v17, 2 }
 0xc29   :  { %v7899_v30 = vadd.f32 %v7898_v23, %v7897_v17 }
 0xc2b   :  { %v7900_v54 = vrot.slane %v7899_v30, 1 }
 0xc2d   :  { %v7901_v21 = vadd.f32 %v7900_v54, %v7899_v30 }
 0xc2f   :  { %9235 = vpush %v7901_v21 }
 0xc60   :  { %s9236_s0 = spop %9235 }
 0xc61   :  { %s7905_s30 = smul.f32 0.125, %s9236_s0 }
 0xc63   :  { %v7916_v4 = vstv %s7905_s30 }
 0xc64   :  { %v7917_v63 = vmul.f32 %v7972_v37, %v7916_v4 }
 0xc66   :  { %v7918_v15 = vadd.f32 %v7917_v63, %v7912_v24 }
 0xc68   :  { %v7924_v36 = vadd.f32 %v7923_v57, %v7918_v15 }
 0xc6a   :  { %7925 = vst [vmem:[#allocation2] sm:$0x1] %v7924_v36 }
 0xc6b   :  { %9312 = shalt.err (!%p9309_p4)
}
 0xc6c   :  { %s9313_s23 = scalar_lea.hbm %s11660_s17, 16 }
 0xc6d   :  { %p9314_p5 = scmp.ne.s32.totalorder %s11660_s17, %s9313_s23  ;;  %p9317_p6 = scmp.lt.u32.totalorder %s9313_s23, %s11660_s17 }
 0xc6f   :  { %p9319_p7 = pnand %p9317_p6, %p9314_p5 }
 0xc71   :  { %9322 = shalt.err (!%p9319_p7)
}
 0xc72   :  { %7937 = dma.vmem_to_hbm [thread:$0]  %s7935_s19, 16, %s11660_s17, [#allocation3]  }
 0xc73   :  { %9323 = dma.done.wait [#allocation3], 16  }
 0xc74   :  { %9324 = vsyncadd [#allocation3], 4294967280 }
 0xc75   :  { %7943 = vsyncpa [#allocation3], 1 }

</bundles_post_ra>
